<compile_context>
chip_gen: v7x
topology: tpu7x:2x2x1
jax: 0.10.0
libtpu: 0.0.40
codegen_flags: <defaults>
</compile_context>

<pallas_src>
import functools

import jax
import jax.numpy as jnp
import numpy as np
from jax.experimental import pallas as pl
from jax.experimental.pallas import tpu as pltpu


def _round_up(x, m):
    return ((x + m - 1) // m) * m


# ----------------------------------------------------------------------------
# Kernel 1: grouped 3x3 conv (in-kernel im2col) -> * trans_weight -> spatial
#           mean.  grid = (batch_blocks, row_tiles); row tiles are the
#           reduction (accumulator) axis.
# ----------------------------------------------------------------------------
def _code_kernel(x_ref, w_ref, tw_ref, out_ref, acc_ref, *, tb, th, wp, c, inv_hw):
    # x_ref : (tb, th+2, wp, c)  bf16  padded NHWC activation rows (2-row halo)
    # w_ref : (9, c, c)          bf16  per-tap block-diagonal conv weight
    # tw_ref: (th, wp, c)        bf16  zero-padded OrthorTransform weight
    # out   : (tb, 1, c)         f32   per-batch channel code
    # acc   : (tb, c)            f32   accumulator scratch
    ri = pl.program_id(1)

    @pl.when(ri == 0)
    def _():
        acc_ref[...] = jnp.zeros_like(acc_ref)

    x = x_ref[...]                                   # one VMEM load, sliced below
    m = tb * th * wp

    # 9 taps: ky handled by a free leading-dim slice, kx handled after the
    # matmul (shift commutes with the per-position contraction over channels).
    parts = [None, None, None]                       # one f32 partial per kx
    for ky in range(3):
        rows = x[:, ky:ky + th].reshape(m, c)        # free merge (wp % 16 == 0)
        for kx in range(3):
            mm = jnp.dot(rows, w_ref[ky * 3 + kx],
                         preferred_element_type=jnp.float32)   # MXU, f32 acc
            parts[kx] = mm if parts[kx] is None else parts[kx] + mm

    # kx shift via sublane roll (XLU); wrapped / cross-row junk lands only in
    # columns where the zero-padded transform weight is 0.
    conv = parts[1]
    conv = conv + pltpu.roll(parts[0], shift=1, axis=0)
    conv = conv + pltpu.roll(parts[2], shift=m - 1, axis=0)

    tw = tw_ref[...].reshape(th * wp, c).astype(jnp.float32)
    prod = conv.reshape(tb, th * wp, c) * tw[None]
    acc_ref[...] += jnp.sum(prod, axis=1)            # XLU reduce over the tile

    @pl.when(ri == pl.num_programs(1) - 1)
    def _():
        out_ref[:, 0, :] = acc_ref[...] * inv_hw     # spatial mean (bias added
                                                     # in the wrapper)


# ----------------------------------------------------------------------------
# Kernel 2: both cos_similarity(weight.view(groups, -1)) losses, fused.
# ----------------------------------------------------------------------------
def _cos_pair_kernel(wc_ref, wt_ref, oc_ref, ot_ref):
    def loss(w):
        g = w.shape[0]
        sumsq = jnp.sum(w * w, axis=-1, keepdims=True)
        wn = w * jax.lax.rsqrt(jnp.maximum(sumsq, 1e-12))    # EUP rsqrt, eps-safe
        gram = jax.lax.dot_general(wn, wn, (((1,), (1,)), ((), ())),
                                   preferred_element_type=jnp.float32)  # (G, G)
        sq = gram * gram
        ii = jax.lax.broadcasted_iota(jnp.int32, (g, g), 0)
        jj = jax.lax.broadcasted_iota(jnp.int32, (g, g), 1)
        sq = jnp.where(ii == jj, 0.0, sq)                    # fill_diagonal_(0)
        return jnp.sum(sq, keepdims=True) * (1.0 / (g * g))

    oc_ref[...] = loss(wc_ref[...])
    ot_ref[...] = loss(wt_ref[...])


# ----------------------------------------------------------------------------
# Chip-aware tile / VMEM sizing
# ----------------------------------------------------------------------------
def _vmem_bytes(tb, th, wp, c):
    m = tb * th * wp
    x_blk = tb * (th + 2) * wp * c * 2       # bf16 activation block
    tw_blk = th * wp * c * 2                 # bf16 transform block
    w_blk = 9 * c * c * 2                    # bf16 tap weights (invariant)
    out_blk = tb * c * 4
    dbuf = 2 * (x_blk + tw_blk + w_blk + out_blk)   # BlockSpec double-buffering
    acc = tb * c * 4
    temps = x_blk + 5 * m * c * 4            # loaded x value + f32 partials/conv
    return dbuf + acc + temps


def _pick_tiles(batch, height, wp, c, budget):
    b_divs = [d for d in range(1, batch + 1) if batch % d == 0]
    h_divs = [d for d in range(1, height + 1) if height % d == 0]
    best = None
    for tb in b_divs:
        for th in h_divs:
            if _vmem_bytes(tb, th, wp, c) <= budget:
                key = (tb * th, th, tb)      # maximize M; prefer tall tiles
                if best is None or key > best[0]:
                    best = (key, tb, th)
    if best is None:
        return 1, 1
    return best[1], best[2]


# ----------------------------------------------------------------------------
# Wrapper: CodeReduction.forward
# ----------------------------------------------------------------------------
@functools.partial(jax.jit, static_argnames=("groups", "force_tiles"))
def code_reduction_forward(x, conv_w, conv_b, trans_w, *, groups, force_tiles=None):
    B, C, H, W = x.shape
    G = groups
    cg = C // G
    HW = H * W
    Wp = _round_up(W + 2, 16)   # lane-friendly padded width (bf16 sublane tile)

    # ---- chip-aware VMEM budget ---------------------------------------------
    try:
        vmem_cap = int(pltpu.get_tpu_info().vmem_capacity_bytes)
    except Exception:
        vmem_cap = 64 * 1024 * 1024          # conservative (v7x) fallback
    if force_tiles is not None:
        tb, th = force_tiles
    else:
        tb, th = _pick_tiles(B, H, Wp, C, int(0.55 * vmem_cap))
    assert B % tb == 0 and H % th == 0, "tiles must divide (B, H)"
    n_b, n_r = B // tb, H // th
    vmem_limit = int(min(0.9 * vmem_cap,
                         max(1.5 * _vmem_bytes(tb, th, Wp, C), 32 * 1024 * 1024)))
    # TODO(synk): when B == 1 on v7x, add a second parallel axis so both
    #             TensorCores are used.

    # ---- activation: cast to bf16 FIRST, then NHWC + zero pad ----------------
    x_nhwc = jnp.transpose(x.astype(jnp.bfloat16), (0, 2, 3, 1))   # (B, H, W, C)
    x_pad = jnp.pad(x_nhwc, ((0, 0), (1, 1), (1, Wp - W - 1), (0, 0)))
    if n_r == 1:
        x_tiles = x_pad                                            # (B, H+2, Wp, C)
    else:
        # row tiles with a 2-row halo, row-tile-major so a batch chunk is one block
        x_tiles = jnp.stack(
            [x_pad[:, r * th:r * th + th + 2] for r in range(n_r)], axis=0)
        x_tiles = x_tiles.reshape(n_r * B, th + 2, Wp, C)

    # ---- per-tap block-diagonal conv weight (9, C, C), bf16 ------------------
    w_r = conv_w.reshape(G, cg, cg, 3, 3)                          # [g, oi, i, ky, kx]
    w_perm = jnp.transpose(w_r, (3, 4, 0, 2, 1)).reshape(9, G, cg, cg)  # [k, g, i, oi]
    eye = jnp.eye(G, dtype=conv_w.dtype)
    w_taps = jnp.einsum("kgio,gh->kgiho", w_perm, eye).reshape(9, C, C)
    w_taps = w_taps.astype(jnp.bfloat16)

    # ---- transform weight: zero-padded to Wp (masks junk columns), bf16 ------
    tw_hwc = jnp.transpose(trans_w[0], (1, 2, 0))                  # (H, W, C)
    tw_pad = jnp.pad(tw_hwc, ((0, 0), (1, Wp - W - 1), (0, 0))).astype(jnp.bfloat16)

    # ---- bias hoisted out of the spatial loop: b * mean_hw(tw) ---------------
    bias_corr = conv_b * jnp.mean(trans_w[0], axis=(1, 2))         # (C,) f32

    kernel = functools.partial(_code_kernel, tb=tb, th=th, wp=Wp, c=C,
                               inv_hw=1.0 / HW)
    out = pl.pallas_call(
        kernel,
        out_shape=jax.ShapeDtypeStruct((B, 1, C), jnp.float32),
        grid=(n_b, n_r),
        in_specs=[
            pl.BlockSpec((tb, th + 2, Wp, C),
                         lambda bi, ri: (ri * n_b + bi, 0, 0, 0)),
            pl.BlockSpec((9, C, C), lambda bi, ri: (0, 0, 0)),
            pl.BlockSpec((th, Wp, C), lambda bi, ri: (ri, 0, 0)),
        ],
        out_specs=pl.BlockSpec((tb, 1, C), lambda bi, ri: (bi, 0, 0)),
        scratch_shapes=[pltpu.VMEM((tb, C), jnp.float32)],
        compiler_params=pltpu.CompilerParams(
            dimension_semantics=("parallel", "arbitrary"),
            vmem_limit_bytes=vmem_limit),
    )(x_tiles, w_taps, tw_pad)
    pred_c = out[:, 0, :] + bias_corr[None, :]

    # ---- Pallas: both orthogonality losses in one launch ---------------------
    loss_c, loss_t = pl.pallas_call(
        _cos_pair_kernel,
        out_shape=(jax.ShapeDtypeStruct((1, 1), jnp.float32),
                   jax.ShapeDtypeStruct((1, 1), jnp.float32)),
        in_specs=[pl.BlockSpec(memory_space=pltpu.MemorySpace.VMEM),
                  pl.BlockSpec(memory_space=pltpu.MemorySpace.VMEM)],
        out_specs=(pl.BlockSpec(memory_space=pltpu.MemorySpace.VMEM),
                   pl.BlockSpec(memory_space=pltpu.MemorySpace.VMEM)),
    )(conv_w.reshape(G, -1), trans_w.reshape(G, -1))

    return pred_c, loss_c[0, 0], loss_t[0, 0]


# ----------------------------------------------------------------------------
# Pure-JAX reference (for sanity checking)
# ----------------------------------------------------------------------------
def _reference(x, conv_w, conv_b, trans_w, groups):
    out = jax.lax.conv_general_dilated(
        x, conv_w, window_strides=(1, 1), padding=((1, 1), (1, 1)),
        dimension_numbers=("NCHW", "OIHW", "NCHW"), feature_group_count=groups)
    out = out + conv_b[None, :, None, None]
    pred = (out * trans_w).mean(axis=-1).mean(axis=-1)

    def cos(wv):
        wn = wv / jnp.linalg.norm(wv, axis=-1, keepdims=True)
        c = (wn @ wn.T) ** 2
        c = c * (1.0 - jnp.eye(wv.shape[0]))
        return c.mean()

    return pred, cos(conv_w.reshape(groups, -1)), cos(trans_w.reshape(groups, -1))


if __name__ == "__main__":
    # CodeReduction(c_dim=8, feat_hw=16, blocks=4, prob=False)
    B, C, H, W = 2, 8, 16, 16
    G = 4

    key = jax.random.PRNGKey(0)
    k1, k2, k3, k4 = jax.random.split(key, 4)
    x = jax.random.normal(k1, (B, C, H, W), jnp.float32)
    conv_w = jax.random.normal(k2, (C, C // G, 3, 3), jnp.float32) * 0.2
    conv_b = jax.random.normal(k3, (C,), jnp.float32) * 0.1
    trans_w = jax.random.normal(k4, (1, C, H, W), jnp.float32)

    ref_pred, ref_lc, ref_lt = _reference(x, conv_w, conv_b, trans_w, G)

    # Default (auto-picked) tiling: whole batch / whole image in one block.
    pred_c, loss_conv, loss_trans = code_reduction_forward(
        x, conv_w, conv_b, trans_w, groups=G)
    jax.block_until_ready((pred_c, loss_conv, loss_trans))
    np.testing.assert_allclose(np.asarray(pred_c), np.asarray(ref_pred),
                               rtol=5e-2, atol=5e-2)
    np.testing.assert_allclose(float(loss_conv), float(ref_lc),
                               rtol=5e-2, atol=5e-2)
    np.testing.assert_allclose(float(loss_trans), float(ref_lt),
                               rtol=5e-2, atol=5e-2)

    # Forced small tiles: exercises the (batch-block, row-tile) accumulator path.
    pred_c2, _, _ = code_reduction_forward(
        x, conv_w, conv_b, trans_w, groups=G, force_tiles=(1, 8))
    jax.block_until_ready(pred_c2)
    np.testing.assert_allclose(np.asarray(pred_c2), np.asarray(ref_pred),
                               rtol=5e-2, atol=5e-2)

    assert pred_c.shape == (B, C)
    print("KERNEL_OK")
</pallas_src>

<mosaic_0001>
module attributes {stable_mosaic.version = 11 : i64} {
  func.func @_cos_pair_kernel(%arg0: memref<4x36xf32, #tpu.memory_space<vmem>>, %arg1: memref<4x512xf32, #tpu.memory_space<vmem>>, %arg2: memref<1x1xf32, #tpu.memory_space<vmem>>, %arg3: memref<1x1xf32, #tpu.memory_space<vmem>>) attributes {dimension_semantics = [], scalar_prefetch = 0 : i64, scratch_operands = 0 : i64, tpu.core_type = #tpu.core_type<tc>} {
    %c0 = arith.constant 0 : index
    %c0_0 = arith.constant 0 : index
    %0 = vector.load %arg0[%c0, %c0_0] : memref<4x36xf32, #tpu.memory_space<vmem>>, vector<4x36xf32>
    %1 = arith.mulf %0, %0 : vector<4x36xf32>
    %cst = arith.constant dense<0.000000e+00> : vector<4xf32>
    %2 = vector.multi_reduction <add>, %1, %cst [1] : vector<4x36xf32> to vector<4xf32>
    %3 = vector.shape_cast %2 : vector<4xf32> to vector<4x1xf32>
    %cst_1 = arith.constant 9.99999996E-13 : f32
    %4 = vector.broadcast %cst_1 : f32 to vector<4x1xf32>
    %5 = arith.maximumf %3, %4 : vector<4x1xf32>
    %6 = math.rsqrt %5 : vector<4x1xf32>
    %7 = vector.broadcast %6 : vector<4x1xf32> to vector<4x36xf32>
    %8 = arith.mulf %0, %7 : vector<4x36xf32>
    %cst_2 = arith.constant dense<0.000000e+00> : vector<4x4xf32>
    %9 = tpu.matmul %8, %8, %cst_2 {dimension_numbers = #tpu.dot_dimension_numbers<[1], [1], [0], [0], [0, 0, 1, 0], [], []>} : vector<4x36xf32>, vector<4x36xf32>, vector<4x4xf32> -> vector<4x4xf32>
    %10 = arith.mulf %9, %9 : vector<4x4xf32>
    %11 = tpu.iota {dimensions = array<i32: 0>} : vector<4x4xi32>
    %12 = tpu.iota {dimensions = array<i32: 1>} : vector<4x4xi32>
    %13 = arith.cmpi eq, %11, %12 : vector<4x4xi32>
    %cst_3 = arith.constant 0.000000e+00 : f32
    %14 = vector.broadcast %cst_3 : f32 to vector<4x4xf32>
    %15 = arith.select %13, %14, %10 : vector<4x4xi1>, vector<4x4xf32>
    %16 = vector.shape_cast %15 : vector<4x4xf32> to vector<1x4x4xf32>
    %cst_4 = arith.constant dense<0.000000e+00> : vector<1xf32>
    %17 = vector.multi_reduction <add>, %16, %cst_4 [1, 2] : vector<1x4x4xf32> to vector<1xf32>
    %18 = vector.shape_cast %17 : vector<1xf32> to vector<1x1x1xf32>
    %19 = vector.extract %18[0, 0, 0] : f32 from vector<1x1x1xf32>
    %20 = vector.broadcast %19 : f32 to vector<1x1xf32>
    %cst_5 = arith.constant 6.250000e-02 : f32
    %21 = vector.broadcast %cst_5 : f32 to vector<1x1xf32>
    %22 = arith.mulf %20, %21 : vector<1x1xf32>
    %c0_6 = arith.constant 0 : index
    %c0_7 = arith.constant 0 : index
    %23 = vector.load %arg2[%c0_6, %c0_7] : memref<1x1xf32, #tpu.memory_space<vmem>>, vector<1x1xf32>
    tpu.vector_store %arg2[%c0_6, %c0_7], %22 {strides = array<i32>} : memref<1x1xf32, #tpu.memory_space<vmem>>, vector<1x1xf32>,
    %c0_8 = arith.constant 0 : index
    %c0_9 = arith.constant 0 : index
    %24 = vector.load %arg1[%c0_8, %c0_9] : memref<4x512xf32, #tpu.memory_space<vmem>>, vector<4x512xf32>
    %25 = arith.mulf %24, %24 : vector<4x512xf32>
    %cst_10 = arith.constant dense<0.000000e+00> : vector<4xf32>
    %26 = vector.multi_reduction <add>, %25, %cst_10 [1] : vector<4x512xf32> to vector<4xf32>
    %27 = vector.shape_cast %26 : vector<4xf32> to vector<4x1xf32>
    %cst_11 = arith.constant 9.99999996E-13 : f32
    %28 = vector.broadcast %cst_11 : f32 to vector<4x1xf32>
    %29 = arith.maximumf %27, %28 : vector<4x1xf32>
    %30 = math.rsqrt %29 : vector<4x1xf32>
    %31 = vector.broadcast %30 : vector<4x1xf32> to vector<4x512xf32>
    %32 = arith.mulf %24, %31 : vector<4x512xf32>
    %cst_12 = arith.constant dense<0.000000e+00> : vector<4x4xf32>
    %33 = tpu.matmul %32, %32, %cst_12 {dimension_numbers = #tpu.dot_dimension_numbers<[1], [1], [0], [0], [0, 0, 1, 0], [], []>} : vector<4x512xf32>, vector<4x512xf32>, vector<4x4xf32> -> vector<4x4xf32>
    %34 = arith.mulf %33, %33 : vector<4x4xf32>
    %35 = tpu.iota {dimensions = array<i32: 0>} : vector<4x4xi32>
    %36 = tpu.iota {dimensions = array<i32: 1>} : vector<4x4xi32>
    %37 = arith.cmpi eq, %35, %36 : vector<4x4xi32>
    %cst_13 = arith.constant 0.000000e+00 : f32
    %38 = vector.broadcast %cst_13 : f32 to vector<4x4xf32>
    %39 = arith.select %37, %38, %34 : vector<4x4xi1>, vector<4x4xf32>
    %40 = vector.shape_cast %39 : vector<4x4xf32> to vector<1x4x4xf32>
    %cst_14 = arith.constant dense<0.000000e+00> : vector<1xf32>
    %41 = vector.multi_reduction <add>, %40, %cst_14 [1, 2] : vector<1x4x4xf32> to vector<1xf32>
    %42 = vector.shape_cast %41 : vector<1xf32> to vector<1x1x1xf32>
    %43 = vector.extract %42[0, 0, 0] : f32 from vector<1x1x1xf32>
    %44 = vector.broadcast %43 : f32 to vector<1x1xf32>
    %cst_15 = arith.constant 6.250000e-02 : f32
    %45 = vector.broadcast %cst_15 : f32 to vector<1x1xf32>
    %46 = arith.mulf %44, %45 : vector<1x1xf32>
    %c0_16 = arith.constant 0 : index
    %c0_17 = arith.constant 0 : index
    %47 = vector.load %arg3[%c0_16, %c0_17] : memref<1x1xf32, #tpu.memory_space<vmem>>, vector<1x1xf32>
    tpu.vector_store %arg3[%c0_16, %c0_17], %46 {strides = array<i32>} : memref<1x1xf32, #tpu.memory_space<vmem>>, vector<1x1xf32>,
    return
  }
}

module attributes {stable_mosaic.version = 11 : i64} {
  func.func @_code_kernel(%arg0: i32, %arg1: i32, %arg2: memref<2x18x32x8xbf16, #tpu.memory_space<vmem>>, %arg3: memref<9x8x8xbf16, #tpu.memory_space<vmem>>, %arg4: memref<16x32x8xbf16, #tpu.memory_space<vmem>>, %arg5: memref<2x1x8xf32, #tpu.memory_space<vmem>>, %arg6: memref<2x8xf32, #tpu.memory_space<vmem>>) attributes {dimension_semantics = [#tpu.dimension_semantics<parallel>, #tpu.dimension_semantics<arbitrary>], iteration_bounds = array<i64: 1, 1>, scalar_prefetch = 0 : i64, scratch_operands = 1 : i64, tpu.core_type = #tpu.core_type<tc>, window_params = [{transform_indices = @transform_0, window_bounds = array<i64: 2, 18, 32, 8>}, {pipeline_mode = #tpu.pipeline_mode<synchronous>, transform_indices = @transform_1, window_bounds = array<i64: 9, 8, 8>}, {transform_indices = @transform_2, window_bounds = array<i64: 16, 32, 8>}, {transform_indices = @transform_3, window_bounds = array<i64: 2, 1, 8>}]} {
    %c0_i32 = arith.constant 0 : i32
    %0 = arith.cmpi eq, %arg1, %c0_i32 : i32
    %1 = arith.extui %0 : i1 to i32
    %c0_i32_0 = arith.constant 0 : i32
    %2 = arith.cmpi ne, %1, %c0_i32_0 : i32
    scf.if %2 {
      %cst_41 = arith.constant 0.000000e+00 : f32
      %61 = vector.broadcast %cst_41 : f32 to vector<2x8xf32>
      %c0_42 = arith.constant 0 : index
      %c0_43 = arith.constant 0 : index
      %62 = vector.load %arg6[%c0_42, %c0_43] : memref<2x8xf32, #tpu.memory_space<vmem>>, vector<2x8xf32>
      tpu.vector_store %arg6[%c0_42, %c0_43], %61 {strides = array<i32>} : memref<2x8xf32, #tpu.memory_space<vmem>>, vector<2x8xf32>,
    } else {
    }
    %c0 = arith.constant 0 : index
    %c0_1 = arith.constant 0 : index
    %c0_2 = arith.constant 0 : index
    %c0_3 = arith.constant 0 : index
    %3 = vector.load %arg2[%c0, %c0_1, %c0_2, %c0_3] : memref<2x18x32x8xbf16, #tpu.memory_space<vmem>>, vector<2x18x32x8xbf16>
    %4 = vector.extract_strided_slice %3 {offsets = [0, 0, 0, 0], sizes = [2, 16, 32, 8], strides = [1, 1, 1, 1]} : vector<2x18x32x8xbf16> to vector<2x16x32x8xbf16>
    %5 = vector.shape_cast %4 : vector<2x16x32x8xbf16> to vector<1024x8xbf16>
    %c0_4 = arith.constant 0 : index
    %c0_5 = arith.constant 0 : index
    %c0_6 = arith.constant 0 : index
    %6 = vector.load %arg3[%c0_4, %c0_5, %c0_6] : memref<9x8x8xbf16, #tpu.memory_space<vmem>>, vector<1x8x8xbf16>
    %7 = vector.shape_cast %6 : vector<1x8x8xbf16> to vector<8x8xbf16>
    %cst = arith.constant dense<0.000000e+00> : vector<1024x8xf32>
    %8 = tpu.matmul %5, %7, %cst {dimension_numbers = #tpu.dot_dimension_numbers<[1], [0], [0], [1], [0, 0, 1, 1], [], []>} : vector<1024x8xbf16>, vector<8x8xbf16>, vector<1024x8xf32> -> vector<1024x8xf32>
    %c1 = arith.constant 1 : index
    %c0_7 = arith.constant 0 : index
    %c0_8 = arith.constant 0 : index
    %9 = vector.load %arg3[%c1, %c0_7, %c0_8] : memref<9x8x8xbf16, #tpu.memory_space<vmem>>, vector<1x8x8xbf16>
    %10 = vector.shape_cast %9 : vector<1x8x8xbf16> to vector<8x8xbf16>
    %cst_9 = arith.constant dense<0.000000e+00> : vector<1024x8xf32>
    %11 = tpu.matmul %5, %10, %cst_9 {dimension_numbers = #tpu.dot_dimension_numbers<[1], [0], [0], [1], [0, 0, 1, 1], [], []>} : vector<1024x8xbf16>, vector<8x8xbf16>, vector<1024x8xf32> -> vector<1024x8xf32>
    %c2 = arith.constant 2 : index
    %c0_10 = arith.constant 0 : index
    %c0_11 = arith.constant 0 : index
    %12 = vector.load %arg3[%c2, %c0_10, %c0_11] : memref<9x8x8xbf16, #tpu.memory_space<vmem>>, vector<1x8x8xbf16>
    %13 = vector.shape_cast %12 : vector<1x8x8xbf16> to vector<8x8xbf16>
    %cst_12 = arith.constant dense<0.000000e+00> : vector<1024x8xf32>
    %14 = tpu.matmul %5, %13, %cst_12 {dimension_numbers = #tpu.dot_dimension_numbers<[1], [0], [0], [1], [0, 0, 1, 1], [], []>} : vector<1024x8xbf16>, vector<8x8xbf16>, vector<1024x8xf32> -> vector<1024x8xf32>
    %15 = vector.extract_strided_slice %3 {offsets = [0, 1, 0, 0], sizes = [2, 16, 32, 8], strides = [1, 1, 1, 1]} : vector<2x18x32x8xbf16> to vector<2x16x32x8xbf16>
    %16 = vector.shape_cast %15 : vector<2x16x32x8xbf16> to vector<1024x8xbf16>
    %c3 = arith.constant 3 : index
    %c0_13 = arith.constant 0 : index
    %c0_14 = arith.constant 0 : index
    %17 = vector.load %arg3[%c3, %c0_13, %c0_14] : memref<9x8x8xbf16, #tpu.memory_space<vmem>>, vector<1x8x8xbf16>
    %18 = vector.shape_cast %17 : vector<1x8x8xbf16> to vector<8x8xbf16>
    %cst_15 = arith.constant dense<0.000000e+00> : vector<1024x8xf32>
    %19 = tpu.matmul %16, %18, %cst_15 {dimension_numbers = #tpu.dot_dimension_numbers<[1], [0], [0], [1], [0, 0, 1, 1], [], []>} : vector<1024x8xbf16>, vector<8x8xbf16>, vector<1024x8xf32> -> vector<1024x8xf32>
    %20 = arith.addf %8, %19 : vector<1024x8xf32>
    %c4 = arith.constant 4 : index
    %c0_16 = arith.constant 0 : index
    %c0_17 = arith.constant 0 : index
    %21 = vector.load %arg3[%c4, %c0_16, %c0_17] : memref<9x8x8xbf16, #tpu.memory_space<vmem>>, vector<1x8x8xbf16>
    %22 = vector.shape_cast %21 : vector<1x8x8xbf16> to vector<8x8xbf16>
    %cst_18 = arith.constant dense<0.000000e+00> : vector<1024x8xf32>
    %23 = tpu.matmul %16, %22, %cst_18 {dimension_numbers = #tpu.dot_dimension_numbers<[1], [0], [0], [1], [0, 0, 1, 1], [], []>} : vector<1024x8xbf16>, vector<8x8xbf16>, vector<1024x8xf32> -> vector<1024x8xf32>
    %24 = arith.addf %11, %23 : vector<1024x8xf32>
    %c5 = arith.constant 5 : index
    %c0_19 = arith.constant 0 : index
    %c0_20 = arith.constant 0 : index
    %25 = vector.load %arg3[%c5, %c0_19, %c0_20] : memref<9x8x8xbf16, #tpu.memory_space<vmem>>, vector<1x8x8xbf16>
    %26 = vector.shape_cast %25 : vector<1x8x8xbf16> to vector<8x8xbf16>
    %cst_21 = arith.constant dense<0.000000e+00> : vector<1024x8xf32>
    %27 = tpu.matmul %16, %26, %cst_21 {dimension_numbers = #tpu.dot_dimension_numbers<[1], [0], [0], [1], [0, 0, 1, 1], [], []>} : vector<1024x8xbf16>, vector<8x8xbf16>, vector<1024x8xf32> -> vector<1024x8xf32>
    %28 = arith.addf %14, %27 : vector<1024x8xf32>
    %29 = vector.extract_strided_slice %3 {offsets = [0, 2, 0, 0], sizes = [2, 16, 32, 8], strides = [1, 1, 1, 1]} : vector<2x18x32x8xbf16> to vector<2x16x32x8xbf16>
    %30 = vector.shape_cast %29 : vector<2x16x32x8xbf16> to vector<1024x8xbf16>
    %c6 = arith.constant 6 : index
    %c0_22 = arith.constant 0 : index
    %c0_23 = arith.constant 0 : index
    %31 = vector.load %arg3[%c6, %c0_22, %c0_23] : memref<9x8x8xbf16, #tpu.memory_space<vmem>>, vector<1x8x8xbf16>
    %32 = vector.shape_cast %31 : vector<1x8x8xbf16> to vector<8x8xbf16>
    %cst_24 = arith.constant dense<0.000000e+00> : vector<1024x8xf32>
    %33 = tpu.matmul %30, %32, %cst_24 {dimension_numbers = #tpu.dot_dimension_numbers<[1], [0], [0], [1], [0, 0, 1, 1], [], []>} : vector<1024x8xbf16>, vector<8x8xbf16>, vector<1024x8xf32> -> vector<1024x8xf32>
    %34 = arith.addf %20, %33 : vector<1024x8xf32>
    %c7 = arith.constant 7 : index
    %c0_25 = arith.constant 0 : index
    %c0_26 = arith.constant 0 : index
    %35 = vector.load %arg3[%c7, %c0_25, %c0_26] : memref<9x8x8xbf16, #tpu.memory_space<vmem>>, vector<1x8x8xbf16>
    %36 = vector.shape_cast %35 : vector<1x8x8xbf16> to vector<8x8xbf16>
    %cst_27 = arith.constant dense<0.000000e+00> : vector<1024x8xf32>
    %37 = tpu.matmul %30, %36, %cst_27 {dimension_numbers = #tpu.dot_dimension_numbers<[1], [0], [0], [1], [0, 0, 1, 1], [], []>} : vector<1024x8xbf16>, vector<8x8xbf16>, vector<1024x8xf32> -> vector<1024x8xf32>
    %38 = arith.addf %24, %37 : vector<1024x8xf32>
    %c8 = arith.constant 8 : index
    %c0_28 = arith.constant 0 : index
    %c0_29 = arith.constant 0 : index
    %39 = vector.load %arg3[%c8, %c0_28, %c0_29] : memref<9x8x8xbf16, #tpu.memory_space<vmem>>, vector<1x8x8xbf16>
    %40 = vector.shape_cast %39 : vector<1x8x8xbf16> to vector<8x8xbf16>
    %cst_30 = arith.constant dense<0.000000e+00> : vector<1024x8xf32>
    %41 = tpu.matmul %30, %40, %cst_30 {dimension_numbers = #tpu.dot_dimension_numbers<[1], [0], [0], [1], [0, 0, 1, 1], [], []>} : vector<1024x8xbf16>, vector<8x8xbf16>, vector<1024x8xf32> -> vector<1024x8xf32>
    %42 = arith.addf %28, %41 : vector<1024x8xf32>
    %c1_i32 = arith.constant 1 : i32
    %43 = tpu.dynamic_rotate %34 by %c1_i32 dim 0 : vector<1024x8xf32>, i32 -> vector<1024x8xf32>
    %44 = arith.addf %38, %43 : vector<1024x8xf32>
    %c1023_i32 = arith.constant 1023 : i32
    %45 = tpu.dynamic_rotate %42 by %c1023_i32 dim 0 : vector<1024x8xf32>, i32 -> vector<1024x8xf32>
    %46 = arith.addf %44, %45 : vector<1024x8xf32>
    %c0_31 = arith.constant 0 : index
    %c0_32 = arith.constant 0 : index
    %c0_33 = arith.constant 0 : index
    %47 = vector.load %arg4[%c0_31, %c0_32, %c0_33] : memref<16x32x8xbf16, #tpu.memory_space<vmem>>, vector<16x32x8xbf16>
    %48 = vector.shape_cast %47 : vector<16x32x8xbf16> to vector<512x8xbf16>
    %49 = arith.extf %48 : vector<512x8xbf16> to vector<512x8xf32>
    %50 = vector.shape_cast %46 : vector<1024x8xf32> to vector<2x512x8xf32>
    %51 = vector.shape_cast %49 : vector<512x8xf32> to vector<1x512x8xf32>
    %52 = vector.broadcast %51 : vector<1x512x8xf32> to vector<2x512x8xf32>
    %53 = arith.mulf %50, %52 : vector<2x512x8xf32>
    %c0_34 = arith.constant 0 : index
    %c0_35 = arith.constant 0 : index
    %54 = vector.load %arg6[%c0_34, %c0_35] : memref<2x8xf32, #tpu.memory_space<vmem>>, vector<2x8xf32>
    %cst_36 = arith.constant dense<0.000000e+00> : vector<2x8xf32>
    %55 = vector.multi_reduction <add>, %53, %cst_36 [1] : vector<2x512x8xf32> to vector<2x8xf32>
    %56 = arith.addf %54, %55 : vector<2x8xf32>
    %c0_37 = arith.constant 0 : index
    %c0_38 = arith.constant 0 : index
    %57 = vector.load %arg6[%c0_37, %c0_38] : memref<2x8xf32, #tpu.memory_space<vmem>>, vector<2x8xf32>
    tpu.vector_store %arg6[%c0_37, %c0_38], %56 {strides = array<i32>} : memref<2x8xf32, #tpu.memory_space<vmem>>, vector<2x8xf32>,
    %c0_i32_39 = arith.constant 0 : i32
    %58 = arith.cmpi eq, %arg1, %c0_i32_39 : i32
    %59 = arith.extui %58 : i1 to i32
    %c0_i32_40 = arith.constant 0 : i32
    %60 = arith.cmpi ne, %59, %c0_i32_40 : i32
    scf.if %60 {
      %c0_41 = arith.constant 0 : index
      %c0_42 = arith.constant 0 : index
      %61 = vector.load %arg6[%c0_41, %c0_42] : memref<2x8xf32, #tpu.memory_space<vmem>>, vector<2x8xf32>
      %cst_43 = arith.constant 3.906250e-03 : f32
      %62 = vector.broadcast %cst_43 : f32 to vector<2x8xf32>
      %63 = arith.mulf %61, %62 : vector<2x8xf32>
      %c0_44 = arith.constant 0 : index
      %c0_45 = arith.constant 0 : index
      %c0_46 = arith.constant 0 : index
      %64 = vector.load %arg5[%c0_44, %c0_45, %c0_46] : memref<2x1x8xf32, #tpu.memory_space<vmem>>, vector<2x1x8xf32>
      %65 = vector.shape_cast %64 : vector<2x1x8xf32> to vector<2x8xf32>
      %66 = vector.shape_cast %63 : vector<2x8xf32> to vector<2x1x8xf32>
      tpu.vector_store %arg5[%c0_44, %c0_45, %c0_46], %66 {strides = array<i32>} : memref<2x1x8xf32, #tpu.memory_space<vmem>>, vector<2x1x8xf32>,
    } else {
    }
    return
  }
  func.func @transform_0(%arg0: i32, %arg1: i32) -> (i32, i32, i32, i32) {
    %c1_i32 = arith.constant 1 : i32
    %0 = arith.muli %arg1, %c1_i32 : i32
    %1 = arith.addi %0, %arg0 : i32
    %c0_i32 = arith.constant 0 : i32
    %c0_i32_0 = arith.constant 0 : i32
    %c0_i32_1 = arith.constant 0 : i32
    %c0_i32_2 = arith.constant 0 : i32
    return %1, %c0_i32, %c0_i32_0, %c0_i32_1 : i32, i32, i32, i32
  }
  func.func @transform_1(%arg0: i32, %arg1: i32) -> (i32, i32, i32) {
    %c0_i32 = arith.constant 0 : i32
    %c0_i32_0 = arith.constant 0 : i32
    %c0_i32_1 = arith.constant 0 : i32
    %c0_i32_2 = arith.constant 0 : i32
    return %c0_i32, %c0_i32_0, %c0_i32_1 : i32, i32, i32
  }
  func.func @transform_2(%arg0: i32, %arg1: i32) -> (i32, i32, i32) {
    %c0_i32 = arith.constant 0 : i32
    %c0_i32_0 = arith.constant 0 : i32
    %c0_i32_1 = arith.constant 0 : i32
    return %arg1, %c0_i32, %c0_i32_0 : i32, i32, i32
  }
  func.func @transform_3(%arg0: i32, %arg1: i32) -> (i32, i32, i32) {
    %c0_i32 = arith.constant 0 : i32
    %c0_i32_0 = arith.constant 0 : i32
    %c0_i32_1 = arith.constant 0 : i32
    return %arg0, %c0_i32, %c0_i32_0 : i32, i32, i32
  }
}

</mosaic_0001>

<bundles_post_ra>
// kernel: code_reduction_forward.3
= control target key start
LH: loop header
LB: loop body
LE: loop exit
PB: predicated region body
PF: predicated region fallthrough
CT: control target
= control target key end

     0   :  { %9 = vsyncpa [#allocation3], 0  ;;  %vm130_vm0 = vcmask 1043456   ;;  %s474_s0 = inlined_call_operand.vmem [shape: f32[4,36], index: 0, kind: input, shape index: {}]   ;;  %s475_s1 = inlined_call_operand.vmem [shape: f32[4,512], index: 1, kind: input, shape index: {}]   ;;  %s476_s2 = inlined_call_operand.hbm [shape: f32[1,1], index: 2, kind: output, shape index: {0}]   ;;  %s477_s3 = inlined_call_operand.hbm [shape: f32[1,1], index: 3, kind: output, shape index: {1}]  }
   0x1   :  { %v120_v0 = vld [vmem:[%s475_s1] sm:$0xff]  ;;  %v121_v1 = vld [vmem:[%s475_s1 + $0x8] sm:$0xff] }
   0x2   :  { %v122_v2 = vmul.f32 %v120_v0, %v120_v0  ;;  %v123_v3 = vmul.f32 %v121_v1, %v121_v1 }
   0x3   :  { %10 = vsyncpa [#allocation5], 0  ;;  %v15_v10 = vld [vmem:[%s474_s0] sm:$0xf]  ;;  %vm17_vm1 = vcmask 289792   ;;  %v414_v16 = vmov 0.0   ;;  %v99_v19 = vlaneseq }
   0x4   :  { %v126_v4 = vcombine.high %v122_v2, %v122_v2  ;;  %v127_v5 = vcombine.high %v123_v3, %v123_v3  ;;  %v131_v6 = vsel %vm130_vm0, %v122_v2, 0.0  ;;  %v134_v8 = vsel %vm130_vm0, %v123_v3, 0.0  ;;  %346 = vmatprep.subr.mxu0 %v414_v16  ;;  %s417_s0 = smov [#allocation2]  }
   0x5   :  { %v16_v13 = vmul.f32 %v15_v10, %v15_v10  ;;  %vm415_vm2 = vmmov 0   ;;  %v416_v20 = vmov 839922192   ;;  %v100_v24 = vshrl.u32 %v99_v19, 7  ;;  %s320_s1 = sshll.u32 %s417_s0, 4  ;;  %s321_s1 = int_to_ptr.vmem [resolvable:$true] %s320_s1 }
   0x6   :  { %v132_v7 = vsel %vm130_vm0, %v126_v4, 0.0  ;;  %v136_v11 = vsel %vm130_vm0, %v127_v5, 0.0  ;;  %348 = vmatprep.mubr.msk.f32.mxu0 %vm415_vm2, %v414_v16  ;;  %v144_v21 = vunpack.c.l.s4 %v416_v20  ;;  %vm24_vm3 = vcmask 293888   ;;  %s366_s19 = scalar_lea.vmem %s321_s1, 16  ;;  %s370_s20 = scalar_lea.vmem %s321_s1, 32 }
   0x7   :  { %v133_v9 = vadd.f32 %v132_v7, %v131_v6  ;;  %v18_v15 = vsel %vm17_vm1, %v16_v13, 0.0  ;;  %v102_v35 = vand.u32 127, %v99_v19  ;;  %vm105_vm5 = vcmask 27648   ;;  %p367_p0 = scmp.ne.s32.totalorder %s321_s1, %s366_s19  ;;  %p371_p1 = scmp.lt.s32.totalorder %s321_s1, %s321_s1 }
   0x8   :  { %v145_v25 = vunpack.c.0.s8 %v144_v21  ;;  %vm118_vm6 = vcmask 0   ;;  %p372_p2 = scmp.lt.s32.totalorder %s370_s20, %s366_s19 }
   0x9   :  { %v135_v12 = vadd.f32 %v134_v8, %v133_v9  ;;  %vm103_vm4 = vcmp.eq.s32.totalorder %v100_v24, %v102_v35 }
   0xa   :  { %v148_v26 = vsub.s32 %v145_v25, %v100_v24  ;;  %p373_p3 = por %p372_p2, %p371_p1 }
   0xb   :  { %v137_v14 = vadd.f32 %v136_v11, %v135_v12 }
   0xc   :  { %p374_p4 = pnand %p373_p3, %p367_p0 }
   0xd   :  { %138 = vadd.xlane.f32.xlu0 %v137_v14 }
  0x11   :  { %19 = vadd.xlane.f32.xlu0 %v18_v15 }
  0x9a   :  { %v139_v17 = vpop.xlane.xlu0 %138 }
  0x9b   :  { %v140_v18 = vmax.f32 %v139_v17, 1e-12 }
  0x9d   :  { %362 = vrsqrt.f32 %v140_v18 }
  0x9e   :  { %v20_v22 = vpop.xlane.xlu0 %19 }
  0x9f   :  { %v21_v23 = vmax.f32 %v20_v22, 1e-12 }
  0xa1   :  { %364 = vrsqrt.f32 %v21_v23 }
  0xa7   :  { %v363_v27 = vpop.eup %362 }
  0xa8   :  { %v149_v28 = vrot.slane %v363_v27, %v148_v26 }
  0xaa   :  { %v151_v29 = vmul.f32 %v149_v28, %v120_v0  ;;  %v152_v30 = vmul.f32 %v149_v28, %v121_v1 }
  0xab   :  { %v365_v31 = vpop.eup %364 }
  0xac   :  { %v23_v32 = vmul.f32 %v365_v31, %v15_v10  ;;  %v155_v33 = vcombine.high %v151_v29, %v151_v29  ;;  %v156_v34 = vcombine.high %v152_v30, %v152_v30 }
  0xae   :  { %347 = vmatpush3.xpose.msk.msra.mxu0 %vm24_vm3, %v23_v32  ;;  %159 = vmatprep.subr.mxu1 %v155_v33 }
  0xaf   :  { %223 = vmatprep.mubr.f32.mxu1 %v155_v33  ;;  %160 = vmatpush1.xpose.msra.mxu1 %v151_v29 }
  0xb0   :  { %229 = vmatprep.subr.mxu1 %v156_v34 }
  0xb1   :  { %349 = vmatmul.mubr.msk.f32.vlgmr.msra.gmra.mrb[0].mxu0 %vm24_vm3, %v23_v32 }
  0xb2   :  { %224 = vmatmul.mubr.f32.vlgmr.msra.gmra.mrb[0].mxu1 %v151_v29 }
  0xb3   :  { %230 = vmatpush1.xpose.msra.mxu1 %v152_v30  ;;  %293 = vmatprep.mubr.f32.mxu1 %v156_v34 }
  0xba   :  { %294 = vmatmul.mubr.f32.vlgmr.msra.gmra.mrb[0].mxu1 %v152_v30 }
 0x184   :  { %v94_v36 = vpop.f32.mrb[0].mxu0 }
 0x185   :  { %v98_v37 = vmul.f32 %v94_v36, %v94_v36  ;;  %v350_v38 = vpop.f32.mrb[1].mxu0 }
 0x187   :  { %v104_v39 = vsel %vm103_vm4, 0.0, %v98_v37 }
 0x188   :  { %v106_v40 = vsel %vm105_vm5, %v104_v39, 0.0 }
 0x189   :  { %107 = vadd.xlane.f32.xlu1 %v106_v40 }
 0x18d   :  { %v295_v41 = vpop.f32.mrb[0].mxu1 }
 0x18e   :  { %v299_v42 = vmul.f32 %v295_v41, %v295_v41  ;;  %v297_v43 = vpop.f32.mrb[1].mxu1 }
 0x190   :  { %v300_v44 = vsel %vm103_vm4, 0.0, %v299_v42 }
 0x191   :  { %v301_v45 = vsel %vm105_vm5, %v300_v44, 0.0 }
 0x192   :  { %302 = vadd.xlane.f32.xlu1 %v301_v45 }
 0x216   :  { %v108_v46 = vpop.xlane.xlu1 %107 }
 0x217   :  { %v109_v47 = vrot.slane %v108_v46, 4 }
 0x219   :  { %v110_v48 = vadd.f32 %v109_v47, %v108_v46 }
 0x21b   :  { %v111_v49 = vrot.slane %v110_v48, 2 }
 0x21d   :  { %v112_v50 = vadd.f32 %v111_v49, %v110_v48 }
 0x21f   :  { %v303_v51 = vpop.xlane.xlu1 %302  ;;  %v113_v52 = vrot.slane %v112_v50, 1 }
 0x220   :  { %v304_v53 = vrot.slane %v303_v51, 4 }
 0x221   :  { %v114_v54 = vadd.f32 %v113_v52, %v112_v50 }
 0x222   :  { %v305_v55 = vadd.f32 %v304_v53, %v303_v51 }
 0x223   :  { %353 = vpush %v114_v54 }
 0x224   :  { %v306_v56 = vrot.slane %v305_v55, 2 }
 0x226   :  { %v307_v57 = vadd.f32 %v306_v56, %v305_v55 }
 0x228   :  { %v308_v58 = vrot.slane %v307_v57, 1 }
 0x22a   :  { %v309_v59 = vadd.f32 %v308_v58, %v307_v57 }
 0x22c   :  { %355 = vpush %v309_v59 }
 0x254   :  { %s354_s18 = spop %353 }
 0x255   :  { %v116_v60 = vstv %s354_s18 }
 0x256   :  { %v117_v61 = vmul.f32 0.0625, %v116_v60 }
 0x258   :  { %119 = vst.msk [vmem:[#allocation2] sm:$0x1] %vm118_vm6, %v117_v61 }
 0x259   :  { %377 = shalt.err (!%p374_p4)
}
 0x25a   :  { %s378_s23 = scalar_lea.hbm %s476_s2, 16 }
 0x25b   :  { %p379_p5 = scmp.ne.s32.totalorder %s476_s2, %s378_s23  ;;  %p382_p6 = scmp.lt.u32.totalorder %s378_s23, %s476_s2 }
 0x25d   :  { %p384_p7 = pnand %p382_p6, %p379_p5 }
 0x25f   :  { %387 = shalt.err (!%p384_p7)
}
 0x260   :  { %323 = dma.vmem_to_hbm [thread:$0]  %s321_s1, 16, %s476_s2, [#allocation3]  }
 0x261   :  { %s418_s30 = smov [#allocation4]   ;;  %s356_s5 = spop %355 }
 0x262   :  { %s330_s4 = sshll.u32 %s418_s30, 4  ;;  %v311_v62 = vstv %s356_s5  ;;  %s331_s4 = int_to_ptr.vmem [resolvable:$true] %s330_s4 }
 0x263   :  { %v312_v63 = vmul.f32 0.0625, %v311_v62  ;;  %s388_s6 = scalar_lea.vmem %s331_s4, 16  ;;  %s392_s7 = scalar_lea.vmem %s331_s4, 32 }
 0x264   :  { %p389_p8 = scmp.ne.s32.totalorder %s331_s4, %s388_s6  ;;  %p393_p9 = scmp.lt.s32.totalorder %s331_s4, %s331_s4 }
 0x265   :  { %313 = vst.msk [vmem:[#allocation4] sm:$0x1] %vm118_vm6, %v312_v63  ;;  %p394_p10 = scmp.lt.s32.totalorder %s392_s7, %s388_s6 }
 0x267   :  { %p395_p11 = por %p394_p10, %p393_p9 }
 0x269   :  { %p396_p12 = pnand %p395_p11, %p389_p8 }
 0x26b   :  { %399 = shalt.err (!%p396_p12)
}
 0x26c   :  { %s400_s2 = scalar_lea.hbm %s477_s3, 16 }
 0x26d   :  { %p401_p13 = scmp.ne.s32.totalorder %s477_s3, %s400_s2  ;;  %p404_p0 = scmp.lt.u32.totalorder %s400_s2, %s477_s3 }
 0x26f   :  { %p406_p1 = pnand %p404_p0, %p401_p13 }
 0x271   :  { %409 = shalt.err (!%p406_p1)
}
 0x272   :  { %333 = dma.vmem_to_hbm [thread:$0]  %s331_s4, 16, %s477_s3, [#allocation5]  }
 0x273   :  { %410 = dma.done.wait [#allocation3], 16  }
 0x274   :  { %411 = vsyncadd [#allocation3], 4294967280 }
 0x275   :  { %412 = dma.done.wait [#allocation5], 16  }
 0x276   :  { %413 = vsyncadd [#allocation5], 4294967280 }
 0x277   :  { %340 = vsyncpa [#allocation3], 1 }
 0x278   :  { %341 = vsyncpa [#allocation5], 1 }

// kernel: code_reduction_forward.2
= control target key start
LH: loop header
LB: loop body
LE: loop exit
PB: predicated region body
PF: predicated region fallthrough
CT: control target
= control target key end

     0   :  { %vm710_vm0 = vcmask 1043456   ;;  %vm517_vm1 = vcmask 64512   ;;  %vm44_vm4 = vcmask 58368   ;;  %vm7398_vm5 = vcmask 1041409   ;;  %s14654_s1 = inlined_call_operand.vmem [shape: bf16[9,8,8], index: 1, kind: input, shape index: {}]   ;;  %s14655_s0 = inlined_call_operand.vmem [shape: bf16[2,18,32,8], index: 0, kind: input, shape index: {}]   ;;  %s14656_s2 = inlined_call_operand.vmem [shape: bf16[16,32,8], index: 2, kind: input, shape index: {}]   ;;  %s14657_s3 = inlined_call_operand.vmem [shape: f32[2,1,8], index: 3, kind: output, shape index: {}]  }
   0x1   :  { %v7449_v0 = vld [vmem:[%s14654_s1 + $0xc] sm:$0xf]  ;;  %v190_v1 = vld [vmem:[%s14654_s1] sm:$0xf]  ;;  %v10979_v4 = vld [vmem:[%s14655_s0 + $0x10] sm:$0xff]   ;;  %vm7434_vm6 = vcmask 57344  }
   0x2   :  { %10787 = vmatprep.subr.msk.bf16.mxu1 %vm710_vm0, %v7449_v0  ;;  %10788 = vmatprep.subr.msk.bf16.mxu0 %vm710_vm0, %v190_v1  ;;  %v712_v2 = vsel %vm710_vm0, %v7449_v0, 0  ;;  %v1292_v3 = vsel %vm710_vm0, %v190_v1, 0  ;;  %v10984_v5 = vld [vmem:[%s14655_s0] sm:$0xff]   ;;  %v10993_v6 = vld [vmem:[%s14655_s0 + $0x18] sm:$0xff]   ;;  %v10998_v7 = vld [vmem:[%s14655_s0 + $0x8] sm:$0xff]  }
   0x3   :  { %8848 = vmatpush3.bf16.msra.mxu1 %v712_v2  ;;  %8978 = vmatpush3.bf16.msra.mxu0 %v1292_v3  ;;  %v7775_v8 = vld [vmem:[%s14654_s1 + $0x14] sm:$0xf]  ;;  %v11011_v10 = vld [vmem:[%s14655_s0 + $0x20] sm:$0xff]   ;;  %v11022_v11 = vld [vmem:[%s14655_s0 + $0x28] sm:$0xff]  }
   0x4   :  { %8849 = vmatprep.mubr.msk.bf16.mxu1 %vm517_vm1, %v10979_v4  ;;  %8979 = vmatprep.mubr.msk.bf16.mxu0 %vm517_vm1, %v10984_v5  ;;  %v2940_v9 = vsel %vm710_vm0, %v7775_v8, 0  ;;  %v11027_v12 = vld [vmem:[%s14655_s0 + $0x30] sm:$0xff]   ;;  %v11040_v13 = vld [vmem:[%s14655_s0 + $0x38] sm:$0xff]   ;;  %v11045_v14 = vld [vmem:[%s14655_s0 + $0x40] sm:$0xff]  }
   0x5   :  { %10789 = vmatprep.subr.msk.bf16.mxu1 %vm710_vm0, %v190_v1  ;;  %10792 = vmatprep.subr.msk.bf16.mxu0 %vm710_vm0, %v7775_v8  ;;  %v11058_v15 = vld [vmem:[%s14655_s0 + $0x48] sm:$0xff]   ;;  %v11063_v16 = vld [vmem:[%s14655_s0 + $0x50] sm:$0xff]   ;;  %v11076_v17 = vld [vmem:[%s14655_s0 + $0x58] sm:$0xff]  }
   0x6   :  { %8850 = vmatmul.mubr.msk.bf16.vlgmr.msra.gmra.mrb[0].mxu1 %vm517_vm1, %v10993_v6  ;;  %8980 = vmatmul.mubr.msk.bf16.vlgmr.msra.gmra.mrb[0].mxu0 %vm517_vm1, %v10998_v7  ;;  %v11081_v18 = vld [vmem:[%s14655_s0 + $0x60] sm:$0xff]   ;;  %v11088_v19 = vld [vmem:[%s14654_s1 + $0x8] sm:$0xf]  ;;  %v11106_v21 = vld [vmem:[%s14655_s0 + $0x70] sm:$0xff]  }
   0x7   :  { %10018 = vmatpush3.bf16.msra.mxu1 %v1292_v3  ;;  %9368 = vmatpush3.bf16.msra.mxu0 %v2940_v9  ;;  %v11101_v20 = vld [vmem:[%s14655_s0 + $0x68] sm:$0xff]   ;;  %v11119_v22 = vld [vmem:[%s14655_s0 + $0x78] sm:$0xff]   ;;  %v11124_v23 = vld [vmem:[%s14655_s0 + $0x80] sm:$0xff]   ;;  %v3488_v44 = vsel %vm710_vm0, %v11088_v19, 0 }
   0x8   :  { %8853 = vmatprep.mubr.msk.bf16.mxu1 %vm517_vm1, %v11011_v10  ;;  %8983 = vmatprep.mubr.msk.bf16.mxu0 %vm517_vm1, %v10979_v4  ;;  %v11137_v24 = vld [vmem:[%s14655_s0 + $0x88] sm:$0xff]   ;;  %v11142_v25 = vld [vmem:[%s14655_s0 + $0x90] sm:$0xff]   ;;  %v11155_v26 = vld [vmem:[%s14655_s0 + $0x98] sm:$0xff]  }
   0x9   :  { %10793 = vmatprep.subr.msk.bf16.mxu0 %vm710_vm0, %v11088_v19  ;;  %v11160_v27 = vld [vmem:[%s14655_s0 + $0xa0] sm:$0xff]   ;;  %v11173_v28 = vld [vmem:[%s14655_s0 + $0xa8] sm:$0xff]   ;;  %v11178_v29 = vld [vmem:[%s14655_s0 + $0xb0] sm:$0xff]  }
   0xa   :  { %v11191_v30 = vld [vmem:[%s14655_s0 + $0xb8] sm:$0xff]   ;;  %v11196_v31 = vld [vmem:[%s14655_s0 + $0xc0] sm:$0xff]   ;;  %v11209_v32 = vld [vmem:[%s14655_s0 + $0xc8] sm:$0xff]  }
   0xb   :  { %14708 = vst [vmem:[#allocation3_spill] sm:$0xff] %v11196_v31  ;;  %14709 = vst [vmem:[#allocation4_spill] sm:$0xff] %v11209_v32  ;;  %v11214_v33 = vld [vmem:[%s14655_s0 + $0xd0] sm:$0xff]   ;;  %v11227_v34 = vld [vmem:[%s14655_s0 + $0xd8] sm:$0xff]  }
   0xc   :  { %14710 = vst [vmem:[#allocation5_spill] sm:$0xff] %v11214_v33  ;;  %14711 = vst [vmem:[#allocation6_spill] sm:$0xff] %v11227_v34  ;;  %v11232_v35 = vld [vmem:[%s14655_s0 + $0xe0] sm:$0xff]   ;;  %v11245_v36 = vld [vmem:[%s14655_s0 + $0xe8] sm:$0xff]  }
   0xd   :  { %14712 = vst [vmem:[#allocation7_spill] sm:$0xff] %v11232_v35  ;;  %14713 = vst [vmem:[#allocation8_spill] sm:$0xff] %v11245_v36  ;;  %v11250_v37 = vld [vmem:[%s14655_s0 + $0xf0] sm:$0xff]   ;;  %v11263_v38 = vld [vmem:[%s14655_s0 + $0xf8] sm:$0xff]  }
   0xe   :  { %8854 = vmatmul.mubr.msk.bf16.gmra.mrb[4].mxu1 %vm517_vm1, %v11022_v11  ;;  %8984 = vmatmul.mubr.msk.bf16.gmra.mrb[4].mxu0 %vm517_vm1, %v10993_v6  ;;  %14714 = vst [vmem:[#allocation9_spill] sm:$0xff] %v11250_v37  ;;  %14715 = vst [vmem:[#allocation10_spill] sm:$0xff] %v11263_v38  ;;  %v11268_v39 = vld [vmem:[%s14655_s0 + $0x100] sm:$0xff]   ;;  %v11281_v40 = vld [vmem:[%s14655_s0 + $0x108] sm:$0xff]  }
   0xf   :  { %8857 = vmatprep.mubr.msk.bf16.mxu1 %vm517_vm1, %v11027_v12  ;;  %8987 = vmatprep.mubr.msk.bf16.mxu0 %vm517_vm1, %v11011_v10  ;;  %14716 = vst [vmem:[#allocation11_spill] sm:$0xff] %v11268_v39  ;;  %14717 = vst [vmem:[#allocation12_spill] sm:$0xff] %v11281_v40  ;;  %v11286_v41 = vld [vmem:[%s14655_s0 + $0x130] sm:$0xff]   ;;  %v11299_v42 = vld [vmem:[%s14655_s0 + $0x138] sm:$0xff]  }
  0x10   :  { %v11304_v43 = vld [vmem:[%s14655_s0 + $0x140] sm:$0xff]   ;;  %v11317_v45 = vld [vmem:[%s14654_s1 + $0x10] sm:$0xf]  ;;  %v11326_v46 = vld [vmem:[%s14655_s0 + $0x148] sm:$0xff]  }
  0x11   :  { %10790 = vmatprep.subr.msk.bf16.mxu1 %vm710_vm0, %v11317_v45  ;;  %v11331_v47 = vld [vmem:[%s14655_s0 + $0x150] sm:$0xff]   ;;  %v11344_v48 = vld [vmem:[%s14655_s0 + $0x158] sm:$0xff]   ;;  %v11349_v49 = vld [vmem:[%s14655_s0 + $0x160] sm:$0xff]  }
  0x12   :  { %v11362_v50 = vld [vmem:[%s14655_s0 + $0x168] sm:$0xff]   ;;  %v11367_v51 = vld [vmem:[%s14655_s0 + $0x170] sm:$0xff]   ;;  %v11380_v52 = vld [vmem:[%s14655_s0 + $0x178] sm:$0xff]  }
  0x13   :  { %v11385_v53 = vld [vmem:[%s14655_s0 + $0x180] sm:$0xff]   ;;  %v11398_v54 = vld [vmem:[%s14655_s0 + $0x188] sm:$0xff]   ;;  %v11403_v55 = vld [vmem:[%s14655_s0 + $0x190] sm:$0xff]  }
  0x14   :  { %v11416_v56 = vld [vmem:[%s14655_s0 + $0x198] sm:$0xff]   ;;  %v11421_v57 = vld [vmem:[%s14655_s0 + $0x1a0] sm:$0xff]   ;;  %v11434_v58 = vld [vmem:[%s14655_s0 + $0x1a8] sm:$0xff]  }
  0x15   :  { %v11439_v59 = vld [vmem:[%s14655_s0 + $0x1b0] sm:$0xff]   ;;  %v11452_v60 = vld [vmem:[%s14655_s0 + $0x1b8] sm:$0xff]   ;;  %v11457_v61 = vld [vmem:[%s14655_s0 + $0x1c0] sm:$0xff]  }
  0x16   :  { %8858 = vmatmul.mubr.msk.bf16.gmra.mrb[8].mxu1 %vm517_vm1, %v11040_v13  ;;  %8988 = vmatmul.mubr.msk.bf16.gmra.mrb[8].mxu0 %vm517_vm1, %v11022_v11  ;;  %v11470_v62 = vld [vmem:[%s14655_s0 + $0x1c8] sm:$0xff]   ;;  %v11475_v63 = vld [vmem:[%s14655_s0 + $0x1d0] sm:$0xff]   ;;  %v11488_v0 = vld [vmem:[%s14655_s0 + $0x1d8] sm:$0xff]  }
  0x17   :  { %8861 = vmatprep.mubr.msk.bf16.mxu1 %vm517_vm1, %v11045_v14  ;;  %8991 = vmatprep.mubr.msk.bf16.mxu0 %vm517_vm1, %v11027_v12  ;;  %v11493_v1 = vld [vmem:[%s14655_s0 + $0x1e0] sm:$0xff]   ;;  %v11510_v8 = vld [vmem:[%s14655_s0 + $0x1e8] sm:$0xff]   ;;  %v11517_v19 = vld [vmem:[%s14655_s0 + $0x1f0] sm:$0xff]  }
  0x1e   :  { %8862 = vmatmul.mubr.msk.bf16.gmra.mrb[12].mxu1 %vm517_vm1, %v11058_v15  ;;  %8992 = vmatmul.mubr.msk.bf16.gmra.mrb[12].mxu0 %vm517_vm1, %v11040_v13 }
  0x1f   :  { %8865 = vmatprep.mubr.msk.bf16.mxu1 %vm517_vm1, %v11063_v16  ;;  %8995 = vmatprep.mubr.msk.bf16.mxu0 %vm517_vm1, %v11045_v14 }
  0x26   :  { %8866 = vmatmul.mubr.msk.bf16.gmra.mrb[16].mxu1 %vm517_vm1, %v11076_v17  ;;  %8996 = vmatmul.mubr.msk.bf16.gmra.mrb[16].mxu0 %vm517_vm1, %v11058_v15 }
  0x27   :  { %8869 = vmatprep.mubr.msk.bf16.mxu1 %vm517_vm1, %v11081_v18  ;;  %8999 = vmatprep.mubr.msk.bf16.mxu0 %vm517_vm1, %v11063_v16 }
  0x2e   :  { %8870 = vmatmul.mubr.msk.bf16.gmra.mrb[20].mxu1 %vm517_vm1, %v11101_v20  ;;  %9000 = vmatmul.mubr.msk.bf16.gmra.mrb[20].mxu0 %vm517_vm1, %v11076_v17 }
  0x2f   :  { %8873 = vmatprep.mubr.msk.bf16.mxu1 %vm517_vm1, %v11106_v21  ;;  %9003 = vmatprep.mubr.msk.bf16.mxu0 %vm517_vm1, %v11081_v18 }
  0x36   :  { %8874 = vmatmul.mubr.msk.bf16.gmra.mrb[24].mxu1 %vm517_vm1, %v11119_v22  ;;  %9004 = vmatmul.mubr.msk.bf16.gmra.mrb[24].mxu0 %vm517_vm1, %v11101_v20 }
  0x37   :  { %8877 = vmatprep.mubr.msk.bf16.mxu1 %vm517_vm1, %v11124_v23  ;;  %9007 = vmatprep.mubr.msk.bf16.mxu0 %vm517_vm1, %v11106_v21 }
  0x3e   :  { %8878 = vmatmul.mubr.msk.bf16.gmra.mrb[28].mxu1 %vm517_vm1, %v11137_v24  ;;  %9008 = vmatmul.mubr.msk.bf16.gmra.mrb[28].mxu0 %vm517_vm1, %v11119_v22 }
  0x3f   :  { %8881 = vmatprep.mubr.msk.bf16.mxu1 %vm517_vm1, %v11142_v25  ;;  %9011 = vmatprep.mubr.msk.bf16.mxu0 %vm517_vm1, %v11124_v23 }
  0x46   :  { %8882 = vmatmul.mubr.msk.bf16.gmra.mrb[32].mxu1 %vm517_vm1, %v11155_v26  ;;  %9012 = vmatmul.mubr.msk.bf16.gmra.mrb[32].mxu0 %vm517_vm1, %v11137_v24 }
  0x47   :  { %8885 = vmatprep.mubr.msk.bf16.mxu1 %vm517_vm1, %v11160_v27  ;;  %9015 = vmatprep.mubr.msk.bf16.mxu0 %vm517_vm1, %v11142_v25 }
  0x4e   :  { %8886 = vmatmul.mubr.msk.bf16.gmra.mrb[36].mxu1 %vm517_vm1, %v11173_v28  ;;  %9016 = vmatmul.mubr.msk.bf16.gmra.mrb[36].mxu0 %vm517_vm1, %v11155_v26 }
  0x4f   :  { %8889 = vmatprep.mubr.msk.bf16.mxu1 %vm517_vm1, %v11178_v29  ;;  %9019 = vmatprep.mubr.msk.bf16.mxu0 %vm517_vm1, %v11160_v27 }
  0x56   :  { %8890 = vmatmul.mubr.msk.bf16.gmra.mrb[40].mxu1 %vm517_vm1, %v11191_v30  ;;  %9020 = vmatmul.mubr.msk.bf16.gmra.mrb[40].mxu0 %vm517_vm1, %v11173_v28 }
  0x57   :  { %8893 = vmatprep.mubr.msk.bf16.mxu1 %vm517_vm1, %v11196_v31  ;;  %9023 = vmatprep.mubr.msk.bf16.mxu0 %vm517_vm1, %v11178_v29 }
  0x5e   :  { %8894 = vmatmul.mubr.msk.bf16.gmra.mrb[44].mxu1 %vm517_vm1, %v11209_v32  ;;  %9024 = vmatmul.mubr.msk.bf16.gmra.mrb[44].mxu0 %vm517_vm1, %v11191_v30 }
  0x5f   :  { %8897 = vmatprep.mubr.msk.bf16.mxu1 %vm517_vm1, %v11214_v33  ;;  %9027 = vmatprep.mubr.msk.bf16.mxu0 %vm517_vm1, %v11196_v31 }
  0x66   :  { %8898 = vmatmul.mubr.msk.bf16.gmra.mrb[48].mxu1 %vm517_vm1, %v11227_v34  ;;  %9028 = vmatmul.mubr.msk.bf16.gmra.mrb[48].mxu0 %vm517_vm1, %v11209_v32 }
  0x67   :  { %8901 = vmatprep.mubr.msk.bf16.mxu1 %vm517_vm1, %v11232_v35  ;;  %9031 = vmatprep.mubr.msk.bf16.mxu0 %vm517_vm1, %v11214_v33 }
  0x6e   :  { %8902 = vmatmul.mubr.msk.bf16.gmra.mrb[52].mxu1 %vm517_vm1, %v11245_v36  ;;  %9032 = vmatmul.mubr.msk.bf16.gmra.mrb[52].mxu0 %vm517_vm1, %v11227_v34 }
  0x6f   :  { %8905 = vmatprep.mubr.msk.bf16.mxu1 %vm517_vm1, %v11250_v37  ;;  %9035 = vmatprep.mubr.msk.bf16.mxu0 %vm517_vm1, %v11232_v35 }
  0x76   :  { %8906 = vmatmul.mubr.msk.bf16.gmra.mrb[56].mxu1 %vm517_vm1, %v11263_v38  ;;  %9036 = vmatmul.mubr.msk.bf16.gmra.mrb[56].mxu0 %vm517_vm1, %v11245_v36 }
  0x77   :  { %8909 = vmatprep.mubr.msk.bf16.mxu1 %vm517_vm1, %v11268_v39  ;;  %9039 = vmatprep.mubr.msk.bf16.mxu0 %vm517_vm1, %v11250_v37 }
  0x7e   :  { %8910 = vmatmul.mubr.msk.bf16.gmra.mrb[60].mxu1 %vm517_vm1, %v11281_v40  ;;  %9040 = vmatmul.mubr.msk.bf16.gmra.mrb[60].mxu0 %vm517_vm1, %v11263_v38 }
  0x7f   :  { %8913 = vmatprep.mubr.msk.bf16.mxu1 %vm517_vm1, %v11286_v41  ;;  %9369 = vmatprep.mubr.msk.bf16.mxu0 %vm517_vm1, %v10979_v4 }
  0x86   :  { %8914 = vmatmul.mubr.msk.bf16.gmra.mrb[64].mxu1 %vm517_vm1, %v11299_v42  ;;  %9370 = vmatmul.mubr.msk.bf16.vlgmr.msra.gmra.mrb[64].mxu0 %vm517_vm1, %v10993_v6 }
  0x87   :  { %8917 = vmatprep.mubr.msk.bf16.mxu1 %vm517_vm1, %v11304_v43  ;;  %9498 = vmatpush3.bf16.msra.mxu0 %v3488_v44 }
  0x88   :  { %9373 = vmatprep.mubr.msk.bf16.mxu0 %vm517_vm1, %v11011_v10 }
  0x8e   :  { %8918 = vmatmul.mubr.msk.bf16.gmra.mrb[68].mxu1 %vm517_vm1, %v11326_v46  ;;  %9374 = vmatmul.mubr.msk.bf16.gmra.mrb[68].mxu0 %vm517_vm1, %v11022_v11 }
  0x8f   :  { %8921 = vmatprep.mubr.msk.bf16.mxu1 %vm517_vm1, %v11331_v47  ;;  %9377 = vmatprep.mubr.msk.bf16.mxu0 %vm517_vm1, %v11027_v12 }
  0x96   :  { %8922 = vmatmul.mubr.msk.bf16.gmra.mrb[72].mxu1 %vm517_vm1, %v11344_v48  ;;  %9378 = vmatmul.mubr.msk.bf16.gmra.mrb[72].mxu0 %vm517_vm1, %v11040_v13 }
  0x97   :  { %8925 = vmatprep.mubr.msk.bf16.mxu1 %vm517_vm1, %v11349_v49  ;;  %9381 = vmatprep.mubr.msk.bf16.mxu0 %vm517_vm1, %v11045_v14 }
  0x9e   :  { %8926 = vmatmul.mubr.msk.bf16.gmra.mrb[76].mxu1 %vm517_vm1, %v11362_v50  ;;  %9382 = vmatmul.mubr.msk.bf16.gmra.mrb[76].mxu0 %vm517_vm1, %v11058_v15 }
  0x9f   :  { %8929 = vmatprep.mubr.msk.bf16.mxu1 %vm517_vm1, %v11367_v51  ;;  %9385 = vmatprep.mubr.msk.bf16.mxu0 %vm517_vm1, %v11063_v16 }
  0xa6   :  { %8930 = vmatmul.mubr.msk.bf16.gmra.mrb[80].mxu1 %vm517_vm1, %v11380_v52  ;;  %9386 = vmatmul.mubr.msk.bf16.gmra.mrb[80].mxu0 %vm517_vm1, %v11076_v17 }
  0xa7   :  { %8933 = vmatprep.mubr.msk.bf16.mxu1 %vm517_vm1, %v11385_v53  ;;  %9389 = vmatprep.mubr.msk.bf16.mxu0 %vm517_vm1, %v11081_v18 }
  0xae   :  { %8934 = vmatmul.mubr.msk.bf16.gmra.mrb[84].mxu1 %vm517_vm1, %v11398_v54  ;;  %9390 = vmatmul.mubr.msk.bf16.gmra.mrb[84].mxu0 %vm517_vm1, %v11101_v20 }
  0xaf   :  { %8937 = vmatprep.mubr.msk.bf16.mxu1 %vm517_vm1, %v11403_v55  ;;  %9393 = vmatprep.mubr.msk.bf16.mxu0 %vm517_vm1, %v11106_v21 }
  0xb6   :  { %8938 = vmatmul.mubr.msk.bf16.gmra.mrb[88].mxu1 %vm517_vm1, %v11416_v56  ;;  %9394 = vmatmul.mubr.msk.bf16.gmra.mrb[88].mxu0 %vm517_vm1, %v11119_v22 }
  0xb7   :  { %8941 = vmatprep.mubr.msk.bf16.mxu1 %vm517_vm1, %v11421_v57  ;;  %9397 = vmatprep.mubr.msk.bf16.mxu0 %vm517_vm1, %v11124_v23 }
  0xbe   :  { %8942 = vmatmul.mubr.msk.bf16.gmra.mrb[92].mxu1 %vm517_vm1, %v11434_v58  ;;  %9398 = vmatmul.mubr.msk.bf16.gmra.mrb[92].mxu0 %vm517_vm1, %v11137_v24 }
  0xbf   :  { %8945 = vmatprep.mubr.msk.bf16.mxu1 %vm517_vm1, %v11439_v59  ;;  %9401 = vmatprep.mubr.msk.bf16.mxu0 %vm517_vm1, %v11142_v25 }
  0xc6   :  { %8946 = vmatmul.mubr.msk.bf16.gmra.mrb[96].mxu1 %vm517_vm1, %v11452_v60  ;;  %9402 = vmatmul.mubr.msk.bf16.gmra.mrb[96].mxu0 %vm517_vm1, %v11155_v26 }
  0xc7   :  { %8949 = vmatprep.mubr.msk.bf16.mxu1 %vm517_vm1, %v11457_v61  ;;  %9405 = vmatprep.mubr.msk.bf16.mxu0 %vm517_vm1, %v11160_v27 }
  0xce   :  { %8950 = vmatmul.mubr.msk.bf16.gmra.mrb[100].mxu1 %vm517_vm1, %v11470_v62  ;;  %9406 = vmatmul.mubr.msk.bf16.gmra.mrb[100].mxu0 %vm517_vm1, %v11173_v28 }
  0xcf   :  { %8953 = vmatprep.mubr.msk.bf16.mxu1 %vm517_vm1, %v11475_v63  ;;  %9409 = vmatprep.mubr.msk.bf16.mxu0 %vm517_vm1, %v11178_v29 }
  0xd6   :  { %8954 = vmatmul.mubr.msk.bf16.gmra.mrb[104].mxu1 %vm517_vm1, %v11488_v0  ;;  %9410 = vmatmul.mubr.msk.bf16.gmra.mrb[104].mxu0 %vm517_vm1, %v11191_v30 }
  0xd7   :  { %8957 = vmatprep.mubr.msk.bf16.mxu1 %vm517_vm1, %v11493_v1  ;;  %9413 = vmatprep.mubr.msk.bf16.mxu0 %vm517_vm1, %v11196_v31 }
  0xd9   :  { %v11503_v2 = vpop.f32.mrb[0].mxu1 }
  0xda   :  { %14718 = vst [vmem:[#allocation13_spill] sm:$0xff] %v11503_v2  ;;  %v11505_v3 = vpop.f32.mrb[1].mxu1 }
  0xdb   :  { %14719 = vst [vmem:[#allocation14_spill] sm:$0xff] %v11505_v3  ;;  %v11512_v9 = vpop.f32.mrb[2].mxu1 }
  0xdc   :  { %14720 = vst [vmem:[#allocation15_spill] sm:$0xff] %v11512_v9  ;;  %v11519_v44 = vpop.f32.mrb[3].mxu1 }
  0xdd   :  { %14721 = vst [vmem:[#allocation16_spill] sm:$0xff] %v11519_v44  ;;  %v11536_v44 = vld [vmem:[%s14655_s0 + $0x1f8] sm:$0xff]  }
  0xde   :  { %8958 = vmatmul.mubr.msk.bf16.gmra.mrb[108].mxu1 %vm517_vm1, %v11510_v8  ;;  %9414 = vmatmul.mubr.msk.bf16.gmra.mrb[108].mxu0 %vm517_vm1, %v11209_v32  ;;  %v11543_v32 = vld [vmem:[%s14655_s0 + $0x200] sm:$0xff]  }
  0xdf   :  { %8961 = vmatprep.mubr.msk.bf16.mxu1 %vm517_vm1, %v11517_v19  ;;  %9417 = vmatprep.mubr.msk.bf16.mxu0 %vm517_vm1, %v11214_v33 }
  0xe1   :  { %v11529_v9 = vpop.f32.mrb[4].mxu1 }
  0xe2   :  { %14722 = vst [vmem:[#allocation17_spill] sm:$0xff] %v11529_v9  ;;  %v11531_v3 = vpop.f32.mrb[5].mxu1 }
  0xe3   :  { %14723 = vst [vmem:[#allocation18_spill] sm:$0xff] %v11531_v3  ;;  %v11538_v2 = vpop.f32.mrb[6].mxu1 }
  0xe4   :  { %14724 = vst [vmem:[#allocation19_spill] sm:$0xff] %v11538_v2  ;;  %v11545_v31 = vpop.f32.mrb[7].mxu1 }
  0xe5   :  { %14725 = vst [vmem:[#allocation20_spill] sm:$0xff] %v11545_v31  ;;  %v11562_v31 = vld [vmem:[%s14655_s0 + $0x208] sm:$0xff]  }
  0xe6   :  { %8962 = vmatmul.mubr.msk.bf16.gmra.mrb[112].mxu1 %vm517_vm1, %v11536_v44  ;;  %9418 = vmatmul.mubr.msk.bf16.gmra.mrb[112].mxu0 %vm517_vm1, %v11227_v34  ;;  %v11569_v34 = vld [vmem:[%s14655_s0 + $0x210] sm:$0xff]  }
  0xe7   :  { %8965 = vmatprep.mubr.msk.bf16.mxu1 %vm517_vm1, %v11543_v32  ;;  %9421 = vmatprep.mubr.msk.bf16.mxu0 %vm517_vm1, %v11232_v35 }
  0xe9   :  { %v11555_v2 = vpop.f32.mrb[8].mxu1 }
  0xea   :  { %14726 = vst [vmem:[#allocation21_spill] sm:$0xff] %v11555_v2  ;;  %v11557_v3 = vpop.f32.mrb[9].mxu1 }
  0xeb   :  { %14727 = vst [vmem:[#allocation22_spill] sm:$0xff] %v11557_v3  ;;  %v11564_v9 = vpop.f32.mrb[10].mxu1 }
  0xec   :  { %14728 = vst [vmem:[#allocation23_spill] sm:$0xff] %v11564_v9  ;;  %v11571_v33 = vpop.f32.mrb[11].mxu1 }
  0xed   :  { %14729 = vst [vmem:[#allocation24_spill] sm:$0xff] %v11571_v33  ;;  %v11588_v33 = vld [vmem:[%s14655_s0 + $0x218] sm:$0xff]  }
  0xee   :  { %8966 = vmatmul.mubr.msk.bf16.gmra.mrb[116].mxu1 %vm517_vm1, %v11562_v31  ;;  %9422 = vmatmul.mubr.msk.bf16.gmra.mrb[116].mxu0 %vm517_vm1, %v11245_v36  ;;  %v11595_v36 = vld [vmem:[%s14655_s0 + $0x220] sm:$0xff]  }
  0xef   :  { %8969 = vmatprep.mubr.msk.bf16.mxu1 %vm517_vm1, %v11569_v34  ;;  %9425 = vmatprep.mubr.msk.bf16.mxu0 %vm517_vm1, %v11250_v37 }
  0xf1   :  { %v11581_v9 = vpop.f32.mrb[12].mxu1 }
  0xf2   :  { %14730 = vst [vmem:[#allocation25_spill] sm:$0xff] %v11581_v9  ;;  %v11583_v3 = vpop.f32.mrb[13].mxu1 }
  0xf3   :  { %14731 = vst [vmem:[#allocation26_spill] sm:$0xff] %v11583_v3  ;;  %v11590_v2 = vpop.f32.mrb[14].mxu1 }
  0xf4   :  { %14732 = vst [vmem:[#allocation27_spill] sm:$0xff] %v11590_v2  ;;  %v11597_v35 = vpop.f32.mrb[15].mxu1 }
  0xf5   :  { %14733 = vst [vmem:[#allocation28_spill] sm:$0xff] %v11597_v35  ;;  %v11614_v35 = vld [vmem:[%s14655_s0 + $0x228] sm:$0xff]  }
  0xf6   :  { %8970 = vmatmul.mubr.msk.bf16.gmra.mrb[120].mxu1 %vm517_vm1, %v11588_v33  ;;  %9426 = vmatmul.mubr.msk.bf16.gmra.mrb[120].mxu0 %vm517_vm1, %v11263_v38  ;;  %v11621_v38 = vld [vmem:[%s14655_s0 + $0x120] sm:$0xff]  }
  0xf7   :  { %8973 = vmatprep.mubr.msk.bf16.mxu1 %vm517_vm1, %v11595_v36  ;;  %9429 = vmatprep.mubr.msk.bf16.mxu0 %vm517_vm1, %v11268_v39 }
  0xf9   :  { %v11607_v2 = vpop.f32.mrb[16].mxu1 }
  0xfa   :  { %14734 = vst [vmem:[#allocation29_spill] sm:$0xff] %v11607_v2  ;;  %v11609_v3 = vpop.f32.mrb[17].mxu1 }
  0xfb   :  { %14735 = vst [vmem:[#allocation30_spill] sm:$0xff] %v11609_v3  ;;  %v11616_v9 = vpop.f32.mrb[18].mxu1 }
  0xfc   :  { %14736 = vst [vmem:[#allocation31_spill] sm:$0xff] %v11616_v9  ;;  %v11623_v37 = vpop.f32.mrb[19].mxu1 }
  0xfd   :  { %14737 = vst [vmem:[#allocation32_spill] sm:$0xff] %v11623_v37  ;;  %v11640_v37 = vld [vmem:[%s14655_s0 + $0x128] sm:$0xff]  }
  0xfe   :  { %8974 = vmatmul.mubr.msk.bf16.gmra.mrb[124].mxu1 %vm517_vm1, %v11614_v35  ;;  %9430 = vmatmul.mubr.msk.bf16.gmra.mrb[124].mxu0 %vm517_vm1, %v11281_v40  ;;  %14740 = vst [vmem:[#allocation35_spill] sm:$0xff] %v11640_v37  ;;  %v1842_v40 = vsel %vm710_vm0, %v11317_v45, 0  ;;  %v11664_v45 = vld [vmem:[%s14654_s1 + $0x4] sm:$0xf] }
  0xff   :  { %9043 = vmatprep.mubr.msk.bf16.mxu1 %vm517_vm1, %v11621_v38  ;;  %9433 = vmatprep.mubr.msk.bf16.mxu0 %vm517_vm1, %v11286_v41 }
 0x101   :  { %v11633_v9 = vpop.f32.mrb[20].mxu1 }
 0x102   :  { %14738 = vst [vmem:[#allocation33_spill] sm:$0xff] %v11633_v9  ;;  %v11635_v3 = vpop.f32.mrb[21].mxu1 }
 0x103   :  { %14739 = vst [vmem:[#allocation34_spill] sm:$0xff] %v11635_v3  ;;  %v11642_v2 = vpop.f32.mrb[22].mxu1  ;;  %v11655_v3 = vld [vmem:[%s14654_s1 + $0x18] sm:$0xf] }
 0x104   :  { %14741 = vst [vmem:[#allocation36_spill] sm:$0xff] %v11642_v2  ;;  %v11644_v39 = vpop.f32.mrb[23].mxu1  ;;  %10794 = vmatprep.subr.msk.bf16.mxu0 %vm710_vm0, %v11655_v3 }
 0x105   :  { %14742 = vst [vmem:[#allocation37_spill] sm:$0xff] %v11644_v39 }
 0x106   :  { %9044 = vmatmul.mubr.msk.bf16.vlgmr.msra.gmra.mrb[64].mxu1 %vm517_vm1, %v11640_v37  ;;  %9434 = vmatmul.mubr.msk.bf16.gmra.mrb[128].mxu0 %vm517_vm1, %v11299_v42 }
 0x107   :  { %9108 = vmatpush3.bf16.msra.mxu1 %v1842_v40  ;;  %9047 = vmatprep.mubr.msk.bf16.mxu1 %vm517_vm1, %v11286_v41 }
 0x108   :  { %9437 = vmatprep.mubr.msk.bf16.mxu0 %vm517_vm1, %v11304_v43  ;;  %10791 = vmatprep.subr.msk.bf16.mxu1 %vm710_vm0, %v11664_v45 }
 0x109   :  { %v11666_v39 = vpop.f32.mrb[24].mxu1 }
 0x10a   :  { %14743 = vst [vmem:[#allocation38_spill] sm:$0xff] %v11666_v39  ;;  %v11672_v40 = vpop.f32.mrb[25].mxu1 }
 0x10b   :  { %14744 = vst [vmem:[#allocation39_spill] sm:$0xff] %v11672_v40  ;;  %v11674_v2 = vpop.f32.mrb[26].mxu1 }
 0x10c   :  { %14745 = vst [vmem:[#allocation40_spill] sm:$0xff] %v11674_v2  ;;  %v11676_v9 = vpop.f32.mrb[27].mxu1 }
 0x10d   :  { %14746 = vst [vmem:[#allocation41_spill] sm:$0xff] %v11676_v9 }
 0x10e   :  { %9048 = vmatmul.mubr.msk.bf16.gmra.mrb[68].mxu1 %vm517_vm1, %v11299_v42  ;;  %9438 = vmatmul.mubr.msk.bf16.gmra.mrb[132].mxu0 %vm517_vm1, %v11326_v46 }
 0x10f   :  { %9051 = vmatprep.mubr.msk.bf16.mxu1 %vm517_vm1, %v11304_v43  ;;  %9441 = vmatprep.mubr.msk.bf16.mxu0 %vm517_vm1, %v11331_v47 }
 0x111   :  { %v11686_v39 = vpop.f32.mrb[28].mxu1 }
 0x112   :  { %14747 = vst [vmem:[#allocation42_spill] sm:$0xff] %v11686_v39  ;;  %v11688_v37 = vpop.f32.mrb[29].mxu1 }
 0x113   :  { %14748 = vst [vmem:[#allocation43_spill] sm:$0xff] %v11688_v37  ;;  %v11690_v40 = vpop.f32.mrb[30].mxu1 }
 0x114   :  { %14749 = vst [vmem:[#allocation44_spill] sm:$0xff] %v11690_v40  ;;  %v11692_v2 = vpop.f32.mrb[31].mxu1 }
 0x115   :  { %14750 = vst [vmem:[#allocation45_spill] sm:$0xff] %v11692_v2 }
 0x116   :  { %9052 = vmatmul.mubr.msk.bf16.gmra.mrb[72].mxu1 %vm517_vm1, %v11326_v46  ;;  %9442 = vmatmul.mubr.msk.bf16.gmra.mrb[136].mxu0 %vm517_vm1, %v11344_v48 }
 0x117   :  { %9055 = vmatprep.mubr.msk.bf16.mxu1 %vm517_vm1, %v11331_v47  ;;  %9445 = vmatprep.mubr.msk.bf16.mxu0 %vm517_vm1, %v11349_v49 }
 0x119   :  { %v11702_v9 = vpop.f32.mrb[32].mxu1 }
 0x11a   :  { %14751 = vst [vmem:[#allocation46_spill] sm:$0xff] %v11702_v9  ;;  %v11704_v39 = vpop.f32.mrb[33].mxu1 }
 0x11b   :  { %14752 = vst [vmem:[#allocation47_spill] sm:$0xff] %v11704_v39  ;;  %v11706_v37 = vpop.f32.mrb[34].mxu1 }
 0x11c   :  { %14753 = vst [vmem:[#allocation48_spill] sm:$0xff] %v11706_v37  ;;  %v11708_v40 = vpop.f32.mrb[35].mxu1 }
 0x11d   :  { %14754 = vst [vmem:[#allocation49_spill] sm:$0xff] %v11708_v40 }
 0x11e   :  { %9056 = vmatmul.mubr.msk.bf16.gmra.mrb[76].mxu1 %vm517_vm1, %v11344_v48  ;;  %9446 = vmatmul.mubr.msk.bf16.gmra.mrb[140].mxu0 %vm517_vm1, %v11362_v50 }
 0x11f   :  { %9059 = vmatprep.mubr.msk.bf16.mxu1 %vm517_vm1, %v11349_v49  ;;  %9449 = vmatprep.mubr.msk.bf16.mxu0 %vm517_vm1, %v11367_v51 }
 0x121   :  { %v11718_v2 = vpop.f32.mrb[36].mxu1 }
 0x122   :  { %14755 = vst [vmem:[#allocation50_spill] sm:$0xff] %v11718_v2  ;;  %v11720_v9 = vpop.f32.mrb[37].mxu1 }
 0x123   :  { %14756 = vst [vmem:[#allocation51_spill] sm:$0xff] %v11720_v9  ;;  %v11722_v39 = vpop.f32.mrb[38].mxu1 }
 0x124   :  { %14757 = vst [vmem:[#allocation52_spill] sm:$0xff] %v11722_v39  ;;  %v11724_v37 = vpop.f32.mrb[39].mxu1 }
 0x125   :  { %14758 = vst [vmem:[#allocation53_spill] sm:$0xff] %v11724_v37 }
 0x126   :  { %9060 = vmatmul.mubr.msk.bf16.gmra.mrb[80].mxu1 %vm517_vm1, %v11362_v50  ;;  %9450 = vmatmul.mubr.msk.bf16.gmra.mrb[144].mxu0 %vm517_vm1, %v11380_v52 }
 0x127   :  { %9063 = vmatprep.mubr.msk.bf16.mxu1 %vm517_vm1, %v11367_v51  ;;  %9453 = vmatprep.mubr.msk.bf16.mxu0 %vm517_vm1, %v11385_v53 }
 0x129   :  { %v11734_v40 = vpop.f32.mrb[40].mxu1 }
 0x12a   :  { %14759 = vst [vmem:[#allocation54_spill] sm:$0xff] %v11734_v40  ;;  %v11736_v2 = vpop.f32.mrb[41].mxu1 }
 0x12b   :  { %14760 = vst [vmem:[#allocation55_spill] sm:$0xff] %v11736_v2  ;;  %v11738_v9 = vpop.f32.mrb[42].mxu1 }
 0x12c   :  { %14761 = vst [vmem:[#allocation56_spill] sm:$0xff] %v11738_v9  ;;  %v11740_v39 = vpop.f32.mrb[43].mxu1 }
 0x12d   :  { %14762 = vst [vmem:[#allocation57_spill] sm:$0xff] %v11740_v39 }
 0x12e   :  { %9064 = vmatmul.mubr.msk.bf16.gmra.mrb[84].mxu1 %vm517_vm1, %v11380_v52  ;;  %9454 = vmatmul.mubr.msk.bf16.gmra.mrb[148].mxu0 %vm517_vm1, %v11398_v54 }
 0x12f   :  { %9067 = vmatprep.mubr.msk.bf16.mxu1 %vm517_vm1, %v11385_v53  ;;  %9457 = vmatprep.mubr.msk.bf16.mxu0 %vm517_vm1, %v11403_v55 }
 0x131   :  { %v11750_v37 = vpop.f32.mrb[44].mxu1 }
 0x132   :  { %14763 = vst [vmem:[#allocation58_spill] sm:$0xff] %v11750_v37  ;;  %v11752_v40 = vpop.f32.mrb[45].mxu1 }
 0x133   :  { %14764 = vst [vmem:[#allocation59_spill] sm:$0xff] %v11752_v40  ;;  %v11754_v2 = vpop.f32.mrb[46].mxu1 }
 0x134   :  { %14765 = vst [vmem:[#allocation60_spill] sm:$0xff] %v11754_v2  ;;  %v11756_v9 = vpop.f32.mrb[47].mxu1 }
 0x135   :  { %14766 = vst [vmem:[#allocation61_spill] sm:$0xff] %v11756_v9 }
 0x136   :  { %9068 = vmatmul.mubr.msk.bf16.gmra.mrb[88].mxu1 %vm517_vm1, %v11398_v54  ;;  %9458 = vmatmul.mubr.msk.bf16.gmra.mrb[152].mxu0 %vm517_vm1, %v11416_v56 }
 0x137   :  { %9071 = vmatprep.mubr.msk.bf16.mxu1 %vm517_vm1, %v11403_v55  ;;  %9461 = vmatprep.mubr.msk.bf16.mxu0 %vm517_vm1, %v11421_v57 }
 0x139   :  { %v11766_v39 = vpop.f32.mrb[48].mxu1 }
 0x13a   :  { %14767 = vst [vmem:[#allocation62_spill] sm:$0xff] %v11766_v39  ;;  %v11768_v37 = vpop.f32.mrb[49].mxu1 }
 0x13b   :  { %14768 = vst [vmem:[#allocation63_spill] sm:$0xff] %v11768_v37  ;;  %v11770_v40 = vpop.f32.mrb[50].mxu1 }
 0x13c   :  { %14769 = vst [vmem:[#allocation64_spill] sm:$0xff] %v11770_v40  ;;  %v11772_v2 = vpop.f32.mrb[51].mxu1 }
 0x13d   :  { %14770 = vst [vmem:[#allocation65_spill] sm:$0xff] %v11772_v2 }
 0x13e   :  { %9072 = vmatmul.mubr.msk.bf16.gmra.mrb[92].mxu1 %vm517_vm1, %v11416_v56  ;;  %9462 = vmatmul.mubr.msk.bf16.gmra.mrb[156].mxu0 %vm517_vm1, %v11434_v58 }
 0x13f   :  { %9075 = vmatprep.mubr.msk.bf16.mxu1 %vm517_vm1, %v11421_v57  ;;  %9465 = vmatprep.mubr.msk.bf16.mxu0 %vm517_vm1, %v11439_v59 }
 0x141   :  { %v11782_v9 = vpop.f32.mrb[52].mxu1 }
 0x142   :  { %14771 = vst [vmem:[#allocation66_spill] sm:$0xff] %v11782_v9  ;;  %v11784_v39 = vpop.f32.mrb[53].mxu1 }
 0x143   :  { %14772 = vst [vmem:[#allocation67_spill] sm:$0xff] %v11784_v39  ;;  %v11786_v37 = vpop.f32.mrb[54].mxu1 }
 0x144   :  { %14773 = vst [vmem:[#allocation68_spill] sm:$0xff] %v11786_v37  ;;  %v11788_v40 = vpop.f32.mrb[55].mxu1 }
 0x145   :  { %14774 = vst [vmem:[#allocation69_spill] sm:$0xff] %v11788_v40 }
 0x146   :  { %9076 = vmatmul.mubr.msk.bf16.gmra.mrb[96].mxu1 %vm517_vm1, %v11434_v58  ;;  %9466 = vmatmul.mubr.msk.bf16.gmra.mrb[160].mxu0 %vm517_vm1, %v11452_v60 }
 0x147   :  { %9079 = vmatprep.mubr.msk.bf16.mxu1 %vm517_vm1, %v11439_v59  ;;  %9469 = vmatprep.mubr.msk.bf16.mxu0 %vm517_vm1, %v11457_v61 }
 0x149   :  { %v11798_v2 = vpop.f32.mrb[56].mxu1 }
 0x14a   :  { %14775 = vst [vmem:[#allocation70_spill] sm:$0xff] %v11798_v2  ;;  %v11800_v9 = vpop.f32.mrb[57].mxu1 }
 0x14b   :  { %14776 = vst [vmem:[#allocation71_spill] sm:$0xff] %v11800_v9  ;;  %v11802_v39 = vpop.f32.mrb[58].mxu1 }
 0x14c   :  { %14777 = vst [vmem:[#allocation72_spill] sm:$0xff] %v11802_v39  ;;  %v11804_v37 = vpop.f32.mrb[59].mxu1 }
 0x14e   :  { %9080 = vmatmul.mubr.msk.bf16.gmra.mrb[100].mxu1 %vm517_vm1, %v11452_v60  ;;  %9470 = vmatmul.mubr.msk.bf16.gmra.mrb[164].mxu0 %vm517_vm1, %v11470_v62 }
 0x14f   :  { %9083 = vmatprep.mubr.msk.bf16.mxu1 %vm517_vm1, %v11457_v61  ;;  %9473 = vmatprep.mubr.msk.bf16.mxu0 %vm517_vm1, %v11475_v63 }
 0x151   :  { %v11814_v40 = vpop.f32.mrb[60].mxu1 }
 0x152   :  { %v11816_v2 = vpop.f32.mrb[61].mxu1 }
 0x153   :  { %14778 = vst [vmem:[#allocation73_spill] sm:$0xff] %v11816_v2  ;;  %v11818_v9 = vpop.f32.mrb[62].mxu1  ;;  %v12465_v2 = vld [vmem:[%s14655_s0 + $0xc0] sm:$0xff]  }
 0x154   :  { %14779 = vst [vmem:[#allocation74_spill] sm:$0xff] %v11818_v9  ;;  %v11820_v39 = vpop.f32.mrb[63].mxu1  ;;  %v4070_v9 = vsel %vm710_vm0, %v11655_v3, 0 }
 0x155   :  { %14780 = vst [vmem:[#allocation75_spill] sm:$0xff] %v11820_v39  ;;  %v2390_v39 = vsel %vm710_vm0, %v11664_v45, 0 }
 0x156   :  { %9084 = vmatmul.mubr.msk.bf16.gmra.mrb[104].mxu1 %vm517_vm1, %v11470_v62  ;;  %9474 = vmatmul.mubr.msk.bf16.gmra.mrb[168].mxu0 %vm517_vm1, %v11488_v0 }
 0x157   :  { %9087 = vmatprep.mubr.msk.bf16.mxu1 %vm517_vm1, %v11475_v63  ;;  %9477 = vmatprep.mubr.msk.bf16.mxu0 %vm517_vm1, %v11493_v1 }
 0x15e   :  { %9088 = vmatmul.mubr.msk.bf16.gmra.mrb[108].mxu1 %vm517_vm1, %v11488_v0  ;;  %9478 = vmatmul.mubr.msk.bf16.gmra.mrb[172].mxu0 %vm517_vm1, %v11510_v8 }
 0x15f   :  { %9091 = vmatprep.mubr.msk.bf16.mxu1 %vm517_vm1, %v11493_v1  ;;  %9481 = vmatprep.mubr.msk.bf16.mxu0 %vm517_vm1, %v11517_v19 }
 0x166   :  { %9092 = vmatmul.mubr.msk.bf16.gmra.mrb[112].mxu1 %vm517_vm1, %v11510_v8  ;;  %9482 = vmatmul.mubr.msk.bf16.gmra.mrb[176].mxu0 %vm517_vm1, %v11536_v44 }
 0x167   :  { %9095 = vmatprep.mubr.msk.bf16.mxu1 %vm517_vm1, %v11517_v19  ;;  %9485 = vmatprep.mubr.msk.bf16.mxu0 %vm517_vm1, %v11543_v32 }
 0x16e   :  { %9096 = vmatmul.mubr.msk.bf16.gmra.mrb[116].mxu1 %vm517_vm1, %v11536_v44  ;;  %9486 = vmatmul.mubr.msk.bf16.gmra.mrb[180].mxu0 %vm517_vm1, %v11562_v31 }
 0x16f   :  { %9099 = vmatprep.mubr.msk.bf16.mxu1 %vm517_vm1, %v11543_v32  ;;  %9489 = vmatprep.mubr.msk.bf16.mxu0 %vm517_vm1, %v11569_v34 }
 0x176   :  { %9100 = vmatmul.mubr.msk.bf16.gmra.mrb[120].mxu1 %vm517_vm1, %v11562_v31  ;;  %9490 = vmatmul.mubr.msk.bf16.gmra.mrb[184].mxu0 %vm517_vm1, %v11588_v33 }
 0x177   :  { %9103 = vmatprep.mubr.msk.bf16.mxu1 %vm517_vm1, %v11569_v34  ;;  %9493 = vmatprep.mubr.msk.bf16.mxu0 %vm517_vm1, %v11595_v36 }
 0x17e   :  { %9104 = vmatmul.mubr.msk.bf16.gmra.mrb[124].mxu1 %vm517_vm1, %v11588_v33  ;;  %9494 = vmatmul.mubr.msk.bf16.gmra.mrb[188].mxu0 %vm517_vm1, %v11614_v35 }
 0x17f   :  { %9109 = vmatprep.mubr.msk.bf16.mxu1 %vm517_vm1, %v10979_v4  ;;  %9499 = vmatprep.mubr.msk.bf16.mxu0 %vm517_vm1, %v10984_v5 }
 0x186   :  { %9110 = vmatmul.mubr.msk.bf16.vlgmr.msra.gmra.mrb[128].mxu1 %vm517_vm1, %v10993_v6  ;;  %9500 = vmatmul.mubr.msk.bf16.vlgmr.msra.gmra.mrb[64].mxu0 %vm517_vm1, %v10998_v7 }
 0x187   :  { %9238 = vmatpush3.bf16.msra.mxu1 %v2390_v39  ;;  %9628 = vmatpush3.bf16.msra.mxu0 %v4070_v9  ;;  %v14805_v39 = vld [vmem:[#allocation11_spill] sm:$0xff] }
 0x188   :  { %9113 = vmatprep.mubr.msk.bf16.mxu1 %vm517_vm1, %v11011_v10  ;;  %9503 = vmatprep.mubr.msk.bf16.mxu0 %vm517_vm1, %v10979_v4  ;;  %v14781_v4 = vld [vmem:[#allocation3_spill] sm:$0xff] }
 0x18e   :  { %9114 = vmatmul.mubr.msk.bf16.gmra.mrb[132].mxu1 %vm517_vm1, %v11022_v11  ;;  %9504 = vmatmul.mubr.msk.bf16.gmra.mrb[68].mxu0 %vm517_vm1, %v10993_v6 }
 0x18f   :  { %9117 = vmatprep.mubr.msk.bf16.mxu1 %vm517_vm1, %v11027_v12  ;;  %9507 = vmatprep.mubr.msk.bf16.mxu0 %vm517_vm1, %v11011_v10 }
 0x196   :  { %9118 = vmatmul.mubr.msk.bf16.gmra.mrb[136].mxu1 %vm517_vm1, %v11040_v13  ;;  %9508 = vmatmul.mubr.msk.bf16.gmra.mrb[72].mxu0 %vm517_vm1, %v11022_v11  ;;  %v14786_v11 = vld [vmem:[#allocation4_spill] sm:$0xff] }
 0x197   :  { %9121 = vmatprep.mubr.msk.bf16.mxu1 %vm517_vm1, %v11045_v14  ;;  %9511 = vmatprep.mubr.msk.bf16.mxu0 %vm517_vm1, %v11027_v12  ;;  %v14787_v12 = vld [vmem:[#allocation5_spill] sm:$0xff] }
 0x19e   :  { %9122 = vmatmul.mubr.msk.bf16.gmra.mrb[140].mxu1 %vm517_vm1, %v11058_v15  ;;  %9512 = vmatmul.mubr.msk.bf16.gmra.mrb[76].mxu0 %vm517_vm1, %v11040_v13 }
 0x19f   :  { %9125 = vmatprep.mubr.msk.bf16.mxu1 %vm517_vm1, %v11063_v16  ;;  %9515 = vmatprep.mubr.msk.bf16.mxu0 %vm517_vm1, %v11045_v14 }
 0x1a6   :  { %9126 = vmatmul.mubr.msk.bf16.gmra.mrb[144].mxu1 %vm517_vm1, %v11076_v17  ;;  %9516 = vmatmul.mubr.msk.bf16.gmra.mrb[80].mxu0 %vm517_vm1, %v11058_v15 }
 0x1a7   :  { %9129 = vmatprep.mubr.msk.bf16.mxu1 %vm517_vm1, %v11081_v18  ;;  %9519 = vmatprep.mubr.msk.bf16.mxu0 %vm517_vm1, %v11063_v16 }
 0x1ae   :  { %9130 = vmatmul.mubr.msk.bf16.gmra.mrb[148].mxu1 %vm517_vm1, %v11101_v20  ;;  %9520 = vmatmul.mubr.msk.bf16.gmra.mrb[84].mxu0 %vm517_vm1, %v11076_v17  ;;  %v14792_v17 = vld [vmem:[#allocation6_spill] sm:$0xff] }
 0x1af   :  { %9133 = vmatprep.mubr.msk.bf16.mxu1 %vm517_vm1, %v11106_v21  ;;  %9523 = vmatprep.mubr.msk.bf16.mxu0 %vm517_vm1, %v11081_v18  ;;  %v14793_v18 = vld [vmem:[#allocation7_spill] sm:$0xff] }
 0x1b6   :  { %9134 = vmatmul.mubr.msk.bf16.gmra.mrb[152].mxu1 %vm517_vm1, %v11119_v22  ;;  %9524 = vmatmul.mubr.msk.bf16.gmra.mrb[88].mxu0 %vm517_vm1, %v11101_v20 }
 0x1b7   :  { %9137 = vmatprep.mubr.msk.bf16.mxu1 %vm517_vm1, %v11124_v23  ;;  %9527 = vmatprep.mubr.msk.bf16.mxu0 %vm517_vm1, %v11106_v21 }
 0x1be   :  { %9138 = vmatmul.mubr.msk.bf16.gmra.mrb[156].mxu1 %vm517_vm1, %v11137_v24  ;;  %9528 = vmatmul.mubr.msk.bf16.gmra.mrb[92].mxu0 %vm517_vm1, %v11119_v22 }
 0x1bf   :  { %9141 = vmatprep.mubr.msk.bf16.mxu1 %vm517_vm1, %v11142_v25  ;;  %9531 = vmatprep.mubr.msk.bf16.mxu0 %vm517_vm1, %v11124_v23 }
 0x1c6   :  { %9142 = vmatmul.mubr.msk.bf16.gmra.mrb[160].mxu1 %vm517_vm1, %v11155_v26  ;;  %9532 = vmatmul.mubr.msk.bf16.gmra.mrb[96].mxu0 %vm517_vm1, %v11137_v24  ;;  %v14798_v24 = vld [vmem:[#allocation8_spill] sm:$0xff] }
 0x1c7   :  { %9145 = vmatprep.mubr.msk.bf16.mxu1 %vm517_vm1, %v11160_v27  ;;  %9535 = vmatprep.mubr.msk.bf16.mxu0 %vm517_vm1, %v11142_v25  ;;  %v14799_v25 = vld [vmem:[#allocation9_spill] sm:$0xff] }
 0x1ce   :  { %9146 = vmatmul.mubr.msk.bf16.gmra.mrb[164].mxu1 %vm517_vm1, %v11173_v28  ;;  %9536 = vmatmul.mubr.msk.bf16.gmra.mrb[100].mxu0 %vm517_vm1, %v11155_v26 }
 0x1cf   :  { %9149 = vmatprep.mubr.msk.bf16.mxu1 %vm517_vm1, %v11178_v29  ;;  %9539 = vmatprep.mubr.msk.bf16.mxu0 %vm517_vm1, %v11160_v27 }
 0x1d6   :  { %9150 = vmatmul.mubr.msk.bf16.gmra.mrb[168].mxu1 %vm517_vm1, %v11191_v30  ;;  %9540 = vmatmul.mubr.msk.bf16.gmra.mrb[104].mxu0 %vm517_vm1, %v11173_v28 }
 0x1d7   :  { %9153 = vmatprep.mubr.msk.bf16.mxu1 %vm517_vm1, %v14781_v4  ;;  %9543 = vmatprep.mubr.msk.bf16.mxu0 %vm517_vm1, %v11178_v29 }
 0x1d9   :  { %v11962_v5 = vpop.f32.mrb[64].mxu1 }
 0x1da   :  { %14782 = vst [vmem:[#allocation3_spill] sm:$0xff] %v11962_v5  ;;  %v11964_v6 = vpop.f32.mrb[65].mxu1  ;;  %v12456_v5 = vld [vmem:[%s14655_s0 + $0xb8] sm:$0xff]  }
 0x1db   :  { %14783 = vst [vmem:[#allocation76_spill] sm:$0xff] %v11964_v6  ;;  %v11966_v7 = vpop.f32.mrb[66].mxu1  ;;  %v12447_v6 = vld [vmem:[%s14655_s0 + $0xb0] sm:$0xff]  }
 0x1dc   :  { %14784 = vst [vmem:[#allocation77_spill] sm:$0xff] %v11966_v7  ;;  %v11968_v10 = vpop.f32.mrb[67].mxu1  ;;  %v12438_v7 = vld [vmem:[%s14655_s0 + $0xa8] sm:$0xff]  }
 0x1dd   :  { %14785 = vst [vmem:[#allocation78_spill] sm:$0xff] %v11968_v10  ;;  %v12429_v10 = vld [vmem:[%s14655_s0 + $0xa0] sm:$0xff]  }
 0x1de   :  { %9154 = vmatmul.mubr.msk.bf16.gmra.mrb[172].mxu1 %vm517_vm1, %v14786_v11  ;;  %9544 = vmatmul.mubr.msk.bf16.gmra.mrb[108].mxu0 %vm517_vm1, %v11191_v30  ;;  %v14804_v30 = vld [vmem:[#allocation10_spill] sm:$0xff] }
 0x1df   :  { %9157 = vmatprep.mubr.msk.bf16.mxu1 %vm517_vm1, %v14787_v12  ;;  %9547 = vmatprep.mubr.msk.bf16.mxu0 %vm517_vm1, %v14781_v4 }
 0x1e1   :  { %v11978_v13 = vpop.f32.mrb[68].mxu1 }
 0x1e2   :  { %14788 = vst [vmem:[#allocation4_spill] sm:$0xff] %v11978_v13  ;;  %v11980_v14 = vpop.f32.mrb[69].mxu1  ;;  %v12420_v13 = vld [vmem:[%s14655_s0 + $0x98] sm:$0xff]  }
 0x1e3   :  { %14789 = vst [vmem:[#allocation5_spill] sm:$0xff] %v11980_v14  ;;  %v11982_v15 = vpop.f32.mrb[70].mxu1  ;;  %v12411_v14 = vld [vmem:[%s14655_s0 + $0x90] sm:$0xff]  }
 0x1e4   :  { %14790 = vst [vmem:[#allocation79_spill] sm:$0xff] %v11982_v15  ;;  %v11984_v16 = vpop.f32.mrb[71].mxu1  ;;  %v12402_v15 = vld [vmem:[%s14655_s0 + $0x88] sm:$0xff]  }
 0x1e5   :  { %14791 = vst [vmem:[#allocation80_spill] sm:$0xff] %v11984_v16  ;;  %v12393_v16 = vld [vmem:[%s14655_s0 + $0x80] sm:$0xff]  }
 0x1e6   :  { %9158 = vmatmul.mubr.msk.bf16.gmra.mrb[176].mxu1 %vm517_vm1, %v14792_v17  ;;  %9548 = vmatmul.mubr.msk.bf16.gmra.mrb[112].mxu0 %vm517_vm1, %v14786_v11 }
 0x1e7   :  { %9161 = vmatprep.mubr.msk.bf16.mxu1 %vm517_vm1, %v14793_v18  ;;  %9551 = vmatprep.mubr.msk.bf16.mxu0 %vm517_vm1, %v14787_v12 }
 0x1e9   :  { %v11994_v20 = vpop.f32.mrb[72].mxu1 }
 0x1ea   :  { %14794 = vst [vmem:[#allocation6_spill] sm:$0xff] %v11994_v20  ;;  %v11996_v21 = vpop.f32.mrb[73].mxu1  ;;  %v12384_v20 = vld [vmem:[%s14655_s0 + $0x78] sm:$0xff]  }
 0x1eb   :  { %14795 = vst [vmem:[#allocation7_spill] sm:$0xff] %v11996_v21  ;;  %v11998_v22 = vpop.f32.mrb[74].mxu1  ;;  %v12375_v21 = vld [vmem:[%s14655_s0 + $0x70] sm:$0xff]  }
 0x1ec   :  { %14796 = vst [vmem:[#allocation81_spill] sm:$0xff] %v11998_v22  ;;  %v12000_v23 = vpop.f32.mrb[75].mxu1  ;;  %v12366_v22 = vld [vmem:[%s14655_s0 + $0x68] sm:$0xff]  }
 0x1ed   :  { %14797 = vst [vmem:[#allocation82_spill] sm:$0xff] %v12000_v23  ;;  %v12357_v23 = vld [vmem:[%s14655_s0 + $0x60] sm:$0xff]  }
 0x1ee   :  { %9162 = vmatmul.mubr.msk.bf16.gmra.mrb[180].mxu1 %vm517_vm1, %v14798_v24  ;;  %9552 = vmatmul.mubr.msk.bf16.gmra.mrb[116].mxu0 %vm517_vm1, %v14792_v17 }
 0x1ef   :  { %9165 = vmatprep.mubr.msk.bf16.mxu1 %vm517_vm1, %v14799_v25  ;;  %9555 = vmatprep.mubr.msk.bf16.mxu0 %vm517_vm1, %v14793_v18 }
 0x1f1   :  { %v12010_v26 = vpop.f32.mrb[76].mxu1 }
 0x1f2   :  { %14800 = vst [vmem:[#allocation8_spill] sm:$0xff] %v12010_v26  ;;  %v12012_v27 = vpop.f32.mrb[77].mxu1 }
 0x1f3   :  { %14801 = vst [vmem:[#allocation9_spill] sm:$0xff] %v12012_v27  ;;  %v12014_v28 = vpop.f32.mrb[78].mxu1  ;;  %v12059_v27 = vld [vmem:[%s14654_s1 + $0x20] sm:$0xf] }
 0x1f4   :  { %14802 = vst [vmem:[#allocation83_spill] sm:$0xff] %v12014_v28  ;;  %v12016_v29 = vpop.f32.mrb[79].mxu1  ;;  %10796 = vmatprep.subr.msk.bf16.mxu0 %vm710_vm0, %v12059_v27 }
 0x1f5   :  { %14803 = vst [vmem:[#allocation84_spill] sm:$0xff] %v12016_v29  ;;  %v14810_v29 = vld [vmem:[#allocation12_spill] sm:$0xff] }
 0x1f6   :  { %9166 = vmatmul.mubr.msk.bf16.gmra.mrb[184].mxu1 %vm517_vm1, %v14804_v30  ;;  %9556 = vmatmul.mubr.msk.bf16.gmra.mrb[120].mxu0 %vm517_vm1, %v14798_v24 }
 0x1f7   :  { %9169 = vmatprep.mubr.msk.bf16.mxu1 %vm517_vm1, %v14805_v39  ;;  %9559 = vmatprep.mubr.msk.bf16.mxu0 %vm517_vm1, %v14799_v25 }
 0x1f9   :  { %v12026_v3 = vpop.f32.mrb[80].mxu1 }
 0x1fa   :  { %14806 = vst [vmem:[#allocation10_spill] sm:$0xff] %v12026_v3  ;;  %v12028_v9 = vpop.f32.mrb[81].mxu1 }
 0x1fb   :  { %14807 = vst [vmem:[#allocation11_spill] sm:$0xff] %v12028_v9  ;;  %v12030_v45 = vpop.f32.mrb[82].mxu1 }
 0x1fc   :  { %14808 = vst [vmem:[#allocation85_spill] sm:$0xff] %v12030_v45  ;;  %v12032_v4 = vpop.f32.mrb[83].mxu1 }
 0x1fd   :  { %14809 = vst [vmem:[#allocation86_spill] sm:$0xff] %v12032_v4  ;;  %v14815_v4 = vld [vmem:[#allocation35_spill] sm:$0xff] }
 0x1fe   :  { %9170 = vmatmul.mubr.msk.bf16.gmra.mrb[188].mxu1 %vm517_vm1, %v14810_v29  ;;  %9560 = vmatmul.mubr.msk.bf16.gmra.mrb[124].mxu0 %vm517_vm1, %v14804_v30 }
 0x1ff   :  { %9173 = vmatprep.mubr.msk.bf16.mxu1 %vm517_vm1, %v11286_v41  ;;  %9563 = vmatprep.mubr.msk.bf16.mxu0 %vm517_vm1, %v11621_v38 }
 0x201   :  { %v12042_v28 = vpop.f32.mrb[84].mxu1 }
 0x202   :  { %14811 = vst [vmem:[#allocation12_spill] sm:$0xff] %v12042_v28  ;;  %v12044_v3 = vpop.f32.mrb[85].mxu1 }
 0x203   :  { %14812 = vst [vmem:[#allocation87_spill] sm:$0xff] %v12044_v3  ;;  %v12046_v9 = vpop.f32.mrb[86].mxu1 }
 0x204   :  { %14813 = vst [vmem:[#allocation88_spill] sm:$0xff] %v12046_v9  ;;  %v12048_v45 = vpop.f32.mrb[87].mxu1 }
 0x205   :  { %14814 = vst [vmem:[#allocation89_spill] sm:$0xff] %v12048_v45  ;;  %v12068_v45 = vld [vmem:[%s14654_s1 + $0x1c] sm:$0xf] }
 0x206   :  { %9174 = vmatmul.mubr.msk.bf16.gmra.mrb[192].mxu1 %vm517_vm1, %v11299_v42  ;;  %9564 = vmatmul.mubr.msk.bf16.gmra.mrb[128].mxu0 %vm517_vm1, %v14815_v4 }
 0x207   :  { %9177 = vmatprep.mubr.msk.bf16.mxu1 %vm517_vm1, %v11304_v43  ;;  %9567 = vmatprep.mubr.msk.bf16.mxu0 %vm517_vm1, %v11286_v41 }
 0x208   :  { %10795 = vmatprep.subr.msk.bf16.mxu1 %vm710_vm0, %v12068_v45 }
 0x209   :  { %v12070_v9 = vpop.f32.mrb[88].mxu1 }
 0x20a   :  { %14816 = vst [vmem:[#allocation35_spill] sm:$0xff] %v12070_v9  ;;  %v12074_v3 = vpop.f32.mrb[89].mxu1 }
 0x20b   :  { %14817 = vst [vmem:[#allocation90_spill] sm:$0xff] %v12074_v3  ;;  %v12076_v28 = vpop.f32.mrb[90].mxu1 }
 0x20c   :  { %14818 = vst [vmem:[#allocation91_spill] sm:$0xff] %v12076_v28  ;;  %v12078_v26 = vpop.f32.mrb[91].mxu1 }
 0x20d   :  { %14819 = vst [vmem:[#allocation92_spill] sm:$0xff] %v12078_v26 }
 0x20e   :  { %9178 = vmatmul.mubr.msk.bf16.gmra.mrb[196].mxu1 %vm517_vm1, %v11326_v46  ;;  %9568 = vmatmul.mubr.msk.bf16.gmra.mrb[132].mxu0 %vm517_vm1, %v11299_v42 }
 0x20f   :  { %9181 = vmatprep.mubr.msk.bf16.mxu1 %vm517_vm1, %v11331_v47  ;;  %9571 = vmatprep.mubr.msk.bf16.mxu0 %vm517_vm1, %v11304_v43 }
 0x211   :  { %v12088_v41 = vpop.f32.mrb[92].mxu1 }
 0x212   :  { %14820 = vst [vmem:[#allocation93_spill] sm:$0xff] %v12088_v41  ;;  %v12090_v9 = vpop.f32.mrb[93].mxu1 }
 0x213   :  { %14821 = vst [vmem:[#allocation94_spill] sm:$0xff] %v12090_v9  ;;  %v12092_v3 = vpop.f32.mrb[94].mxu1 }
 0x214   :  { %14822 = vst [vmem:[#allocation95_spill] sm:$0xff] %v12092_v3  ;;  %v12094_v28 = vpop.f32.mrb[95].mxu1 }
 0x215   :  { %14823 = vst [vmem:[#allocation96_spill] sm:$0xff] %v12094_v28 }
 0x216   :  { %9182 = vmatmul.mubr.msk.bf16.gmra.mrb[200].mxu1 %vm517_vm1, %v11344_v48  ;;  %9572 = vmatmul.mubr.msk.bf16.gmra.mrb[136].mxu0 %vm517_vm1, %v11326_v46 }
 0x217   :  { %9185 = vmatprep.mubr.msk.bf16.mxu1 %vm517_vm1, %v11349_v49  ;;  %9575 = vmatprep.mubr.msk.bf16.mxu0 %vm517_vm1, %v11331_v47 }
 0x219   :  { %v12104_v26 = vpop.f32.mrb[96].mxu1 }
 0x21a   :  { %14824 = vst [vmem:[#allocation97_spill] sm:$0xff] %v12104_v26  ;;  %v12106_v41 = vpop.f32.mrb[97].mxu1 }
 0x21b   :  { %14825 = vst [vmem:[#allocation98_spill] sm:$0xff] %v12106_v41  ;;  %v12108_v9 = vpop.f32.mrb[98].mxu1 }
 0x21c   :  { %14826 = vst [vmem:[#allocation99_spill] sm:$0xff] %v12108_v9  ;;  %v12110_v3 = vpop.f32.mrb[99].mxu1 }
 0x21d   :  { %14827 = vst [vmem:[#allocation100_spill] sm:$0xff] %v12110_v3 }
 0x21e   :  { %9186 = vmatmul.mubr.msk.bf16.gmra.mrb[204].mxu1 %vm517_vm1, %v11362_v50  ;;  %9576 = vmatmul.mubr.msk.bf16.gmra.mrb[140].mxu0 %vm517_vm1, %v11344_v48 }
 0x21f   :  { %9189 = vmatprep.mubr.msk.bf16.mxu1 %vm517_vm1, %v11367_v51  ;;  %9579 = vmatprep.mubr.msk.bf16.mxu0 %vm517_vm1, %v11349_v49 }
 0x221   :  { %v12120_v28 = vpop.f32.mrb[100].mxu1 }
 0x222   :  { %14828 = vst [vmem:[#allocation101_spill] sm:$0xff] %v12120_v28  ;;  %v12122_v26 = vpop.f32.mrb[101].mxu1 }
 0x223   :  { %14829 = vst [vmem:[#allocation102_spill] sm:$0xff] %v12122_v26  ;;  %v12124_v41 = vpop.f32.mrb[102].mxu1 }
 0x224   :  { %14830 = vst [vmem:[#allocation103_spill] sm:$0xff] %v12124_v41  ;;  %v12126_v9 = vpop.f32.mrb[103].mxu1 }
 0x225   :  { %14831 = vst [vmem:[#allocation104_spill] sm:$0xff] %v12126_v9 }
 0x226   :  { %9190 = vmatmul.mubr.msk.bf16.gmra.mrb[208].mxu1 %vm517_vm1, %v11380_v52  ;;  %9580 = vmatmul.mubr.msk.bf16.gmra.mrb[144].mxu0 %vm517_vm1, %v11362_v50 }
 0x227   :  { %9193 = vmatprep.mubr.msk.bf16.mxu1 %vm517_vm1, %v11385_v53  ;;  %9583 = vmatprep.mubr.msk.bf16.mxu0 %vm517_vm1, %v11367_v51 }
 0x229   :  { %v12136_v3 = vpop.f32.mrb[104].mxu1 }
 0x22a   :  { %14832 = vst [vmem:[#allocation105_spill] sm:$0xff] %v12136_v3  ;;  %v12138_v28 = vpop.f32.mrb[105].mxu1 }
 0x22b   :  { %14833 = vst [vmem:[#allocation106_spill] sm:$0xff] %v12138_v28  ;;  %v12140_v26 = vpop.f32.mrb[106].mxu1 }
 0x22c   :  { %14834 = vst [vmem:[#allocation107_spill] sm:$0xff] %v12140_v26  ;;  %v12142_v41 = vpop.f32.mrb[107].mxu1 }
 0x22d   :  { %14835 = vst [vmem:[#allocation108_spill] sm:$0xff] %v12142_v41 }
 0x22e   :  { %9194 = vmatmul.mubr.msk.bf16.gmra.mrb[212].mxu1 %vm517_vm1, %v11398_v54  ;;  %9584 = vmatmul.mubr.msk.bf16.gmra.mrb[148].mxu0 %vm517_vm1, %v11380_v52 }
 0x22f   :  { %9197 = vmatprep.mubr.msk.bf16.mxu1 %vm517_vm1, %v11403_v55  ;;  %9587 = vmatprep.mubr.msk.bf16.mxu0 %vm517_vm1, %v11385_v53 }
 0x231   :  { %v12152_v9 = vpop.f32.mrb[108].mxu1 }
 0x232   :  { %14836 = vst [vmem:[#allocation109_spill] sm:$0xff] %v12152_v9  ;;  %v12154_v3 = vpop.f32.mrb[109].mxu1 }
 0x233   :  { %14837 = vst [vmem:[#allocation110_spill] sm:$0xff] %v12154_v3  ;;  %v12156_v28 = vpop.f32.mrb[110].mxu1 }
 0x234   :  { %14838 = vst [vmem:[#allocation111_spill] sm:$0xff] %v12156_v28  ;;  %v12158_v26 = vpop.f32.mrb[111].mxu1 }
 0x235   :  { %14839 = vst [vmem:[#allocation112_spill] sm:$0xff] %v12158_v26 }
 0x236   :  { %9198 = vmatmul.mubr.msk.bf16.gmra.mrb[216].mxu1 %vm517_vm1, %v11416_v56  ;;  %9588 = vmatmul.mubr.msk.bf16.gmra.mrb[152].mxu0 %vm517_vm1, %v11398_v54 }
 0x237   :  { %9201 = vmatprep.mubr.msk.bf16.mxu1 %vm517_vm1, %v11421_v57  ;;  %9591 = vmatprep.mubr.msk.bf16.mxu0 %vm517_vm1, %v11403_v55 }
 0x239   :  { %v12168_v41 = vpop.f32.mrb[112].mxu1 }
 0x23a   :  { %14840 = vst [vmem:[#allocation113_spill] sm:$0xff] %v12168_v41  ;;  %v12170_v9 = vpop.f32.mrb[113].mxu1 }
 0x23b   :  { %14841 = vst [vmem:[#allocation114_spill] sm:$0xff] %v12170_v9  ;;  %v12172_v3 = vpop.f32.mrb[114].mxu1 }
 0x23c   :  { %14842 = vst [vmem:[#allocation115_spill] sm:$0xff] %v12172_v3  ;;  %v12174_v28 = vpop.f32.mrb[115].mxu1 }
 0x23d   :  { %14843 = vst [vmem:[#allocation116_spill] sm:$0xff] %v12174_v28 }
 0x23e   :  { %9202 = vmatmul.mubr.msk.bf16.gmra.mrb[220].mxu1 %vm517_vm1, %v11434_v58  ;;  %9592 = vmatmul.mubr.msk.bf16.gmra.mrb[156].mxu0 %vm517_vm1, %v11416_v56 }
 0x23f   :  { %9205 = vmatprep.mubr.msk.bf16.mxu1 %vm517_vm1, %v11439_v59  ;;  %9595 = vmatprep.mubr.msk.bf16.mxu0 %vm517_vm1, %v11421_v57 }
 0x241   :  { %v12184_v26 = vpop.f32.mrb[116].mxu1 }
 0x242   :  { %14844 = vst [vmem:[#allocation117_spill] sm:$0xff] %v12184_v26  ;;  %v12186_v41 = vpop.f32.mrb[117].mxu1 }
 0x243   :  { %14845 = vst [vmem:[#allocation118_spill] sm:$0xff] %v12186_v41  ;;  %v12188_v9 = vpop.f32.mrb[118].mxu1 }
 0x244   :  { %14846 = vst [vmem:[#allocation119_spill] sm:$0xff] %v12188_v9  ;;  %v12190_v3 = vpop.f32.mrb[119].mxu1 }
 0x245   :  { %14847 = vst [vmem:[#allocation120_spill] sm:$0xff] %v12190_v3 }
 0x246   :  { %9206 = vmatmul.mubr.msk.bf16.gmra.mrb[224].mxu1 %vm517_vm1, %v11452_v60  ;;  %9596 = vmatmul.mubr.msk.bf16.gmra.mrb[160].mxu0 %vm517_vm1, %v11434_v58 }
 0x247   :  { %9209 = vmatprep.mubr.msk.bf16.mxu1 %vm517_vm1, %v11457_v61  ;;  %9599 = vmatprep.mubr.msk.bf16.mxu0 %vm517_vm1, %v11439_v59 }
 0x249   :  { %v12200_v28 = vpop.f32.mrb[120].mxu1 }
 0x24a   :  { %14848 = vst [vmem:[#allocation121_spill] sm:$0xff] %v12200_v28  ;;  %v12202_v26 = vpop.f32.mrb[121].mxu1 }
 0x24b   :  { %14849 = vst [vmem:[#allocation122_spill] sm:$0xff] %v12202_v26  ;;  %v12204_v41 = vpop.f32.mrb[122].mxu1 }
 0x24c   :  { %14850 = vst [vmem:[#allocation123_spill] sm:$0xff] %v12204_v41  ;;  %v12206_v9 = vpop.f32.mrb[123].mxu1 }
 0x24d   :  { %14851 = vst [vmem:[#allocation124_spill] sm:$0xff] %v12206_v9  ;;  %v12348_v9 = vld [vmem:[%s14655_s0 + $0x58] sm:$0xff]  }
 0x24e   :  { %9210 = vmatmul.mubr.msk.bf16.gmra.mrb[228].mxu1 %vm517_vm1, %v11470_v62  ;;  %9600 = vmatmul.mubr.msk.bf16.gmra.mrb[164].mxu0 %vm517_vm1, %v11452_v60 }
 0x24f   :  { %9213 = vmatprep.mubr.msk.bf16.mxu1 %vm517_vm1, %v11475_v63  ;;  %9603 = vmatprep.mubr.msk.bf16.mxu0 %vm517_vm1, %v11457_v61 }
 0x251   :  { %v12216_v3 = vpop.f32.mrb[124].mxu1 }
 0x252   :  { %14852 = vst [vmem:[#allocation125_spill] sm:$0xff] %v12216_v3  ;;  %v12218_v28 = vpop.f32.mrb[125].mxu1  ;;  %v10873_v3 = vld [vmem:[%s14655_s0 + $0x8] sm:$0xff]  }
 0x253   :  { %14853 = vst [vmem:[#allocation126_spill] sm:$0xff] %v12218_v28  ;;  %v12220_v26 = vpop.f32.mrb[126].mxu1  ;;  %v5426_v28 = vsel %vm710_vm0, %v12059_v27, 0  ;;  %v10875_v27 = vld [vmem:[%s14655_s0 + $0x10] sm:$0xff]  }
 0x254   :  { %14854 = vst [vmem:[#allocation127_spill] sm:$0xff] %v12220_v26  ;;  %v12222_v41 = vpop.f32.mrb[127].mxu1  ;;  %v12275_v26 = vld [vmem:[%s14655_s0 + $0x20] sm:$0xff]  }
 0x255   :  { %14855 = vst [vmem:[#allocation128_spill] sm:$0xff] %v12222_v41  ;;  %v10871_v41 = vld [vmem:[%s14655_s0] sm:$0xff]  }
 0x256   :  { %9214 = vmatmul.mubr.msk.bf16.gmra.mrb[232].mxu1 %vm517_vm1, %v11488_v0  ;;  %9604 = vmatmul.mubr.msk.bf16.gmra.mrb[168].mxu0 %vm517_vm1, %v11470_v62 }
 0x257   :  { %9217 = vmatprep.mubr.msk.bf16.mxu1 %vm517_vm1, %v11493_v1  ;;  %9607 = vmatprep.mubr.msk.bf16.mxu0 %vm517_vm1, %v11475_v63 }
 0x25e   :  { %9218 = vmatmul.mubr.msk.bf16.gmra.mrb[236].mxu1 %vm517_vm1, %v11510_v8  ;;  %9608 = vmatmul.mubr.msk.bf16.gmra.mrb[172].mxu0 %vm517_vm1, %v11488_v0 }
 0x25f   :  { %9221 = vmatprep.mubr.msk.bf16.mxu1 %vm517_vm1, %v11517_v19  ;;  %9611 = vmatprep.mubr.msk.bf16.mxu0 %vm517_vm1, %v11493_v1 }
 0x266   :  { %9222 = vmatmul.mubr.msk.bf16.gmra.mrb[240].mxu1 %vm517_vm1, %v11536_v44  ;;  %9612 = vmatmul.mubr.msk.bf16.gmra.mrb[176].mxu0 %vm517_vm1, %v11510_v8 }
 0x267   :  { %9225 = vmatprep.mubr.msk.bf16.mxu1 %vm517_vm1, %v11543_v32  ;;  %9615 = vmatprep.mubr.msk.bf16.mxu0 %vm517_vm1, %v11517_v19 }
 0x26e   :  { %9226 = vmatmul.mubr.msk.bf16.gmra.mrb[244].mxu1 %vm517_vm1, %v11562_v31  ;;  %9616 = vmatmul.mubr.msk.bf16.gmra.mrb[180].mxu0 %vm517_vm1, %v11536_v44 }
 0x26f   :  { %9229 = vmatprep.mubr.msk.bf16.mxu1 %vm517_vm1, %v11569_v34  ;;  %9619 = vmatprep.mubr.msk.bf16.mxu0 %vm517_vm1, %v11543_v32 }
 0x276   :  { %9230 = vmatmul.mubr.msk.bf16.gmra.mrb[248].mxu1 %vm517_vm1, %v11588_v33  ;;  %9620 = vmatmul.mubr.msk.bf16.gmra.mrb[184].mxu0 %vm517_vm1, %v11562_v31 }
 0x277   :  { %9233 = vmatprep.mubr.msk.bf16.mxu1 %vm517_vm1, %v11595_v36  ;;  %9623 = vmatprep.mubr.msk.bf16.mxu0 %vm517_vm1, %v11569_v34 }
 0x27e   :  { %9234 = vmatmul.mubr.msk.bf16.gmra.mrb[252].mxu1 %vm517_vm1, %v11614_v35  ;;  %9624 = vmatmul.mubr.msk.bf16.gmra.mrb[188].mxu0 %vm517_vm1, %v11588_v33  ;;  %v4748_v35 = vsel %vm710_vm0, %v12068_v45, 0  ;;  %v10877_v45 = vld [vmem:[%s14655_s0 + $0x18] sm:$0xff]  }
 0x27f   :  { %9239 = vmatprep.mubr.msk.bf16.mxu1 %vm517_vm1, %v10871_v41  ;;  %9629 = vmatprep.mubr.msk.bf16.mxu0 %vm517_vm1, %v12275_v26  ;;  %v12290_v41 = vld [vmem:[%s14655_s0 + $0x28] sm:$0xff]  }
 0x286   :  { %9240 = vmatmul.mubr.msk.bf16.vlgmr.msra.gmra.mrb[128].mxu1 %vm517_vm1, %v10873_v3  ;;  %9630 = vmatmul.mubr.msk.bf16.vlgmr.msra.gmra.mrb[0].mxu0 %vm517_vm1, %v12290_v41  ;;  %v12301_v3 = vld [vmem:[%s14655_s0 + $0x30] sm:$0xff]  }
 0x287   :  { %9758 = vmatpush3.bf16.msra.mxu1 %v4748_v35  ;;  %9888 = vmatpush3.bf16.msra.mxu0 %v5426_v28  ;;  %v12312_v28 = vld [vmem:[%s14655_s0 + $0x38] sm:$0xff]   ;;  %v12321_v35 = vld [vmem:[%s14655_s0 + $0x40] sm:$0xff]  }
 0x288   :  { %9243 = vmatprep.mubr.msk.bf16.mxu1 %vm517_vm1, %v10875_v27  ;;  %9633 = vmatprep.mubr.msk.bf16.mxu0 %vm517_vm1, %v12301_v3  ;;  %v12330_v27 = vld [vmem:[%s14655_s0 + $0x48] sm:$0xff]  }
 0x28e   :  { %9244 = vmatmul.mubr.msk.bf16.gmra.mrb[132].mxu1 %vm517_vm1, %v10877_v45  ;;  %9634 = vmatmul.mubr.msk.bf16.gmra.mrb[4].mxu0 %vm517_vm1, %v12312_v28  ;;  %v12339_v45 = vld [vmem:[%s14655_s0 + $0x50] sm:$0xff]  }
 0x28f   :  { %9247 = vmatprep.mubr.msk.bf16.mxu1 %vm517_vm1, %v12275_v26  ;;  %9637 = vmatprep.mubr.msk.bf16.mxu0 %vm517_vm1, %v12321_v35 }
 0x296   :  { %9248 = vmatmul.mubr.msk.bf16.gmra.mrb[136].mxu1 %vm517_vm1, %v12290_v41  ;;  %9638 = vmatmul.mubr.msk.bf16.gmra.mrb[8].mxu0 %vm517_vm1, %v12330_v27 }
 0x297   :  { %9251 = vmatprep.mubr.msk.bf16.mxu1 %vm517_vm1, %v12301_v3  ;;  %9641 = vmatprep.mubr.msk.bf16.mxu0 %vm517_vm1, %v12339_v45 }
 0x29e   :  { %9252 = vmatmul.mubr.msk.bf16.gmra.mrb[140].mxu1 %vm517_vm1, %v12312_v28  ;;  %9642 = vmatmul.mubr.msk.bf16.gmra.mrb[12].mxu0 %vm517_vm1, %v12348_v9 }
 0x29f   :  { %9255 = vmatprep.mubr.msk.bf16.mxu1 %vm517_vm1, %v12321_v35  ;;  %9645 = vmatprep.mubr.msk.bf16.mxu0 %vm517_vm1, %v12357_v23 }
 0x2a6   :  { %9256 = vmatmul.mubr.msk.bf16.gmra.mrb[144].mxu1 %vm517_vm1, %v12330_v27  ;;  %9646 = vmatmul.mubr.msk.bf16.gmra.mrb[16].mxu0 %vm517_vm1, %v12366_v22 }
 0x2a7   :  { %9259 = vmatprep.mubr.msk.bf16.mxu1 %vm517_vm1, %v12339_v45  ;;  %9649 = vmatprep.mubr.msk.bf16.mxu0 %vm517_vm1, %v12375_v21 }
 0x2ae   :  { %9260 = vmatmul.mubr.msk.bf16.gmra.mrb[148].mxu1 %vm517_vm1, %v12348_v9  ;;  %9650 = vmatmul.mubr.msk.bf16.gmra.mrb[20].mxu0 %vm517_vm1, %v12384_v20 }
 0x2af   :  { %9263 = vmatprep.mubr.msk.bf16.mxu1 %vm517_vm1, %v12357_v23  ;;  %9653 = vmatprep.mubr.msk.bf16.mxu0 %vm517_vm1, %v12393_v16 }
 0x2b6   :  { %9264 = vmatmul.mubr.msk.bf16.gmra.mrb[152].mxu1 %vm517_vm1, %v12366_v22  ;;  %9654 = vmatmul.mubr.msk.bf16.gmra.mrb[24].mxu0 %vm517_vm1, %v12402_v15 }
 0x2b7   :  { %9267 = vmatprep.mubr.msk.bf16.mxu1 %vm517_vm1, %v12375_v21  ;;  %9657 = vmatprep.mubr.msk.bf16.mxu0 %vm517_vm1, %v12411_v14 }
 0x2be   :  { %9268 = vmatmul.mubr.msk.bf16.gmra.mrb[156].mxu1 %vm517_vm1, %v12384_v20  ;;  %9658 = vmatmul.mubr.msk.bf16.gmra.mrb[28].mxu0 %vm517_vm1, %v12420_v13 }
 0x2bf   :  { %9271 = vmatprep.mubr.msk.bf16.mxu1 %vm517_vm1, %v12393_v16  ;;  %9661 = vmatprep.mubr.msk.bf16.mxu0 %vm517_vm1, %v12429_v10 }
 0x2c6   :  { %9272 = vmatmul.mubr.msk.bf16.gmra.mrb[160].mxu1 %vm517_vm1, %v12402_v15  ;;  %9662 = vmatmul.mubr.msk.bf16.gmra.mrb[32].mxu0 %vm517_vm1, %v12438_v7 }
 0x2c7   :  { %9275 = vmatprep.mubr.msk.bf16.mxu1 %vm517_vm1, %v12411_v14  ;;  %9665 = vmatprep.mubr.msk.bf16.mxu0 %vm517_vm1, %v12447_v6 }
 0x2ce   :  { %9276 = vmatmul.mubr.msk.bf16.gmra.mrb[164].mxu1 %vm517_vm1, %v12420_v13  ;;  %9666 = vmatmul.mubr.msk.bf16.gmra.mrb[36].mxu0 %vm517_vm1, %v12456_v5 }
 0x2cf   :  { %9279 = vmatprep.mubr.msk.bf16.mxu1 %vm517_vm1, %v12429_v10  ;;  %9669 = vmatprep.mubr.msk.bf16.mxu0 %vm517_vm1, %v12465_v2 }
 0x2d6   :  { %9280 = vmatmul.mubr.msk.bf16.gmra.mrb[168].mxu1 %vm517_vm1, %v12438_v7  ;;  %9670 = vmatmul.mubr.msk.bf16.gmra.mrb[40].mxu0 %vm517_vm1, %v14786_v11  ;;  %v12488_v11 = vld [vmem:[%s14655_s0 + $0xc8] sm:$0xff]  }
 0x2d7   :  { %9283 = vmatprep.mubr.msk.bf16.mxu1 %vm517_vm1, %v12447_v6  ;;  %9673 = vmatprep.mubr.msk.bf16.mxu0 %vm517_vm1, %v14787_v12  ;;  %v12497_v12 = vld [vmem:[%s14655_s0 + $0xd0] sm:$0xff]  }
 0x2de   :  { %9284 = vmatmul.mubr.msk.bf16.gmra.mrb[172].mxu1 %vm517_vm1, %v12456_v5  ;;  %9674 = vmatmul.mubr.msk.bf16.gmra.mrb[44].mxu0 %vm517_vm1, %v14792_v17  ;;  %v12506_v17 = vld [vmem:[%s14655_s0 + $0xd8] sm:$0xff]  }
 0x2df   :  { %9287 = vmatprep.mubr.msk.bf16.mxu1 %vm517_vm1, %v12465_v2  ;;  %9677 = vmatprep.mubr.msk.bf16.mxu0 %vm517_vm1, %v14793_v18  ;;  %v12515_v18 = vld [vmem:[%s14655_s0 + $0xe0] sm:$0xff]  }
 0x2e6   :  { %9288 = vmatmul.mubr.msk.bf16.gmra.mrb[176].mxu1 %vm517_vm1, %v12488_v11  ;;  %9678 = vmatmul.mubr.msk.bf16.gmra.mrb[48].mxu0 %vm517_vm1, %v14798_v24  ;;  %v12524_v24 = vld [vmem:[%s14655_s0 + $0x110] sm:$0xff]  }
 0x2e7   :  { %9291 = vmatprep.mubr.msk.bf16.mxu1 %vm517_vm1, %v12497_v12  ;;  %9681 = vmatprep.mubr.msk.bf16.mxu0 %vm517_vm1, %v14799_v25  ;;  %14856 = vst [vmem:[#allocation129_spill] sm:$0xff] %v12524_v24  ;;  %v12529_v25 = vld [vmem:[%s14655_s0 + $0xe8] sm:$0xff]  }
 0x2ee   :  { %9292 = vmatmul.mubr.msk.bf16.gmra.mrb[180].mxu1 %vm517_vm1, %v12506_v17  ;;  %9682 = vmatmul.mubr.msk.bf16.gmra.mrb[52].mxu0 %vm517_vm1, %v14804_v30  ;;  %v12538_v30 = vld [vmem:[%s14655_s0 + $0xf0] sm:$0xff]  }
 0x2ef   :  { %9295 = vmatprep.mubr.msk.bf16.mxu1 %vm517_vm1, %v12515_v18  ;;  %9685 = vmatprep.mubr.msk.bf16.mxu0 %vm517_vm1, %v14805_v39  ;;  %v12547_v39 = vld [vmem:[%s14655_s0 + $0x118] sm:$0xff]  }
 0x2f6   :  { %9296 = vmatmul.mubr.msk.bf16.gmra.mrb[184].mxu1 %vm517_vm1, %v12529_v25  ;;  %9686 = vmatmul.mubr.msk.bf16.gmra.mrb[56].mxu0 %vm517_vm1, %v14810_v29  ;;  %v12552_v29 = vld [vmem:[%s14655_s0 + $0xf8] sm:$0xff]  }
 0x2f7   :  { %9299 = vmatprep.mubr.msk.bf16.mxu1 %vm517_vm1, %v12538_v30  ;;  %9689 = vmatprep.mubr.msk.bf16.mxu0 %vm517_vm1, %v12524_v24  ;;  %v10903_v24 = vld [vmem:[%s14655_s0 + $0x130] sm:$0xff]  }
 0x2fe   :  { %9300 = vmatmul.mubr.msk.bf16.gmra.mrb[188].mxu1 %vm517_vm1, %v12552_v29  ;;  %9690 = vmatmul.mubr.msk.bf16.gmra.mrb[60].mxu0 %vm517_vm1, %v12547_v39 }
 0x2ff   :  { %9303 = vmatprep.mubr.msk.bf16.mxu1 %vm517_vm1, %v11621_v38  ;;  %9693 = vmatprep.mubr.msk.bf16.mxu0 %vm517_vm1, %v11304_v43  ;;  %v6229_v38 = vlaneseq }
 0x306   :  { %9304 = vmatmul.mubr.msk.bf16.gmra.mrb[192].mxu1 %vm517_vm1, %v14815_v4  ;;  %9694 = vmatmul.mubr.msk.bf16.gmra.mrb[192].mxu0 %vm517_vm1, %v11326_v46 }
 0x307   :  { %9307 = vmatprep.mubr.msk.bf16.mxu1 %vm517_vm1, %v10903_v24  ;;  %9697 = vmatprep.mubr.msk.bf16.mxu0 %vm517_vm1, %v11331_v47  ;;  %v14862_v24 = vld [vmem:[#allocation18_spill] sm:$0xff] }
 0x30e   :  { %9308 = vmatmul.mubr.msk.bf16.gmra.mrb[196].mxu1 %vm517_vm1, %v11299_v42  ;;  %9698 = vmatmul.mubr.msk.bf16.gmra.mrb[196].mxu0 %vm517_vm1, %v11344_v48 }
 0x30f   :  { %9311 = vmatprep.mubr.msk.bf16.mxu1 %vm517_vm1, %v11304_v43  ;;  %9701 = vmatprep.mubr.msk.bf16.mxu0 %vm517_vm1, %v11349_v49  ;;  %v12652_v43 = vshrl.u32 %v6229_v38, 7 }
 0x311   :  { %vm6231_vm2 = vcmp.lt.s32.totalorder %v12652_v43, 1  ;;  %vm6616_vm3 = vcmp.lt.s32.totalorder %v12652_v43, 7 }
 0x316   :  { %9312 = vmatmul.mubr.msk.bf16.gmra.mrb[200].mxu1 %vm517_vm1, %v11326_v46  ;;  %9702 = vmatmul.mubr.msk.bf16.gmra.mrb[200].mxu0 %vm517_vm1, %v11362_v50  ;;  %v14857_v46 = vld [vmem:[#allocation13_spill] sm:$0xff] }
 0x317   :  { %9315 = vmatprep.mubr.msk.bf16.mxu1 %vm517_vm1, %v11331_v47  ;;  %9705 = vmatprep.mubr.msk.bf16.mxu0 %vm517_vm1, %v11367_v51 }
 0x31e   :  { %9316 = vmatmul.mubr.msk.bf16.gmra.mrb[204].mxu1 %vm517_vm1, %v11344_v48  ;;  %9706 = vmatmul.mubr.msk.bf16.gmra.mrb[204].mxu0 %vm517_vm1, %v11380_v52 }
 0x31f   :  { %9319 = vmatprep.mubr.msk.bf16.mxu1 %vm517_vm1, %v11349_v49  ;;  %9709 = vmatprep.mubr.msk.bf16.mxu0 %vm517_vm1, %v11385_v53  ;;  %v14858_v49 = vld [vmem:[#allocation14_spill] sm:$0xff] }
 0x326   :  { %9320 = vmatmul.mubr.msk.bf16.gmra.mrb[208].mxu1 %vm517_vm1, %v11362_v50  ;;  %9710 = vmatmul.mubr.msk.bf16.gmra.mrb[208].mxu0 %vm517_vm1, %v11398_v54 }
 0x327   :  { %9323 = vmatprep.mubr.msk.bf16.mxu1 %vm517_vm1, %v11367_v51  ;;  %9713 = vmatprep.mubr.msk.bf16.mxu0 %vm517_vm1, %v11403_v55 }
 0x32e   :  { %9324 = vmatmul.mubr.msk.bf16.gmra.mrb[212].mxu1 %vm517_vm1, %v11380_v52  ;;  %9714 = vmatmul.mubr.msk.bf16.gmra.mrb[212].mxu0 %vm517_vm1, %v11416_v56  ;;  %v14859_v52 = vld [vmem:[#allocation15_spill] sm:$0xff] }
 0x32f   :  { %9327 = vmatprep.mubr.msk.bf16.mxu1 %vm517_vm1, %v11385_v53  ;;  %9717 = vmatprep.mubr.msk.bf16.mxu0 %vm517_vm1, %v11421_v57 }
 0x336   :  { %9328 = vmatmul.mubr.msk.bf16.gmra.mrb[216].mxu1 %vm517_vm1, %v11398_v54  ;;  %9718 = vmatmul.mubr.msk.bf16.gmra.mrb[216].mxu0 %vm517_vm1, %v11434_v58 }
 0x337   :  { %9331 = vmatprep.mubr.msk.bf16.mxu1 %vm517_vm1, %v11403_v55  ;;  %9721 = vmatprep.mubr.msk.bf16.mxu0 %vm517_vm1, %v11439_v59  ;;  %v14860_v55 = vld [vmem:[#allocation16_spill] sm:$0xff] }
 0x33e   :  { %9332 = vmatmul.mubr.msk.bf16.gmra.mrb[220].mxu1 %vm517_vm1, %v11416_v56  ;;  %9722 = vmatmul.mubr.msk.bf16.gmra.mrb[220].mxu0 %vm517_vm1, %v11452_v60 }
 0x33f   :  { %9335 = vmatprep.mubr.msk.bf16.mxu1 %vm517_vm1, %v11421_v57  ;;  %9725 = vmatprep.mubr.msk.bf16.mxu0 %vm517_vm1, %v11457_v61 }
 0x346   :  { %9336 = vmatmul.mubr.msk.bf16.gmra.mrb[224].mxu1 %vm517_vm1, %v11434_v58  ;;  %9726 = vmatmul.mubr.msk.bf16.gmra.mrb[224].mxu0 %vm517_vm1, %v11470_v62 }
 0x347   :  { %9339 = vmatprep.mubr.msk.bf16.mxu1 %vm517_vm1, %v11439_v59  ;;  %9729 = vmatprep.mubr.msk.bf16.mxu0 %vm517_vm1, %v11475_v63 }
 0x34e   :  { %9340 = vmatmul.mubr.msk.bf16.gmra.mrb[228].mxu1 %vm517_vm1, %v11452_v60  ;;  %9730 = vmatmul.mubr.msk.bf16.gmra.mrb[228].mxu0 %vm517_vm1, %v11488_v0 }
 0x34f   :  { %9343 = vmatprep.mubr.msk.bf16.mxu1 %vm517_vm1, %v11457_v61  ;;  %9733 = vmatprep.mubr.msk.bf16.mxu0 %vm517_vm1, %v11493_v1 }
 0x356   :  { %9344 = vmatmul.mubr.msk.bf16.gmra.mrb[232].mxu1 %vm517_vm1, %v11470_v62  ;;  %9734 = vmatmul.mubr.msk.bf16.gmra.mrb[232].mxu0 %vm517_vm1, %v11510_v8 }
 0x357   :  { %9347 = vmatprep.mubr.msk.bf16.mxu1 %vm517_vm1, %v11475_v63  ;;  %9737 = vmatprep.mubr.msk.bf16.mxu0 %vm517_vm1, %v11517_v19 }
 0x359   :  { %v9631_v42 = vpop.f32.mrb[0].mxu0 }
 0x35a   :  { %v10019_v47 = vadd.f32 %v9631_v42, %v14857_v46  ;;  %v4106_v48 = vpop.f32.mrb[1].mxu0  ;;  %v14863_v42 = vld [vmem:[#allocation19_spill] sm:$0xff] }
 0x35b   :  { %v12656_v50 = vadd.f32 %v4106_v48, %v14858_v49  ;;  %v9632_v51 = vpop.f32.mrb[2].mxu0  ;;  %v14864_v49 = vld [vmem:[#allocation20_spill] sm:$0xff] }
 0x35c   :  { %v10021_v53 = vadd.f32 %v9632_v51, %v14859_v52  ;;  %v4109_v54 = vpop.f32.mrb[3].mxu0  ;;  %v6103_v57 = vrot.slane %v10019_v47, 7 }
 0x35d   :  { %v10022_v56 = vadd.f32 %v4109_v54, %v14860_v55  ;;  %v14682_v59 = vrot.slane %v12656_v50, 7 }
 0x35e   :  { %9348 = vmatmul.mubr.msk.bf16.gmra.mrb[236].mxu1 %vm517_vm1, %v11488_v0  ;;  %v6104_v58 = vrot.slane %v10021_v53, 7  ;;  %9738 = vmatmul.mubr.msk.bf16.gmra.mrb[236].mxu0 %vm517_vm1, %v11536_v44 }
 0x35f   :  { %9351 = vmatprep.mubr.msk.bf16.mxu1 %vm517_vm1, %v11493_v1  ;;  %v6102_v60 = vrot.slane %v10022_v56, 7  ;;  %9741 = vmatprep.mubr.msk.bf16.mxu0 %vm517_vm1, %v11543_v32  ;;  %v14861_v1 = vld [vmem:[#allocation17_spill] sm:$0xff] }
 0x360   :  { %v12672_v61 = vsel %vm6231_vm2, %v6103_v57, %v6104_v58 }
 0x361   :  { %v9635_v62 = vpop.f32.mrb[4].mxu0  ;;  %v12676_v63 = vsel %vm6231_vm2, %v6102_v60, %v6103_v57  ;;  %v12682_v0 = vsel %vm6231_vm2, %v14682_v59, %v6102_v60 }
 0x362   :  { %v10023_v44 = vadd.f32 %v9635_v62, %v14861_v1  ;;  %v4122_v4 = vpop.f32.mrb[5].mxu0  ;;  %v14866_v62 = vld [vmem:[#allocation22_spill] sm:$0xff] }
 0x363   :  { %v10024_v32 = vadd.f32 %v4122_v4, %v14862_v24  ;;  %v9636_v38 = vpop.f32.mrb[6].mxu0 }
 0x364   :  { %v10025_v46 = vadd.f32 %v9636_v38, %v14863_v42  ;;  %v4125_v47 = vpop.f32.mrb[7].mxu0  ;;  %v6107_v52 = vrot.slane %v10023_v44, 7  ;;  %v14867_v44 = vld [vmem:[#allocation23_spill] sm:$0xff]  ;;  %v14868_v38 = vld [vmem:[#allocation24_spill] sm:$0xff] }
 0x365   :  { %v6105_v48 = vrot.slane %v10024_v32, 7  ;;  %v10026_v51 = vadd.f32 %v4125_v47, %v14864_v49  ;;  %v10905_v49 = vld [vmem:[%s14655_s0 + $0x200] sm:$0xff]  }
 0x366   :  { %9352 = vmatmul.mubr.msk.bf16.gmra.mrb[240].mxu1 %vm517_vm1, %v11510_v8  ;;  %v6108_v53 = vrot.slane %v10025_v46, 7  ;;  %9742 = vmatmul.mubr.msk.bf16.gmra.mrb[240].mxu0 %vm517_vm1, %v11562_v31  ;;  %v10904_v46 = vld [vmem:[%s14655_s0 + $0x1f8] sm:$0xff]  }
 0x367   :  { %9355 = vmatprep.mubr.msk.bf16.mxu1 %vm517_vm1, %v11517_v19  ;;  %v6106_v54 = vrot.slane %v10026_v51, 7  ;;  %9745 = vmatprep.mubr.msk.bf16.mxu0 %vm517_vm1, %v11569_v34  ;;  %v12698_v55 = vsel %vm6231_vm2, %v6104_v58, %v6105_v48  ;;  %v14865_v19 = vld [vmem:[#allocation21_spill] sm:$0xff] }
 0x368   :  { %v12702_v56 = vsel %vm6231_vm2, %v6107_v52, %v6108_v53 }
 0x369   :  { %v9639_v8 = vpop.f32.mrb[8].mxu0  ;;  %v12706_v57 = vsel %vm6231_vm2, %v6106_v54, %v6107_v52  ;;  %v12710_v31 = vsel %vm6231_vm2, %v6105_v48, %v6106_v54 }
 0x36a   :  { %v10027_v60 = vadd.f32 %v9639_v8, %v14865_v19  ;;  %v4138_v34 = vpop.f32.mrb[9].mxu0 }
 0x36b   :  { %v10028_v1 = vadd.f32 %v4138_v34, %v14866_v62  ;;  %v9640_v58 = vpop.f32.mrb[10].mxu0  ;;  %v14870_v62 = vld [vmem:[#allocation26_spill] sm:$0xff] }
 0x36c   :  { %v10029_v4 = vadd.f32 %v9640_v58, %v14867_v44  ;;  %v4141_v24 = vpop.f32.mrb[11].mxu0  ;;  %v6111_v47 = vrot.slane %v10027_v60, 7  ;;  %v14869_v60 = vld [vmem:[#allocation25_spill] sm:$0xff]  ;;  %v14871_v44 = vld [vmem:[#allocation27_spill] sm:$0xff] }
 0x36d   :  { %v6109_v32 = vrot.slane %v10028_v1, 7  ;;  %v10030_v42 = vadd.f32 %v4141_v24, %v14868_v38  ;;  %v10869_v58 = vld [vmem:[%s14655_s0 + $0x230] sm:$0xff]  }
 0x36e   :  { %9356 = vmatmul.mubr.msk.bf16.gmra.mrb[244].mxu1 %vm517_vm1, %v10904_v46  ;;  %v6112_v48 = vrot.slane %v10029_v4, 7  ;;  %9746 = vmatmul.mubr.msk.bf16.gmra.mrb[244].mxu0 %vm517_vm1, %v11588_v33 }
 0x36f   :  { %9359 = vmatprep.mubr.msk.bf16.mxu1 %vm517_vm1, %v10905_v49  ;;  %v6110_v51 = vrot.slane %v10030_v42, 7  ;;  %9749 = vmatprep.mubr.msk.bf16.mxu0 %vm517_vm1, %v11595_v36  ;;  %v12730_v52 = vsel %vm6231_vm2, %v6108_v53, %v6109_v32  ;;  %v14872_v42 = vld [vmem:[#allocation28_spill] sm:$0xff] }
 0x370   :  { %v12734_v54 = vsel %vm6231_vm2, %v6111_v47, %v6112_v48 }
 0x371   :  { %v9643_v8 = vpop.f32.mrb[12].mxu0  ;;  %v12738_v33 = vsel %vm6231_vm2, %v6110_v51, %v6111_v47  ;;  %v12742_v19 = vsel %vm6231_vm2, %v6109_v32, %v6110_v51  ;;  %v10906_v32 = vld [vmem:[%s14655_s0 + $0x208] sm:$0xff]  }
 0x372   :  { %v10031_v34 = vadd.f32 %v9643_v8, %v14869_v60  ;;  %v4154_v36 = vpop.f32.mrb[13].mxu0  ;;  %v10907_v51 = vld [vmem:[%s14655_s0 + $0x228] sm:$0xff]   ;;  %v10908_v8 = vld [vmem:[%s14655_s0 + $0x210] sm:$0xff]  }
 0x373   :  { %v10032_v1 = vadd.f32 %v4154_v36, %v14870_v62  ;;  %v9644_v53 = vpop.f32.mrb[14].mxu0 }
 0x374   :  { %v10033_v4 = vadd.f32 %v9644_v53, %v14871_v44  ;;  %v4157_v24 = vpop.f32.mrb[15].mxu0  ;;  %v6115_v47 = vrot.slane %v10031_v34, 7  ;;  %v14875_v44 = vld [vmem:[#allocation29_spill] sm:$0xff] }
 0x375   :  { %v6113_v38 = vrot.slane %v10032_v1, 7  ;;  %v10034_v46 = vadd.f32 %v4157_v24, %v14872_v42  ;;  %v14876_v24 = vld [vmem:[#allocation30_spill] sm:$0xff] }
 0x376   :  { %9360 = vmatmul.mubr.msk.bf16.gmra.mrb[248].mxu1 %vm517_vm1, %v10906_v32  ;;  %v6116_v49 = vrot.slane %v10033_v4, 7  ;;  %9750 = vmatmul.mubr.msk.bf16.gmra.mrb[248].mxu0 %vm517_vm1, %v10907_v51  ;;  %v14877_v32 = vld [vmem:[#allocation31_spill] sm:$0xff] }
 0x377   :  { %9363 = vmatprep.mubr.msk.bf16.mxu1 %vm517_vm1, %v10908_v8  ;;  %v6114_v60 = vrot.slane %v10034_v46, 7  ;;  %9753 = vmatprep.mubr.msk.bf16.mxu0 %vm517_vm1, %v10869_v58  ;;  %v12766_v36 = vsel %vm6231_vm2, %v6112_v48, %v6113_v38  ;;  %v10870_v48 = vld [vmem:[%s14655_s0 + $0x238] sm:$0xff]  }
 0x378   :  { %v12770_v34 = vsel %vm6231_vm2, %v6115_v47, %v6116_v49 }
 0x379   :  { %14873 = vst [vmem:[#allocation13_spill] sm:$0xff] %v12770_v34  ;;  %v9647_v62 = vpop.f32.mrb[16].mxu0  ;;  %v12774_v1 = vsel %vm6231_vm2, %v6114_v60, %v6115_v47  ;;  %v12778_v53 = vsel %vm6231_vm2, %v6113_v38, %v6114_v60  ;;  %v14878_v47 = vld [vmem:[#allocation32_spill] sm:$0xff]  ;;  %v10909_v38 = vld [vmem:[%s14655_s0 + $0x218] sm:$0xff]  }
 0x37a   :  { %14874 = vst [vmem:[#allocation14_spill] sm:$0xff] %v12778_v53  ;;  %v10035_v4 = vadd.f32 %v9647_v62, %v14875_v44  ;;  %v4170_v58 = vpop.f32.mrb[17].mxu0 }
 0x37b   :  { %v10036_v42 = vadd.f32 %v4170_v58, %v14876_v24  ;;  %v9648_v46 = vpop.f32.mrb[18].mxu0 }
 0x37c   :  { %v10037_v51 = vadd.f32 %v9648_v46, %v14877_v32  ;;  %v4173_v8 = vpop.f32.mrb[19].mxu0  ;;  %v6119_v60 = vrot.slane %v10035_v4, 7  ;;  %v14883_v32 = vld [vmem:[#allocation34_spill] sm:$0xff] }
 0x37d   :  { %v6117_v59 = vrot.slane %v10036_v42, 7  ;;  %v10038_v34 = vadd.f32 %v4173_v8, %v14878_v47  ;;  %v14884_v8 = vld [vmem:[#allocation36_spill] sm:$0xff] }
 0x37e   :  { %9364 = vmatmul.mubr.msk.bf16.gmra.mrb[252].mxu1 %vm517_vm1, %v10909_v38  ;;  %v6120_v62 = vrot.slane %v10037_v51, 7  ;;  %9754 = vmatmul.mubr.msk.bf16.gmra.mrb[252].mxu0 %vm517_vm1, %v10870_v48 }
 0x37f   :  { %9759 = vmatprep.mubr.msk.bf16.mxu1 %vm517_vm1, %v12275_v26  ;;  %v6118_v44 = vrot.slane %v10038_v34, 7  ;;  %9889 = vmatprep.mubr.msk.bf16.mxu0 %vm517_vm1, %v12275_v26  ;;  %v12798_v58 = vsel %vm6231_vm2, %v6116_v49, %v6117_v59  ;;  %v14882_v34 = vld [vmem:[#allocation33_spill] sm:$0xff] }
 0x380   :  { %14879 = vst [vmem:[#allocation15_spill] sm:$0xff] %v12798_v58  ;;  %v12802_v24 = vsel %vm6231_vm2, %v6119_v60, %v6120_v62 }
 0x381   :  { %14880 = vst [vmem:[#allocation16_spill] sm:$0xff] %v12802_v24  ;;  %v9651_v42 = vpop.f32.mrb[20].mxu0  ;;  %v12806_v4 = vsel %vm6231_vm2, %v6118_v44, %v6119_v60  ;;  %v12810_v48 = vsel %vm6231_vm2, %v6117_v59, %v6118_v44  ;;  %v14885_v24 = vld [vmem:[#allocation37_spill] sm:$0xff] }
 0x382   :  { %14881 = vst [vmem:[#allocation17_spill] sm:$0xff] %v12806_v4  ;;  %v10039_v46 = vadd.f32 %v9651_v42, %v14882_v34  ;;  %v4186_v26 = vpop.f32.mrb[21].mxu0 }
 0x383   :  { %v10040_v51 = vadd.f32 %v4186_v26, %v14883_v32  ;;  %v9652_v49 = vpop.f32.mrb[22].mxu0  ;;  %v14889_v26 = vld [vmem:[#allocation39_spill] sm:$0xff] }
 0x384   :  { %v10041_v47 = vadd.f32 %v9652_v49, %v14884_v8  ;;  %v4189_v38 = vpop.f32.mrb[23].mxu0  ;;  %v6123_v60 = vrot.slane %v10039_v46, 7 }
 0x385   :  { %v6121_v58 = vrot.slane %v10040_v51, 7  ;;  %v10042_v53 = vadd.f32 %v4189_v38, %v14885_v24  ;;  %v14890_v51 = vld [vmem:[#allocation40_spill] sm:$0xff]  ;;  %v14891_v38 = vld [vmem:[#allocation41_spill] sm:$0xff] }
 0x386   :  { %9760 = vmatmul.mubr.msk.bf16.vlgmr.msra.gmra.mrb[128].mxu1 %vm517_vm1, %v12290_v41  ;;  %v6124_v4 = vrot.slane %v10041_v47, 7  ;;  %9890 = vmatmul.mubr.msk.bf16.vlgmr.msra.gmra.mrb[64].mxu0 %vm517_vm1, %v12290_v41 }
 0x387   :  { %9763 = vmatprep.mubr.msk.bf16.mxu1 %vm517_vm1, %v12301_v3  ;;  %v6122_v59 = vrot.slane %v10042_v53, 7  ;;  %9893 = vmatprep.mubr.msk.bf16.mxu0 %vm517_vm1, %v12301_v3  ;;  %v12826_v44 = vsel %vm6231_vm2, %v6120_v62, %v6121_v58  ;;  %v14888_v53 = vld [vmem:[#allocation38_spill] sm:$0xff] }
 0x388   :  { %14886 = vst [vmem:[#allocation18_spill] sm:$0xff] %v12826_v44  ;;  %v12830_v24 = vsel %vm6231_vm2, %v6123_v60, %v6124_v4 }
 0x389   :  { %14887 = vst [vmem:[#allocation19_spill] sm:$0xff] %v12830_v24  ;;  %v9655_v42 = vpop.f32.mrb[24].mxu0  ;;  %v12834_v34 = vsel %vm6231_vm2, %v6122_v59, %v6123_v60  ;;  %v12838_v41 = vsel %vm6231_vm2, %v6121_v58, %v6122_v59 }
 0x38a   :  { %v10043_v46 = vadd.f32 %v9655_v42, %v14888_v53  ;;  %v4202_v3 = vpop.f32.mrb[25].mxu0 }
 0x38b   :  { %v10044_v32 = vadd.f32 %v4202_v3, %v14889_v26  ;;  %v9656_v62 = vpop.f32.mrb[26].mxu0  ;;  %v14895_v26 = vld [vmem:[#allocation43_spill] sm:$0xff] }
 0x38c   :  { %v10045_v49 = vadd.f32 %v9656_v62, %v14890_v51  ;;  %v4205_v8 = vpop.f32.mrb[27].mxu0  ;;  %v6127_v60 = vrot.slane %v10043_v46, 7  ;;  %v14896_v62 = vld [vmem:[#allocation44_spill] sm:$0xff] }
 0x38d   :  { %v6125_v47 = vrot.slane %v10044_v32, 7  ;;  %v10046_v24 = vadd.f32 %v4205_v8, %v14891_v38  ;;  %v14897_v38 = vld [vmem:[#allocation45_spill] sm:$0xff] }
 0x38e   :  { %9764 = vmatmul.mubr.msk.bf16.gmra.mrb[132].mxu1 %vm517_vm1, %v12312_v28  ;;  %v6128_v44 = vrot.slane %v10045_v49, 7  ;;  %9894 = vmatmul.mubr.msk.bf16.gmra.mrb[68].mxu0 %vm517_vm1, %v12312_v28 }
 0x38f   :  { %9767 = vmatprep.mubr.msk.bf16.mxu1 %vm517_vm1, %v12321_v35  ;;  %v6126_v58 = vrot.slane %v10046_v24, 7  ;;  %9897 = vmatprep.mubr.msk.bf16.mxu0 %vm517_vm1, %v12321_v35  ;;  %v12854_v59 = vsel %vm6231_vm2, %v6124_v4, %v6125_v47  ;;  %v14894_v24 = vld [vmem:[#allocation42_spill] sm:$0xff] }
 0x390   :  { %14892 = vst [vmem:[#allocation20_spill] sm:$0xff] %v12854_v59  ;;  %v12858_v42 = vsel %vm6231_vm2, %v6127_v60, %v6128_v44 }
 0x391   :  { %14893 = vst [vmem:[#allocation21_spill] sm:$0xff] %v12858_v42  ;;  %v9659_v53 = vpop.f32.mrb[28].mxu0  ;;  %v12862_v46 = vsel %vm6231_vm2, %v6126_v58, %v6127_v60  ;;  %v12866_v28 = vsel %vm6231_vm2, %v6125_v47, %v6126_v58 }
 0x392   :  { %v10047_v3 = vadd.f32 %v9659_v53, %v14894_v24  ;;  %v4218_v35 = vpop.f32.mrb[29].mxu0 }
 0x393   :  { %v10048_v32 = vadd.f32 %v4218_v35, %v14895_v26  ;;  %v9660_v4 = vpop.f32.mrb[30].mxu0  ;;  %v14901_v26 = vld [vmem:[#allocation47_spill] sm:$0xff] }
 0x394   :  { %v10049_v51 = vadd.f32 %v9660_v4, %v14896_v62  ;;  %v4221_v49 = vpop.f32.mrb[31].mxu0  ;;  %v6131_v60 = vrot.slane %v10047_v3, 7  ;;  %v14902_v4 = vld [vmem:[#allocation48_spill] sm:$0xff] }
 0x395   :  { %v6129_v8 = vrot.slane %v10048_v32, 7  ;;  %v10050_v42 = vadd.f32 %v4221_v49, %v14897_v38  ;;  %v14903_v38 = vld [vmem:[#allocation49_spill] sm:$0xff] }
 0x396   :  { %9768 = vmatmul.mubr.msk.bf16.gmra.mrb[136].mxu1 %vm517_vm1, %v12330_v27  ;;  %v6132_v59 = vrot.slane %v10049_v51, 7  ;;  %9898 = vmatmul.mubr.msk.bf16.gmra.mrb[72].mxu0 %vm517_vm1, %v12330_v27 }
 0x397   :  { %9771 = vmatprep.mubr.msk.bf16.mxu1 %vm517_vm1, %v12339_v45  ;;  %v6130_v47 = vrot.slane %v10050_v42, 7  ;;  %9901 = vmatprep.mubr.msk.bf16.mxu0 %vm517_vm1, %v12339_v45  ;;  %v12882_v58 = vsel %vm6231_vm2, %v6128_v44, %v6129_v8  ;;  %v14900_v42 = vld [vmem:[#allocation46_spill] sm:$0xff] }
 0x398   :  { %14898 = vst [vmem:[#allocation22_spill] sm:$0xff] %v12882_v58  ;;  %v12886_v53 = vsel %vm6231_vm2, %v6131_v60, %v6132_v59 }
 0x399   :  { %14899 = vst [vmem:[#allocation23_spill] sm:$0xff] %v12886_v53  ;;  %v9663_v24 = vpop.f32.mrb[32].mxu0  ;;  %v12890_v3 = vsel %vm6231_vm2, %v6130_v47, %v6131_v60  ;;  %v12894_v27 = vsel %vm6231_vm2, %v6129_v8, %v6130_v47 }
 0x39a   :  { %v10051_v35 = vadd.f32 %v9663_v24, %v14900_v42  ;;  %v4234_v45 = vpop.f32.mrb[33].mxu0 }
 0x39b   :  { %v10052_v32 = vadd.f32 %v4234_v45, %v14901_v26  ;;  %v9664_v44 = vpop.f32.mrb[34].mxu0  ;;  %v14907_v26 = vld [vmem:[#allocation51_spill] sm:$0xff] }
 0x39c   :  { %v10053_v62 = vadd.f32 %v9664_v44, %v14902_v4  ;;  %v4237_v51 = vpop.f32.mrb[35].mxu0  ;;  %v6135_v60 = vrot.slane %v10051_v35, 7  ;;  %v14908_v44 = vld [vmem:[#allocation52_spill] sm:$0xff] }
 0x39d   :  { %v6133_v49 = vrot.slane %v10052_v32, 7  ;;  %v10054_v53 = vadd.f32 %v4237_v51, %v14903_v38  ;;  %v14909_v38 = vld [vmem:[#allocation53_spill] sm:$0xff] }
 0x39e   :  { %9772 = vmatmul.mubr.msk.bf16.gmra.mrb[140].mxu1 %vm517_vm1, %v12348_v9  ;;  %v6136_v58 = vrot.slane %v10053_v62, 7  ;;  %9902 = vmatmul.mubr.msk.bf16.gmra.mrb[76].mxu0 %vm517_vm1, %v12348_v9 }
 0x39f   :  { %9775 = vmatprep.mubr.msk.bf16.mxu1 %vm517_vm1, %v12357_v23  ;;  %v6134_v8 = vrot.slane %v10054_v53, 7  ;;  %9905 = vmatprep.mubr.msk.bf16.mxu0 %vm517_vm1, %v12357_v23  ;;  %v12910_v47 = vsel %vm6231_vm2, %v6132_v59, %v6133_v49  ;;  %v14906_v53 = vld [vmem:[#allocation50_spill] sm:$0xff] }
 0x3a0   :  { %14904 = vst [vmem:[#allocation24_spill] sm:$0xff] %v12910_v47  ;;  %v12914_v24 = vsel %vm6231_vm2, %v6135_v60, %v6136_v58 }
 0x3a1   :  { %14905 = vst [vmem:[#allocation25_spill] sm:$0xff] %v12914_v24  ;;  %v9667_v42 = vpop.f32.mrb[36].mxu0  ;;  %v12918_v35 = vsel %vm6231_vm2, %v6134_v8, %v6135_v60  ;;  %v12922_v9 = vsel %vm6231_vm2, %v6133_v49, %v6134_v8 }
 0x3a2   :  { %v10055_v45 = vadd.f32 %v9667_v42, %v14906_v53  ;;  %v4250_v23 = vpop.f32.mrb[37].mxu0 }
 0x3a3   :  { %v10056_v32 = vadd.f32 %v4250_v23, %v14907_v26  ;;  %v9668_v59 = vpop.f32.mrb[38].mxu0  ;;  %v14913_v26 = vld [vmem:[#allocation55_spill] sm:$0xff] }
 0x3a4   :  { %v10057_v4 = vadd.f32 %v9668_v59, %v14908_v44  ;;  %v4253_v62 = vpop.f32.mrb[39].mxu0  ;;  %v6139_v60 = vrot.slane %v10055_v45, 7  ;;  %v14914_v59 = vld [vmem:[#allocation56_spill] sm:$0xff] }
 0x3a5   :  { %v6137_v51 = vrot.slane %v10056_v32, 7  ;;  %v10058_v24 = vadd.f32 %v4253_v62, %v14909_v38  ;;  %v14915_v38 = vld [vmem:[#allocation57_spill] sm:$0xff] }
 0x3a6   :  { %9776 = vmatmul.mubr.msk.bf16.gmra.mrb[144].mxu1 %vm517_vm1, %v12366_v22  ;;  %v6140_v47 = vrot.slane %v10057_v4, 7  ;;  %9906 = vmatmul.mubr.msk.bf16.gmra.mrb[80].mxu0 %vm517_vm1, %v12366_v22 }
 0x3a7   :  { %9779 = vmatprep.mubr.msk.bf16.mxu1 %vm517_vm1, %v12375_v21  ;;  %v6138_v49 = vrot.slane %v10058_v24, 7  ;;  %9909 = vmatprep.mubr.msk.bf16.mxu0 %vm517_vm1, %v12375_v21  ;;  %v12938_v8 = vsel %vm6231_vm2, %v6136_v58, %v6137_v51  ;;  %v14912_v24 = vld [vmem:[#allocation54_spill] sm:$0xff] }
 0x3a8   :  { %14910 = vst [vmem:[#allocation26_spill] sm:$0xff] %v12938_v8  ;;  %v12942_v42 = vsel %vm6231_vm2, %v6139_v60, %v6140_v47 }
 0x3a9   :  { %14911 = vst [vmem:[#allocation27_spill] sm:$0xff] %v12942_v42  ;;  %v9671_v53 = vpop.f32.mrb[40].mxu0  ;;  %v12946_v45 = vsel %vm6231_vm2, %v6138_v49, %v6139_v60  ;;  %v12950_v22 = vsel %vm6231_vm2, %v6137_v51, %v6138_v49 }
 0x3aa   :  { %v10059_v23 = vadd.f32 %v9671_v53, %v14912_v24  ;;  %v4266_v21 = vpop.f32.mrb[41].mxu0 }
 0x3ab   :  { %v10060_v32 = vadd.f32 %v4266_v21, %v14913_v26  ;;  %v9672_v58 = vpop.f32.mrb[42].mxu0  ;;  %v14919_v26 = vld [vmem:[#allocation59_spill] sm:$0xff] }
 0x3ac   :  { %v10061_v44 = vadd.f32 %v9672_v58, %v14914_v59  ;;  %v4269_v4 = vpop.f32.mrb[43].mxu0  ;;  %v6143_v60 = vrot.slane %v10059_v23, 7  ;;  %v14920_v58 = vld [vmem:[#allocation60_spill] sm:$0xff] }
 0x3ad   :  { %v6141_v62 = vrot.slane %v10060_v32, 7  ;;  %v10062_v42 = vadd.f32 %v4269_v4, %v14915_v38  ;;  %v14921_v38 = vld [vmem:[#allocation61_spill] sm:$0xff] }
 0x3ae   :  { %9780 = vmatmul.mubr.msk.bf16.gmra.mrb[148].mxu1 %vm517_vm1, %v12384_v20  ;;  %v6144_v8 = vrot.slane %v10061_v44, 7  ;;  %9910 = vmatmul.mubr.msk.bf16.gmra.mrb[84].mxu0 %vm517_vm1, %v12384_v20 }
 0x3af   :  { %9783 = vmatprep.mubr.msk.bf16.mxu1 %vm517_vm1, %v12393_v16  ;;  %v6142_v51 = vrot.slane %v10062_v42, 7  ;;  %9913 = vmatprep.mubr.msk.bf16.mxu0 %vm517_vm1, %v12393_v16  ;;  %v12966_v49 = vsel %vm6231_vm2, %v6140_v47, %v6141_v62  ;;  %v14918_v42 = vld [vmem:[#allocation58_spill] sm:$0xff] }
 0x3b0   :  { %14916 = vst [vmem:[#allocation28_spill] sm:$0xff] %v12966_v49  ;;  %v12970_v53 = vsel %vm6231_vm2, %v6143_v60, %v6144_v8 }
 0x3b1   :  { %14917 = vst [vmem:[#allocation29_spill] sm:$0xff] %v12970_v53  ;;  %v9675_v24 = vpop.f32.mrb[44].mxu0  ;;  %v12974_v23 = vsel %vm6231_vm2, %v6142_v51, %v6143_v60  ;;  %v12978_v20 = vsel %vm6231_vm2, %v6141_v62, %v6142_v51 }
 0x3b2   :  { %v10063_v21 = vadd.f32 %v9675_v24, %v14918_v42  ;;  %v4282_v16 = vpop.f32.mrb[45].mxu0 }
 0x3b3   :  { %v10064_v32 = vadd.f32 %v4282_v16, %v14919_v26  ;;  %v9676_v47 = vpop.f32.mrb[46].mxu0  ;;  %v14925_v26 = vld [vmem:[#allocation63_spill] sm:$0xff] }
 0x3b4   :  { %v10065_v59 = vadd.f32 %v9676_v47, %v14920_v58  ;;  %v4285_v44 = vpop.f32.mrb[47].mxu0  ;;  %v6147_v60 = vrot.slane %v10063_v21, 7  ;;  %v14926_v47 = vld [vmem:[#allocation64_spill] sm:$0xff] }
 0x3b5   :  { %v6145_v4 = vrot.slane %v10064_v32, 7  ;;  %v10066_v53 = vadd.f32 %v4285_v44, %v14921_v38  ;;  %v14927_v38 = vld [vmem:[#allocation65_spill] sm:$0xff] }
 0x3b6   :  { %9784 = vmatmul.mubr.msk.bf16.gmra.mrb[152].mxu1 %vm517_vm1, %v12402_v15  ;;  %v6148_v49 = vrot.slane %v10065_v59, 7  ;;  %9914 = vmatmul.mubr.msk.bf16.gmra.mrb[88].mxu0 %vm517_vm1, %v12402_v15 }
 0x3b7   :  { %9787 = vmatprep.mubr.msk.bf16.mxu1 %vm517_vm1, %v12411_v14  ;;  %v6146_v62 = vrot.slane %v10066_v53, 7  ;;  %9917 = vmatprep.mubr.msk.bf16.mxu0 %vm517_vm1, %v12411_v14  ;;  %v12994_v51 = vsel %vm6231_vm2, %v6144_v8, %v6145_v4  ;;  %v14924_v53 = vld [vmem:[#allocation62_spill] sm:$0xff] }
 0x3b8   :  { %14922 = vst [vmem:[#allocation30_spill] sm:$0xff] %v12994_v51  ;;  %v12998_v24 = vsel %vm6231_vm2, %v6147_v60, %v6148_v49 }
 0x3b9   :  { %14923 = vst [vmem:[#allocation31_spill] sm:$0xff] %v12998_v24  ;;  %v9679_v42 = vpop.f32.mrb[48].mxu0  ;;  %v13002_v21 = vsel %vm6231_vm2, %v6146_v62, %v6147_v60  ;;  %v13006_v15 = vsel %vm6231_vm2, %v6145_v4, %v6146_v62 }
 0x3ba   :  { %v10067_v16 = vadd.f32 %v9679_v42, %v14924_v53  ;;  %v4298_v14 = vpop.f32.mrb[49].mxu0 }
 0x3bb   :  { %v10068_v32 = vadd.f32 %v4298_v14, %v14925_v26  ;;  %v9680_v8 = vpop.f32.mrb[50].mxu0  ;;  %v14931_v26 = vld [vmem:[#allocation67_spill] sm:$0xff] }
 0x3bc   :  { %v10069_v58 = vadd.f32 %v9680_v8, %v14926_v47  ;;  %v4301_v59 = vpop.f32.mrb[51].mxu0  ;;  %v6151_v60 = vrot.slane %v10067_v16, 7  ;;  %v14932_v8 = vld [vmem:[#allocation68_spill] sm:$0xff] }
 0x3bd   :  { %v6149_v44 = vrot.slane %v10068_v32, 7  ;;  %v10070_v24 = vadd.f32 %v4301_v59, %v14927_v38  ;;  %v14933_v38 = vld [vmem:[#allocation69_spill] sm:$0xff] }
 0x3be   :  { %9788 = vmatmul.mubr.msk.bf16.gmra.mrb[156].mxu1 %vm517_vm1, %v12420_v13  ;;  %v6152_v51 = vrot.slane %v10069_v58, 7  ;;  %9918 = vmatmul.mubr.msk.bf16.gmra.mrb[92].mxu0 %vm517_vm1, %v12420_v13 }
 0x3bf   :  { %9791 = vmatprep.mubr.msk.bf16.mxu1 %vm517_vm1, %v12429_v10  ;;  %v6150_v4 = vrot.slane %v10070_v24, 7  ;;  %9921 = vmatprep.mubr.msk.bf16.mxu0 %vm517_vm1, %v12429_v10  ;;  %v13022_v62 = vsel %vm6231_vm2, %v6148_v49, %v6149_v44  ;;  %v14930_v24 = vld [vmem:[#allocation66_spill] sm:$0xff] }
 0x3c0   :  { %14928 = vst [vmem:[#allocation32_spill] sm:$0xff] %v13022_v62  ;;  %v13026_v42 = vsel %vm6231_vm2, %v6151_v60, %v6152_v51 }
 0x3c1   :  { %14929 = vst [vmem:[#allocation33_spill] sm:$0xff] %v13026_v42  ;;  %v9683_v53 = vpop.f32.mrb[52].mxu0  ;;  %v13030_v16 = vsel %vm6231_vm2, %v6150_v4, %v6151_v60  ;;  %v13034_v13 = vsel %vm6231_vm2, %v6149_v44, %v6150_v4 }
 0x3c2   :  { %v10071_v14 = vadd.f32 %v9683_v53, %v14930_v24  ;;  %v4314_v10 = vpop.f32.mrb[53].mxu0 }
 0x3c3   :  { %v10072_v32 = vadd.f32 %v4314_v10, %v14931_v26  ;;  %v9684_v49 = vpop.f32.mrb[54].mxu0  ;;  %v14936_v26 = vld [vmem:[#allocation71_spill] sm:$0xff] }
 0x3c4   :  { %v10073_v47 = vadd.f32 %v9684_v49, %v14932_v8  ;;  %v4317_v58 = vpop.f32.mrb[55].mxu0  ;;  %v6155_v60 = vrot.slane %v10071_v14, 7  ;;  %v14937_v49 = vld [vmem:[#allocation72_spill] sm:$0xff] }
 0x3c5   :  { %v6153_v59 = vrot.slane %v10072_v32, 7  ;;  %v10074_v42 = vadd.f32 %v4317_v58, %v14933_v38 }
 0x3c6   :  { %9792 = vmatmul.mubr.msk.bf16.gmra.mrb[160].mxu1 %vm517_vm1, %v12438_v7  ;;  %v6156_v62 = vrot.slane %v10073_v47, 7  ;;  %9922 = vmatmul.mubr.msk.bf16.gmra.mrb[96].mxu0 %vm517_vm1, %v12438_v7 }
 0x3c7   :  { %9795 = vmatprep.mubr.msk.bf16.mxu1 %vm517_vm1, %v12447_v6  ;;  %v6154_v44 = vrot.slane %v10074_v42, 7  ;;  %9925 = vmatprep.mubr.msk.bf16.mxu0 %vm517_vm1, %v12447_v6  ;;  %v13050_v4 = vsel %vm6231_vm2, %v6152_v51, %v6153_v59  ;;  %v14935_v42 = vld [vmem:[#allocation70_spill] sm:$0xff] }
 0x3c8   :  { %v13054_v53 = vsel %vm6231_vm2, %v6155_v60, %v6156_v62 }
 0x3c9   :  { %14934 = vst [vmem:[#allocation34_spill] sm:$0xff] %v13054_v53  ;;  %v9687_v24 = vpop.f32.mrb[56].mxu0  ;;  %v13058_v14 = vsel %vm6231_vm2, %v6154_v44, %v6155_v60  ;;  %v13062_v7 = vsel %vm6231_vm2, %v6153_v59, %v6154_v44 }
 0x3ca   :  { %v10075_v10 = vadd.f32 %v9687_v24, %v14935_v42  ;;  %v4330_v6 = vpop.f32.mrb[57].mxu0 }
 0x3cb   :  { %v10076_v32 = vadd.f32 %v4330_v6, %v14936_v26  ;;  %v9688_v51 = vpop.f32.mrb[58].mxu0  ;;  %v14939_v6 = vld [vmem:[#allocation73_spill] sm:$0xff] }
 0x3cc   :  { %v10077_v8 = vadd.f32 %v9688_v51, %v14937_v49  ;;  %v4333_v47 = vpop.f32.mrb[59].mxu0  ;;  %v6159_v60 = vrot.slane %v10075_v10, 7 }
 0x3cd   :  { %v6157_v58 = vrot.slane %v10076_v32, 7  ;;  %v10078_v38 = vadd.f32 %v4333_v47, %v11804_v37  ;;  %v14940_v32 = vld [vmem:[#allocation74_spill] sm:$0xff]  ;;  %v14941_v47 = vld [vmem:[#allocation75_spill] sm:$0xff] }
 0x3ce   :  { %9796 = vmatmul.mubr.msk.bf16.gmra.mrb[164].mxu1 %vm517_vm1, %v12456_v5  ;;  %v6160_v53 = vrot.slane %v10077_v8, 7  ;;  %9926 = vmatmul.mubr.msk.bf16.gmra.mrb[100].mxu0 %vm517_vm1, %v12456_v5 }
 0x3cf   :  { %9799 = vmatprep.mubr.msk.bf16.mxu1 %vm517_vm1, %v12465_v2  ;;  %v6158_v59 = vrot.slane %v10078_v38, 7  ;;  %9929 = vmatprep.mubr.msk.bf16.mxu0 %vm517_vm1, %v12465_v2  ;;  %v13078_v44 = vsel %vm6231_vm2, %v6156_v62, %v6157_v58 }
 0x3d0   :  { %v13082_v37 = vsel %vm6231_vm2, %v6159_v60, %v6160_v53 }
 0x3d1   :  { %14938 = vst [vmem:[#allocation36_spill] sm:$0xff] %v13082_v37  ;;  %v9691_v24 = vpop.f32.mrb[60].mxu0  ;;  %v13086_v42 = vsel %vm6231_vm2, %v6158_v59, %v6159_v60  ;;  %v13090_v5 = vsel %vm6231_vm2, %v6157_v58, %v6158_v59 }
 0x3d2   :  { %v10079_v10 = vadd.f32 %v9691_v24, %v11814_v40  ;;  %v4346_v2 = vpop.f32.mrb[61].mxu0 }
 0x3d3   :  { %v10080_v26 = vadd.f32 %v4346_v2, %v14939_v6  ;;  %v9692_v62 = vpop.f32.mrb[62].mxu0  ;;  %v14944_v2 = vld [vmem:[#allocation3_spill] sm:$0xff] }
 0x3d4   :  { %v10081_v51 = vadd.f32 %v9692_v62, %v14940_v32  ;;  %v4349_v49 = vpop.f32.mrb[63].mxu0  ;;  %v6163_v60 = vrot.slane %v10079_v10, 7  ;;  %v14946_v32 = vld [vmem:[#allocation77_spill] sm:$0xff] }
 0x3d5   :  { %v6161_v8 = vrot.slane %v10080_v26, 7  ;;  %v10082_v38 = vadd.f32 %v4349_v49, %v14941_v47  ;;  %v14945_v26 = vld [vmem:[#allocation76_spill] sm:$0xff] }
 0x3d6   :  { %9800 = vmatmul.mubr.msk.bf16.gmra.mrb[168].mxu1 %vm517_vm1, %v12488_v11  ;;  %v6164_v37 = vrot.slane %v10081_v51, 7  ;;  %9930 = vmatmul.mubr.msk.bf16.gmra.mrb[104].mxu0 %vm517_vm1, %v12488_v11 }
 0x3d7   :  { %9803 = vmatprep.mubr.msk.bf16.mxu1 %vm517_vm1, %v12497_v12  ;;  %v6162_v40 = vrot.slane %v10082_v38, 7  ;;  %9933 = vmatprep.mubr.msk.bf16.mxu0 %vm517_vm1, %v12497_v12  ;;  %v13106_v58 = vsel %vm6231_vm2, %v6160_v53, %v6161_v8  ;;  %v14947_v38 = vld [vmem:[#allocation78_spill] sm:$0xff] }
 0x3d8   :  { %14942 = vst [vmem:[#allocation37_spill] sm:$0xff] %v13106_v58  ;;  %v13110_v59 = vsel %vm6231_vm2, %v6163_v60, %v6164_v37 }
 0x3d9   :  { %14943 = vst [vmem:[#allocation38_spill] sm:$0xff] %v13110_v59  ;;  %v9695_v24 = vpop.f32.mrb[192].mxu0  ;;  %v13114_v10 = vsel %vm6231_vm2, %v6162_v40, %v6163_v60  ;;  %v13118_v11 = vsel %vm6231_vm2, %v6161_v8, %v6162_v40 }
 0x3da   :  { %v10083_v6 = vadd.f32 %v9695_v24, %v14944_v2  ;;  %v4362_v12 = vpop.f32.mrb[193].mxu0 }
 0x3db   :  { %v10084_v62 = vadd.f32 %v4362_v12, %v14945_v26  ;;  %v9696_v53 = vpop.f32.mrb[194].mxu0  ;;  %v14951_v26 = vld [vmem:[#allocation5_spill] sm:$0xff] }
 0x3dc   :  { %v10085_v51 = vadd.f32 %v9696_v53, %v14946_v32  ;;  %v4365_v49 = vpop.f32.mrb[195].mxu0  ;;  %v6167_v60 = vrot.slane %v10083_v6, 7  ;;  %v14952_v53 = vld [vmem:[#allocation79_spill] sm:$0xff] }
 0x3dd   :  { %v6165_v47 = vrot.slane %v10084_v62, 7  ;;  %v10086_v59 = vadd.f32 %v4365_v49, %v14947_v38  ;;  %v14953_v38 = vld [vmem:[#allocation80_spill] sm:$0xff] }
 0x3de   :  { %9804 = vmatmul.mubr.msk.bf16.gmra.mrb[172].mxu1 %vm517_vm1, %v12506_v17  ;;  %v6168_v58 = vrot.slane %v10085_v51, 7  ;;  %9934 = vmatmul.mubr.msk.bf16.gmra.mrb[108].mxu0 %vm517_vm1, %v12506_v17 }
 0x3df   :  { %9807 = vmatprep.mubr.msk.bf16.mxu1 %vm517_vm1, %v12515_v18  ;;  %v6166_v8 = vrot.slane %v10086_v59, 7  ;;  %9937 = vmatprep.mubr.msk.bf16.mxu0 %vm517_vm1, %v12515_v18  ;;  %v13134_v40 = vsel %vm6231_vm2, %v6164_v37, %v6165_v47  ;;  %v14950_v59 = vld [vmem:[#allocation4_spill] sm:$0xff] }
 0x3e0   :  { %14948 = vst [vmem:[#allocation39_spill] sm:$0xff] %v13134_v40  ;;  %v13138_v24 = vsel %vm6231_vm2, %v6167_v60, %v6168_v58 }
 0x3e1   :  { %14949 = vst [vmem:[#allocation40_spill] sm:$0xff] %v13138_v24  ;;  %v9699_v2 = vpop.f32.mrb[196].mxu0  ;;  %v13142_v6 = vsel %vm6231_vm2, %v6166_v8, %v6167_v60  ;;  %v13146_v17 = vsel %vm6231_vm2, %v6165_v47, %v6166_v8 }
 0x3e2   :  { %v10087_v12 = vadd.f32 %v9699_v2, %v14950_v59  ;;  %v4378_v18 = vpop.f32.mrb[197].mxu0 }
 0x3e3   :  { %v10088_v62 = vadd.f32 %v4378_v18, %v14951_v26  ;;  %v9700_v37 = vpop.f32.mrb[198].mxu0  ;;  %v14958_v26 = vld [vmem:[#allocation7_spill] sm:$0xff] }
 0x3e4   :  { %v10089_v32 = vadd.f32 %v9700_v37, %v14952_v53  ;;  %v4381_v51 = vpop.f32.mrb[199].mxu0  ;;  %v6171_v60 = vrot.slane %v10087_v12, 7  ;;  %v14959_v37 = vld [vmem:[#allocation81_spill] sm:$0xff] }
 0x3e5   :  { %v6169_v49 = vrot.slane %v10088_v62, 7  ;;  %v10090_v24 = vadd.f32 %v4381_v51, %v14953_v38  ;;  %v14960_v38 = vld [vmem:[#allocation82_spill] sm:$0xff] }
 0x3e6   :  { %9808 = vmatmul.mubr.msk.bf16.gmra.mrb[176].mxu1 %vm517_vm1, %v12529_v25  ;;  %v6172_v40 = vrot.slane %v10089_v32, 7  ;;  %9938 = vmatmul.mubr.msk.bf16.gmra.mrb[112].mxu0 %vm517_vm1, %v12529_v25 }
 0x3e7   :  { %9811 = vmatprep.mubr.msk.bf16.mxu1 %vm517_vm1, %v12538_v30  ;;  %v6170_v47 = vrot.slane %v10090_v24, 7  ;;  %9941 = vmatprep.mubr.msk.bf16.mxu0 %vm517_vm1, %v12538_v30  ;;  %v13162_v8 = vsel %vm6231_vm2, %v6168_v58, %v6169_v49  ;;  %v14957_v24 = vld [vmem:[#allocation6_spill] sm:$0xff] }
 0x3e8   :  { %14954 = vst [vmem:[#allocation41_spill] sm:$0xff] %v13162_v8  ;;  %v13166_v2 = vsel %vm6231_vm2, %v6171_v60, %v6172_v40 }
 0x3e9   :  { %14955 = vst [vmem:[#allocation42_spill] sm:$0xff] %v13166_v2  ;;  %v9703_v59 = vpop.f32.mrb[200].mxu0  ;;  %v13170_v12 = vsel %vm6231_vm2, %v6170_v47, %v6171_v60  ;;  %v13174_v25 = vsel %vm6231_vm2, %v6169_v49, %v6170_v47  ;;  %v10910_v49 = vld [vmem:[%s14655_s0 + $0x100] sm:$0xff]  }
 0x3ea   :  { %14956 = vst [vmem:[#allocation43_spill] sm:$0xff] %v13174_v25  ;;  %v10091_v18 = vadd.f32 %v9703_v59, %v14957_v24  ;;  %v4394_v30 = vpop.f32.mrb[201].mxu0 }
 0x3eb   :  { %v10092_v62 = vadd.f32 %v4394_v30, %v14958_v26  ;;  %v9704_v58 = vpop.f32.mrb[202].mxu0 }
 0x3ec   :  { %v10093_v53 = vadd.f32 %v9704_v58, %v14959_v37  ;;  %v4397_v32 = vpop.f32.mrb[203].mxu0  ;;  %v6175_v60 = vrot.slane %v10091_v18, 7  ;;  %v14966_v58 = vld [vmem:[#allocation9_spill] sm:$0xff] }
 0x3ed   :  { %v6173_v51 = vrot.slane %v10092_v62, 7  ;;  %v10094_v2 = vadd.f32 %v4397_v32, %v14960_v38 }
 0x3ee   :  { %9812 = vmatmul.mubr.msk.bf16.gmra.mrb[180].mxu1 %vm517_vm1, %v12552_v29  ;;  %v6176_v8 = vrot.slane %v10093_v53, 7  ;;  %9942 = vmatmul.mubr.msk.bf16.gmra.mrb[116].mxu0 %vm517_vm1, %v12552_v29  ;;  %v14967_v53 = vld [vmem:[#allocation83_spill] sm:$0xff] }
 0x3ef   :  { %9815 = vmatprep.mubr.msk.bf16.mxu1 %vm517_vm1, %v10910_v49  ;;  %v6174_v47 = vrot.slane %v10094_v2, 7  ;;  %9945 = vmatprep.mubr.msk.bf16.mxu0 %vm517_vm1, %v10910_v49  ;;  %v13191_v59 = vsel %vm6231_vm2, %v6172_v40, %v6173_v51  ;;  %v14965_v2 = vld [vmem:[#allocation8_spill] sm:$0xff] }
 0x3f0   :  { %14961 = vst [vmem:[#allocation44_spill] sm:$0xff] %v13191_v59  ;;  %v13195_v24 = vsel %vm6231_vm2, %v6175_v60, %v6176_v8 }
 0x3f1   :  { %14962 = vst [vmem:[#allocation45_spill] sm:$0xff] %v13195_v24  ;;  %v9707_v18 = vpop.f32.mrb[204].mxu0  ;;  %v13199_v29 = vsel %vm6231_vm2, %v6174_v47, %v6175_v60  ;;  %v13203_v30 = vsel %vm6231_vm2, %v6173_v51, %v6174_v47  ;;  %v14968_v24 = vld [vmem:[#allocation84_spill] sm:$0xff] }
 0x3f2   :  { %14963 = vst [vmem:[#allocation46_spill] sm:$0xff] %v13199_v29  ;;  %14964 = vst [vmem:[#allocation47_spill] sm:$0xff] %v13203_v30  ;;  %v10095_v26 = vadd.f32 %v9707_v18, %v14965_v2  ;;  %v4410_v62 = vpop.f32.mrb[205].mxu0  ;;  %v10911_v60 = vld [vmem:[%s14655_s0 + $0x108] sm:$0xff]   ;;  %v14969_v18 = vld [vmem:[#allocation129_spill] sm:$0xff] }
 0x3f3   :  { %v10096_v37 = vadd.f32 %v4410_v62, %v14966_v58  ;;  %v9708_v40 = vpop.f32.mrb[206].mxu0 }
 0x3f4   :  { %v10097_v32 = vadd.f32 %v9708_v40, %v14967_v53  ;;  %v4413_v38 = vpop.f32.mrb[207].mxu0  ;;  %v6179_v51 = vrot.slane %v10095_v26, 7 }
 0x3f5   :  { %v6177_v49 = vrot.slane %v10096_v37, 7  ;;  %v10098_v59 = vadd.f32 %v4413_v38, %v14968_v24 }
 0x3f6   :  { %9816 = vmatmul.mubr.msk.bf16.gmra.mrb[184].mxu1 %vm517_vm1, %v10911_v60  ;;  %v6180_v47 = vrot.slane %v10097_v32, 7  ;;  %9946 = vmatmul.mubr.msk.bf16.gmra.mrb[120].mxu0 %vm517_vm1, %v10911_v60  ;;  %v14975_v32 = vld [vmem:[#allocation11_spill] sm:$0xff]  ;;  %v14976_v60 = vld [vmem:[#allocation85_spill] sm:$0xff] }
 0x3f7   :  { %9819 = vmatprep.mubr.msk.bf16.mxu1 %vm517_vm1, %v14969_v18  ;;  %v6178_v2 = vrot.slane %v10098_v59, 7  ;;  %9949 = vmatprep.mubr.msk.bf16.mxu0 %vm517_vm1, %v14969_v18  ;;  %v13220_v24 = vsel %vm6231_vm2, %v6176_v8, %v6177_v49  ;;  %v14974_v59 = vld [vmem:[#allocation10_spill] sm:$0xff] }
 0x3f8   :  { %14970 = vst [vmem:[#allocation48_spill] sm:$0xff] %v13220_v24  ;;  %v13224_v62 = vsel %vm6231_vm2, %v6179_v51, %v6180_v47 }
 0x3f9   :  { %14971 = vst [vmem:[#allocation49_spill] sm:$0xff] %v13224_v62  ;;  %v9711_v58 = vpop.f32.mrb[208].mxu0  ;;  %v13228_v26 = vsel %vm6231_vm2, %v6178_v2, %v6179_v51  ;;  %v13232_v37 = vsel %vm6231_vm2, %v6177_v49, %v6178_v2  ;;  %v14977_v62 = vld [vmem:[#allocation86_spill] sm:$0xff] }
 0x3fa   :  { %14972 = vst [vmem:[#allocation50_spill] sm:$0xff] %v13228_v26  ;;  %14973 = vst [vmem:[#allocation51_spill] sm:$0xff] %v13232_v37  ;;  %v10099_v40 = vadd.f32 %v9711_v58, %v14974_v59  ;;  %v4426_v53 = vpop.f32.mrb[209].mxu0  ;;  %v10912_v49 = vld [vmem:[%s14655_s0 + $0x140] sm:$0xff]  }
 0x3fb   :  { %v10100_v38 = vadd.f32 %v4426_v53, %v14975_v32  ;;  %v9712_v8 = vpop.f32.mrb[210].mxu0  ;;  %v14983_v32 = vld [vmem:[#allocation87_spill] sm:$0xff] }
 0x3fc   :  { %v10101_v18 = vadd.f32 %v9712_v8, %v14976_v60  ;;  %v4429_v24 = vpop.f32.mrb[211].mxu0  ;;  %v6183_v51 = vrot.slane %v10099_v40, 7  ;;  %v14984_v8 = vld [vmem:[#allocation88_spill] sm:$0xff] }
 0x3fd   :  { %v6181_v30 = vrot.slane %v10100_v38, 7  ;;  %v10102_v29 = vadd.f32 %v4429_v24, %v14977_v62 }
 0x3fe   :  { %9820 = vmatmul.mubr.msk.bf16.gmra.mrb[188].mxu1 %vm517_vm1, %v12547_v39  ;;  %v6184_v26 = vrot.slane %v10101_v18, 7  ;;  %9950 = vmatmul.mubr.msk.bf16.gmra.mrb[124].mxu0 %vm517_vm1, %v12547_v39 }
 0x3ff   :  { %9823 = vmatprep.mubr.msk.bf16.mxu1 %vm517_vm1, %v10912_v49  ;;  %v6182_v2 = vrot.slane %v10102_v29, 7  ;;  %9953 = vmatprep.mubr.msk.bf16.mxu0 %vm517_vm1, %v10912_v49  ;;  %v13249_v24 = vsel %vm6231_vm2, %v6180_v47, %v6181_v30  ;;  %v14982_v29 = vld [vmem:[#allocation12_spill] sm:$0xff] }
 0x400   :  { %14978 = vst [vmem:[#allocation52_spill] sm:$0xff] %v13249_v24  ;;  %v13253_v62 = vsel %vm6231_vm2, %v6183_v51, %v6184_v26 }
 0x401   :  { %14979 = vst [vmem:[#allocation53_spill] sm:$0xff] %v13253_v62  ;;  %v9715_v58 = vpop.f32.mrb[212].mxu0  ;;  %v13257_v39 = vsel %vm6231_vm2, %v6182_v2, %v6183_v51  ;;  %v13261_v59 = vsel %vm6231_vm2, %v6181_v30, %v6182_v2  ;;  %v14985_v62 = vld [vmem:[#allocation89_spill] sm:$0xff]  ;;  %v10913_v51 = vld [vmem:[%s14655_s0 + $0x148] sm:$0xff]  }
 0x402   :  { %14980 = vst [vmem:[#allocation54_spill] sm:$0xff] %v13257_v39  ;;  %14981 = vst [vmem:[#allocation55_spill] sm:$0xff] %v13261_v59  ;;  %v10103_v40 = vadd.f32 %v9715_v58, %v14982_v29  ;;  %v4442_v53 = vpop.f32.mrb[213].mxu0  ;;  %v10914_v58 = vld [vmem:[%s14655_s0 + $0x150] sm:$0xff]  }
 0x403   :  { %v10104_v38 = vadd.f32 %v4442_v53, %v14983_v32  ;;  %v9716_v47 = vpop.f32.mrb[214].mxu0 }
 0x404   :  { %v10105_v60 = vadd.f32 %v9716_v47, %v14984_v8  ;;  %v4445_v18 = vpop.f32.mrb[215].mxu0  ;;  %v6187_v30 = vrot.slane %v10103_v40, 7 }
 0x405   :  { %v6185_v49 = vrot.slane %v10104_v38, 7  ;;  %v10106_v24 = vadd.f32 %v4445_v18, %v14985_v62 }
 0x406   :  { %9824 = vmatmul.mubr.msk.bf16.gmra.mrb[192].mxu1 %vm517_vm1, %v10913_v51  ;;  %v6188_v2 = vrot.slane %v10105_v60, 7  ;;  %9954 = vmatmul.mubr.msk.bf16.gmra.mrb[128].mxu0 %vm517_vm1, %v10913_v51  ;;  %v14991_v60 = vld [vmem:[#allocation90_spill] sm:$0xff]  ;;  %v14992_v51 = vld [vmem:[#allocation91_spill] sm:$0xff] }
 0x407   :  { %9827 = vmatprep.mubr.msk.bf16.mxu1 %vm517_vm1, %v10914_v58  ;;  %v6186_v29 = vrot.slane %v10106_v24, 7  ;;  %9957 = vmatprep.mubr.msk.bf16.mxu0 %vm517_vm1, %v10914_v58  ;;  %v13279_v62 = vsel %vm6231_vm2, %v6184_v26, %v6185_v49  ;;  %v14990_v24 = vld [vmem:[#allocation35_spill] sm:$0xff] }
 0x408   :  { %14986 = vst [vmem:[#allocation56_spill] sm:$0xff] %v13279_v62  ;;  %v13283_v53 = vsel %vm6231_vm2, %v6187_v30, %v6188_v2 }
 0x409   :  { %14987 = vst [vmem:[#allocation57_spill] sm:$0xff] %v13283_v53  ;;  %v9719_v40 = vpop.f32.mrb[216].mxu0  ;;  %v13287_v32 = vsel %vm6231_vm2, %v6186_v29, %v6187_v30  ;;  %v13291_v38 = vsel %vm6231_vm2, %v6185_v49, %v6186_v29  ;;  %v14993_v53 = vld [vmem:[#allocation92_spill] sm:$0xff]  ;;  %v10915_v30 = vld [vmem:[%s14655_s0 + $0x158] sm:$0xff]  }
 0x40a   :  { %14988 = vst [vmem:[#allocation58_spill] sm:$0xff] %v13287_v32  ;;  %14989 = vst [vmem:[#allocation59_spill] sm:$0xff] %v13291_v38  ;;  %v10107_v47 = vadd.f32 %v9719_v40, %v14990_v24  ;;  %v4458_v8 = vpop.f32.mrb[217].mxu0  ;;  %v10916_v40 = vld [vmem:[%s14655_s0 + $0x160] sm:$0xff]  }
 0x40b   :  { %v10108_v18 = vadd.f32 %v4458_v8, %v14991_v60  ;;  %v9720_v26 = vpop.f32.mrb[218].mxu0 }
 0x40c   :  { %v10109_v58 = vadd.f32 %v9720_v26, %v14992_v51  ;;  %v4461_v62 = vpop.f32.mrb[219].mxu0  ;;  %v6191_v49 = vrot.slane %v10107_v47, 7  ;;  %v14999_v51 = vld [vmem:[#allocation94_spill] sm:$0xff] }
 0x40d   :  { %v6189_v59 = vrot.slane %v10108_v18, 7  ;;  %v10110_v39 = vadd.f32 %v4461_v62, %v14993_v53 }
 0x40e   :  { %9828 = vmatmul.mubr.msk.bf16.gmra.mrb[196].mxu1 %vm517_vm1, %v10915_v30  ;;  %v6192_v29 = vrot.slane %v10109_v58, 7  ;;  %9958 = vmatmul.mubr.msk.bf16.gmra.mrb[132].mxu0 %vm517_vm1, %v10915_v30  ;;  %v15000_v30 = vld [vmem:[#allocation95_spill] sm:$0xff] }
 0x40f   :  { %9831 = vmatprep.mubr.msk.bf16.mxu1 %vm517_vm1, %v10916_v40  ;;  %v6190_v24 = vrot.slane %v10110_v39, 7  ;;  %9961 = vmatprep.mubr.msk.bf16.mxu0 %vm517_vm1, %v10916_v40  ;;  %v13309_v62 = vsel %vm6231_vm2, %v6188_v2, %v6189_v59  ;;  %v14998_v39 = vld [vmem:[#allocation93_spill] sm:$0xff] }
 0x410   :  { %14994 = vst [vmem:[#allocation60_spill] sm:$0xff] %v13309_v62  ;;  %v13313_v53 = vsel %vm6231_vm2, %v6191_v49, %v6192_v29 }
 0x411   :  { %14995 = vst [vmem:[#allocation61_spill] sm:$0xff] %v13313_v53  ;;  %v9723_v47 = vpop.f32.mrb[220].mxu0  ;;  %v13317_v8 = vsel %vm6231_vm2, %v6190_v24, %v6191_v49  ;;  %v13321_v60 = vsel %vm6231_vm2, %v6189_v59, %v6190_v24  ;;  %v15001_v53 = vld [vmem:[#allocation96_spill] sm:$0xff] }
 0x412   :  { %14996 = vst [vmem:[#allocation62_spill] sm:$0xff] %v13317_v8  ;;  %14997 = vst [vmem:[#allocation63_spill] sm:$0xff] %v13321_v60  ;;  %v10111_v18 = vadd.f32 %v9723_v47, %v14998_v39  ;;  %v4474_v26 = vpop.f32.mrb[221].mxu0  ;;  %v10917_v49 = vld [vmem:[%s14655_s0 + $0x168] sm:$0xff]   ;;  %v10918_v47 = vld [vmem:[%s14655_s0 + $0x170] sm:$0xff]  }
 0x413   :  { %v10112_v58 = vadd.f32 %v4474_v26, %v14999_v51  ;;  %v9724_v2 = vpop.f32.mrb[222].mxu0 }
 0x414   :  { %v10113_v40 = vadd.f32 %v9724_v2, %v15000_v30  ;;  %v4477_v62 = vpop.f32.mrb[223].mxu0  ;;  %v6195_v59 = vrot.slane %v10111_v18, 7  ;;  %v15007_v30 = vld [vmem:[#allocation98_spill] sm:$0xff] }
 0x415   :  { %v6193_v38 = vrot.slane %v10112_v58, 7  ;;  %v10114_v32 = vadd.f32 %v4477_v62, %v15001_v53 }
 0x416   :  { %9832 = vmatmul.mubr.msk.bf16.gmra.mrb[200].mxu1 %vm517_vm1, %v10917_v49  ;;  %v6196_v24 = vrot.slane %v10113_v40, 7  ;;  %9962 = vmatmul.mubr.msk.bf16.gmra.mrb[136].mxu0 %vm517_vm1, %v10917_v49  ;;  %v15008_v49 = vld [vmem:[#allocation99_spill] sm:$0xff] }
 0x417   :  { %9835 = vmatprep.mubr.msk.bf16.mxu1 %vm517_vm1, %v10918_v47  ;;  %v6194_v39 = vrot.slane %v10114_v32, 7  ;;  %9965 = vmatprep.mubr.msk.bf16.mxu0 %vm517_vm1, %v10918_v47  ;;  %v13339_v62 = vsel %vm6231_vm2, %v6192_v29, %v6193_v38  ;;  %v15006_v32 = vld [vmem:[#allocation97_spill] sm:$0xff] }
 0x418   :  { %15002 = vst [vmem:[#allocation64_spill] sm:$0xff] %v13339_v62  ;;  %v13343_v53 = vsel %vm6231_vm2, %v6195_v59, %v6196_v24 }
 0x419   :  { %15003 = vst [vmem:[#allocation65_spill] sm:$0xff] %v13343_v53  ;;  %v9727_v18 = vpop.f32.mrb[224].mxu0  ;;  %v13347_v26 = vsel %vm6231_vm2, %v6194_v39, %v6195_v59  ;;  %v13351_v51 = vsel %vm6231_vm2, %v6193_v38, %v6194_v39  ;;  %v15009_v53 = vld [vmem:[#allocation100_spill] sm:$0xff]  ;;  %v10919_v59 = vld [vmem:[%s14655_s0 + $0x178] sm:$0xff]  }
 0x41a   :  { %15004 = vst [vmem:[#allocation66_spill] sm:$0xff] %v13347_v26  ;;  %15005 = vst [vmem:[#allocation67_spill] sm:$0xff] %v13351_v51  ;;  %v10115_v58 = vadd.f32 %v9727_v18, %v15006_v32  ;;  %v4490_v2 = vpop.f32.mrb[225].mxu0  ;;  %v10920_v18 = vld [vmem:[%s14655_s0 + $0x180] sm:$0xff]  }
 0x41b   :  { %v10116_v40 = vadd.f32 %v4490_v2, %v15007_v30  ;;  %v9728_v29 = vpop.f32.mrb[226].mxu0 }
 0x41c   :  { %v10117_v47 = vadd.f32 %v9728_v29, %v15008_v49  ;;  %v4493_v62 = vpop.f32.mrb[227].mxu0  ;;  %v6199_v38 = vrot.slane %v10115_v58, 7  ;;  %v15015_v49 = vld [vmem:[#allocation102_spill] sm:$0xff] }
 0x41d   :  { %v6197_v60 = vrot.slane %v10116_v40, 7  ;;  %v10118_v8 = vadd.f32 %v4493_v62, %v15009_v53 }
 0x41e   :  { %9836 = vmatmul.mubr.msk.bf16.gmra.mrb[204].mxu1 %vm517_vm1, %v10919_v59  ;;  %v6200_v39 = vrot.slane %v10117_v47, 7  ;;  %9966 = vmatmul.mubr.msk.bf16.gmra.mrb[140].mxu0 %vm517_vm1, %v10919_v59  ;;  %v15016_v59 = vld [vmem:[#allocation103_spill] sm:$0xff] }
 0x41f   :  { %9839 = vmatprep.mubr.msk.bf16.mxu1 %vm517_vm1, %v10920_v18  ;;  %v6198_v32 = vrot.slane %v10118_v8, 7  ;;  %9969 = vmatprep.mubr.msk.bf16.mxu0 %vm517_vm1, %v10920_v18  ;;  %v13369_v62 = vsel %vm6231_vm2, %v6196_v24, %v6197_v60  ;;  %v15014_v8 = vld [vmem:[#allocation101_spill] sm:$0xff] }
 0x420   :  { %15010 = vst [vmem:[#allocation68_spill] sm:$0xff] %v13369_v62  ;;  %v13373_v53 = vsel %vm6231_vm2, %v6199_v38, %v6200_v39 }
 0x421   :  { %15011 = vst [vmem:[#allocation69_spill] sm:$0xff] %v13373_v53  ;;  %v9731_v58 = vpop.f32.mrb[228].mxu0  ;;  %v13377_v2 = vsel %vm6231_vm2, %v6198_v32, %v6199_v38  ;;  %v13381_v30 = vsel %vm6231_vm2, %v6197_v60, %v6198_v32  ;;  %v15017_v53 = vld [vmem:[#allocation104_spill] sm:$0xff] }
 0x422   :  { %15012 = vst [vmem:[#allocation70_spill] sm:$0xff] %v13377_v2  ;;  %15013 = vst [vmem:[#allocation71_spill] sm:$0xff] %v13381_v30  ;;  %v10119_v40 = vadd.f32 %v9731_v58, %v15014_v8  ;;  %v4506_v29 = vpop.f32.mrb[229].mxu0  ;;  %v10921_v38 = vld [vmem:[%s14655_s0 + $0x188] sm:$0xff]   ;;  %v10922_v58 = vld [vmem:[%s14655_s0 + $0x190] sm:$0xff]  }
 0x423   :  { %v10120_v47 = vadd.f32 %v4506_v29, %v15015_v49  ;;  %v9732_v24 = vpop.f32.mrb[230].mxu0 }
 0x424   :  { %v10121_v18 = vadd.f32 %v9732_v24, %v15016_v59  ;;  %v4509_v62 = vpop.f32.mrb[231].mxu0  ;;  %v6203_v60 = vrot.slane %v10119_v40, 7  ;;  %v15023_v59 = vld [vmem:[#allocation106_spill] sm:$0xff] }
 0x425   :  { %v6201_v51 = vrot.slane %v10120_v47, 7  ;;  %v10122_v26 = vadd.f32 %v4509_v62, %v15017_v53 }
 0x426   :  { %9840 = vmatmul.mubr.msk.bf16.gmra.mrb[208].mxu1 %vm517_vm1, %v10921_v38  ;;  %v6204_v32 = vrot.slane %v10121_v18, 7  ;;  %9970 = vmatmul.mubr.msk.bf16.gmra.mrb[144].mxu0 %vm517_vm1, %v10921_v38  ;;  %v15024_v38 = vld [vmem:[#allocation107_spill] sm:$0xff] }
 0x427   :  { %9843 = vmatprep.mubr.msk.bf16.mxu1 %vm517_vm1, %v10922_v58  ;;  %v6202_v8 = vrot.slane %v10122_v26, 7  ;;  %9973 = vmatprep.mubr.msk.bf16.mxu0 %vm517_vm1, %v10922_v58  ;;  %v13399_v62 = vsel %vm6231_vm2, %v6200_v39, %v6201_v51  ;;  %v15022_v26 = vld [vmem:[#allocation105_spill] sm:$0xff] }
 0x428   :  { %15018 = vst [vmem:[#allocation72_spill] sm:$0xff] %v13399_v62  ;;  %v13403_v53 = vsel %vm6231_vm2, %v6203_v60, %v6204_v32 }
 0x429   :  { %15019 = vst [vmem:[#allocation73_spill] sm:$0xff] %v13403_v53  ;;  %v9735_v40 = vpop.f32.mrb[232].mxu0  ;;  %v13407_v29 = vsel %vm6231_vm2, %v6202_v8, %v6203_v60  ;;  %v13411_v49 = vsel %vm6231_vm2, %v6201_v51, %v6202_v8  ;;  %v15025_v53 = vld [vmem:[#allocation108_spill] sm:$0xff]  ;;  %v10923_v60 = vld [vmem:[%s14655_s0 + $0x198] sm:$0xff]  }
 0x42a   :  { %15020 = vst [vmem:[#allocation74_spill] sm:$0xff] %v13407_v29  ;;  %15021 = vst [vmem:[#allocation75_spill] sm:$0xff] %v13411_v49  ;;  %v10123_v47 = vadd.f32 %v9735_v40, %v15022_v26  ;;  %v4522_v24 = vpop.f32.mrb[233].mxu0  ;;  %v10924_v40 = vld [vmem:[%s14655_s0 + $0x1a0] sm:$0xff]  }
 0x42b   :  { %v10124_v18 = vadd.f32 %v4522_v24, %v15023_v59  ;;  %v9736_v39 = vpop.f32.mrb[234].mxu0 }
 0x42c   :  { %v10125_v58 = vadd.f32 %v9736_v39, %v15024_v38  ;;  %v4525_v62 = vpop.f32.mrb[235].mxu0  ;;  %v6207_v51 = vrot.slane %v10123_v47, 7  ;;  %v15031_v38 = vld [vmem:[#allocation110_spill] sm:$0xff] }
 0x42d   :  { %v6205_v30 = vrot.slane %v10124_v18, 7  ;;  %v10126_v2 = vadd.f32 %v4525_v62, %v15025_v53 }
 0x42e   :  { %9844 = vmatmul.mubr.msk.bf16.gmra.mrb[212].mxu1 %vm517_vm1, %v10923_v60  ;;  %v6208_v8 = vrot.slane %v10125_v58, 7  ;;  %9974 = vmatmul.mubr.msk.bf16.gmra.mrb[148].mxu0 %vm517_vm1, %v10923_v60  ;;  %v15032_v60 = vld [vmem:[#allocation111_spill] sm:$0xff] }
 0x42f   :  { %9847 = vmatprep.mubr.msk.bf16.mxu1 %vm517_vm1, %v10924_v40  ;;  %v6206_v26 = vrot.slane %v10126_v2, 7  ;;  %9977 = vmatprep.mubr.msk.bf16.mxu0 %vm517_vm1, %v10924_v40  ;;  %v13429_v62 = vsel %vm6231_vm2, %v6204_v32, %v6205_v30  ;;  %v15030_v2 = vld [vmem:[#allocation109_spill] sm:$0xff] }
 0x430   :  { %15026 = vst [vmem:[#allocation3_spill] sm:$0xff] %v13429_v62  ;;  %v13433_v53 = vsel %vm6231_vm2, %v6207_v51, %v6208_v8 }
 0x431   :  { %15027 = vst [vmem:[#allocation76_spill] sm:$0xff] %v13433_v53  ;;  %v9739_v47 = vpop.f32.mrb[236].mxu0  ;;  %v13437_v24 = vsel %vm6231_vm2, %v6206_v26, %v6207_v51  ;;  %v13441_v59 = vsel %vm6231_vm2, %v6205_v30, %v6206_v26  ;;  %v15033_v53 = vld [vmem:[#allocation112_spill] sm:$0xff] }
 0x432   :  { %15028 = vst [vmem:[#allocation77_spill] sm:$0xff] %v13437_v24  ;;  %15029 = vst [vmem:[#allocation78_spill] sm:$0xff] %v13441_v59  ;;  %v10127_v18 = vadd.f32 %v9739_v47, %v15030_v2  ;;  %v4538_v39 = vpop.f32.mrb[237].mxu0  ;;  %v10925_v51 = vld [vmem:[%s14655_s0 + $0x1a8] sm:$0xff]   ;;  %v10926_v47 = vld [vmem:[%s14655_s0 + $0x1b0] sm:$0xff]  }
 0x433   :  { %v10128_v58 = vadd.f32 %v4538_v39, %v15031_v38  ;;  %v9740_v32 = vpop.f32.mrb[238].mxu0 }
 0x434   :  { %v10129_v40 = vadd.f32 %v9740_v32, %v15032_v60  ;;  %v4541_v62 = vpop.f32.mrb[239].mxu0  ;;  %v6211_v30 = vrot.slane %v10127_v18, 7  ;;  %v15039_v60 = vld [vmem:[#allocation114_spill] sm:$0xff] }
 0x435   :  { %v6209_v49 = vrot.slane %v10128_v58, 7  ;;  %v10130_v29 = vadd.f32 %v4541_v62, %v15033_v53 }
 0x436   :  { %9848 = vmatmul.mubr.msk.bf16.gmra.mrb[216].mxu1 %vm517_vm1, %v10925_v51  ;;  %v6212_v26 = vrot.slane %v10129_v40, 7  ;;  %9978 = vmatmul.mubr.msk.bf16.gmra.mrb[152].mxu0 %vm517_vm1, %v10925_v51  ;;  %v15040_v51 = vld [vmem:[#allocation115_spill] sm:$0xff] }
 0x437   :  { %9851 = vmatprep.mubr.msk.bf16.mxu1 %vm517_vm1, %v10926_v47  ;;  %v6210_v2 = vrot.slane %v10130_v29, 7  ;;  %9981 = vmatprep.mubr.msk.bf16.mxu0 %vm517_vm1, %v10926_v47  ;;  %v13459_v62 = vsel %vm6231_vm2, %v6208_v8, %v6209_v49  ;;  %v15038_v29 = vld [vmem:[#allocation113_spill] sm:$0xff] }
 0x438   :  { %15034 = vst [vmem:[#allocation4_spill] sm:$0xff] %v13459_v62  ;;  %v13463_v53 = vsel %vm6231_vm2, %v6211_v30, %v6212_v26 }
 0x439   :  { %15035 = vst [vmem:[#allocation5_spill] sm:$0xff] %v13463_v53  ;;  %v9743_v18 = vpop.f32.mrb[240].mxu0  ;;  %v13467_v39 = vsel %vm6231_vm2, %v6210_v2, %v6211_v30  ;;  %v13471_v38 = vsel %vm6231_vm2, %v6209_v49, %v6210_v2  ;;  %v15041_v53 = vld [vmem:[#allocation116_spill] sm:$0xff]  ;;  %v10927_v30 = vld [vmem:[%s14655_s0 + $0x1b8] sm:$0xff]  }
 0x43a   :  { %15036 = vst [vmem:[#allocation79_spill] sm:$0xff] %v13467_v39  ;;  %15037 = vst [vmem:[#allocation80_spill] sm:$0xff] %v13471_v38  ;;  %v10131_v58 = vadd.f32 %v9743_v18, %v15038_v29  ;;  %v4554_v32 = vpop.f32.mrb[241].mxu0  ;;  %v10928_v18 = vld [vmem:[%s14655_s0 + $0x1c0] sm:$0xff]  }
 0x43b   :  { %v10132_v40 = vadd.f32 %v4554_v32, %v15039_v60  ;;  %v9744_v8 = vpop.f32.mrb[242].mxu0 }
 0x43c   :  { %v10133_v47 = vadd.f32 %v9744_v8, %v15040_v51  ;;  %v4557_v62 = vpop.f32.mrb[243].mxu0  ;;  %v6215_v49 = vrot.slane %v10131_v58, 7  ;;  %v15047_v51 = vld [vmem:[#allocation118_spill] sm:$0xff] }
 0x43d   :  { %v6213_v59 = vrot.slane %v10132_v40, 7  ;;  %v10134_v24 = vadd.f32 %v4557_v62, %v15041_v53 }
 0x43e   :  { %9852 = vmatmul.mubr.msk.bf16.gmra.mrb[220].mxu1 %vm517_vm1, %v10927_v30  ;;  %v6216_v2 = vrot.slane %v10133_v47, 7  ;;  %9982 = vmatmul.mubr.msk.bf16.gmra.mrb[156].mxu0 %vm517_vm1, %v10927_v30  ;;  %v15048_v30 = vld [vmem:[#allocation119_spill] sm:$0xff] }
 0x43f   :  { %9855 = vmatprep.mubr.msk.bf16.mxu1 %vm517_vm1, %v10928_v18  ;;  %v6214_v29 = vrot.slane %v10134_v24, 7  ;;  %9985 = vmatprep.mubr.msk.bf16.mxu0 %vm517_vm1, %v10928_v18  ;;  %v13489_v62 = vsel %vm6231_vm2, %v6212_v26, %v6213_v59  ;;  %v15046_v24 = vld [vmem:[#allocation117_spill] sm:$0xff] }
 0x440   :  { %15042 = vst [vmem:[#allocation6_spill] sm:$0xff] %v13489_v62  ;;  %v13493_v53 = vsel %vm6231_vm2, %v6215_v49, %v6216_v2 }
 0x441   :  { %15043 = vst [vmem:[#allocation7_spill] sm:$0xff] %v13493_v53  ;;  %v9747_v58 = vpop.f32.mrb[244].mxu0  ;;  %v13497_v32 = vsel %vm6231_vm2, %v6214_v29, %v6215_v49  ;;  %v13501_v60 = vsel %vm6231_vm2, %v6213_v59, %v6214_v29  ;;  %v15049_v53 = vld [vmem:[#allocation120_spill] sm:$0xff] }
 0x442   :  { %15044 = vst [vmem:[#allocation81_spill] sm:$0xff] %v13497_v32  ;;  %15045 = vst [vmem:[#allocation82_spill] sm:$0xff] %v13501_v60  ;;  %v10135_v40 = vadd.f32 %v9747_v58, %v15046_v24  ;;  %v4570_v8 = vpop.f32.mrb[245].mxu0  ;;  %v10929_v49 = vld [vmem:[%s14655_s0 + $0x1c8] sm:$0xff]   ;;  %v10930_v58 = vld [vmem:[%s14655_s0 + $0x1d0] sm:$0xff]  }
 0x443   :  { %v10136_v47 = vadd.f32 %v4570_v8, %v15047_v51  ;;  %v9748_v26 = vpop.f32.mrb[246].mxu0 }
 0x444   :  { %v10137_v18 = vadd.f32 %v9748_v26, %v15048_v30  ;;  %v4573_v62 = vpop.f32.mrb[247].mxu0  ;;  %v6219_v59 = vrot.slane %v10135_v40, 7  ;;  %v15055_v30 = vld [vmem:[#allocation122_spill] sm:$0xff] }
 0x445   :  { %v6217_v38 = vrot.slane %v10136_v47, 7  ;;  %v10138_v39 = vadd.f32 %v4573_v62, %v15049_v53 }
 0x446   :  { %9856 = vmatmul.mubr.msk.bf16.gmra.mrb[224].mxu1 %vm517_vm1, %v10929_v49  ;;  %v6220_v29 = vrot.slane %v10137_v18, 7  ;;  %9986 = vmatmul.mubr.msk.bf16.gmra.mrb[160].mxu0 %vm517_vm1, %v10929_v49  ;;  %v15056_v49 = vld [vmem:[#allocation123_spill] sm:$0xff] }
 0x447   :  { %9859 = vmatprep.mubr.msk.bf16.mxu1 %vm517_vm1, %v10930_v58  ;;  %v6218_v24 = vrot.slane %v10138_v39, 7  ;;  %9989 = vmatprep.mubr.msk.bf16.mxu0 %vm517_vm1, %v10930_v58  ;;  %v13519_v62 = vsel %vm6231_vm2, %v6216_v2, %v6217_v38  ;;  %v15054_v39 = vld [vmem:[#allocation121_spill] sm:$0xff] }
 0x448   :  { %15050 = vst [vmem:[#allocation8_spill] sm:$0xff] %v13519_v62  ;;  %v13523_v53 = vsel %vm6231_vm2, %v6219_v59, %v6220_v29 }
 0x449   :  { %15051 = vst [vmem:[#allocation9_spill] sm:$0xff] %v13523_v53  ;;  %v9751_v40 = vpop.f32.mrb[248].mxu0  ;;  %v13527_v8 = vsel %vm6231_vm2, %v6218_v24, %v6219_v59  ;;  %v13531_v51 = vsel %vm6231_vm2, %v6217_v38, %v6218_v24  ;;  %v15057_v53 = vld [vmem:[#allocation124_spill] sm:$0xff]  ;;  %v10931_v59 = vld [vmem:[%s14655_s0 + $0x1d8] sm:$0xff]  }
 0x44a   :  { %15052 = vst [vmem:[#allocation83_spill] sm:$0xff] %v13527_v8  ;;  %15053 = vst [vmem:[#allocation84_spill] sm:$0xff] %v13531_v51  ;;  %v10139_v47 = vadd.f32 %v9751_v40, %v15054_v39  ;;  %v4586_v26 = vpop.f32.mrb[249].mxu0  ;;  %v10932_v40 = vld [vmem:[%s14655_s0 + $0x1e0] sm:$0xff]  }
 0x44b   :  { %v10140_v18 = vadd.f32 %v4586_v26, %v15055_v30  ;;  %v9752_v2 = vpop.f32.mrb[250].mxu0 }
 0x44c   :  { %v10141_v58 = vadd.f32 %v9752_v2, %v15056_v49  ;;  %v4589_v62 = vpop.f32.mrb[251].mxu0  ;;  %v6223_v38 = vrot.slane %v10139_v47, 7  ;;  %v15063_v49 = vld [vmem:[#allocation126_spill] sm:$0xff] }
 0x44d   :  { %v6221_v60 = vrot.slane %v10140_v18, 7  ;;  %v10142_v32 = vadd.f32 %v4589_v62, %v15057_v53 }
 0x44e   :  { %9860 = vmatmul.mubr.msk.bf16.gmra.mrb[228].mxu1 %vm517_vm1, %v10931_v59  ;;  %v6224_v24 = vrot.slane %v10141_v58, 7  ;;  %9990 = vmatmul.mubr.msk.bf16.gmra.mrb[164].mxu0 %vm517_vm1, %v10931_v59  ;;  %v15064_v59 = vld [vmem:[#allocation127_spill] sm:$0xff] }
 0x44f   :  { %9863 = vmatprep.mubr.msk.bf16.mxu1 %vm517_vm1, %v10932_v40  ;;  %v6222_v39 = vrot.slane %v10142_v32, 7  ;;  %9993 = vmatprep.mubr.msk.bf16.mxu0 %vm517_vm1, %v10932_v40  ;;  %v13549_v62 = vsel %vm6231_vm2, %v6220_v29, %v6221_v60  ;;  %v15062_v32 = vld [vmem:[#allocation125_spill] sm:$0xff] }
 0x450   :  { %15058 = vst [vmem:[#allocation129_spill] sm:$0xff] %v13549_v62  ;;  %v13553_v53 = vsel %vm6231_vm2, %v6223_v38, %v6224_v24 }
 0x451   :  { %15059 = vst [vmem:[#allocation10_spill] sm:$0xff] %v13553_v53  ;;  %v9755_v47 = vpop.f32.mrb[252].mxu0  ;;  %v13557_v26 = vsel %vm6231_vm2, %v6222_v39, %v6223_v38  ;;  %v13561_v30 = vsel %vm6231_vm2, %v6221_v60, %v6222_v39  ;;  %v15065_v53 = vld [vmem:[#allocation128_spill] sm:$0xff] }
 0x452   :  { %15060 = vst [vmem:[#allocation11_spill] sm:$0xff] %v13557_v26  ;;  %15061 = vst [vmem:[#allocation85_spill] sm:$0xff] %v13561_v30  ;;  %v10143_v18 = vadd.f32 %v9755_v47, %v15062_v32  ;;  %v4602_v2 = vpop.f32.mrb[253].mxu0  ;;  %v10933_v38 = vld [vmem:[%s14655_s0 + $0x1e8] sm:$0xff]   ;;  %v10934_v47 = vld [vmem:[%s14655_s0 + $0x1f0] sm:$0xff]  }
 0x453   :  { %v10144_v58 = vadd.f32 %v4602_v2, %v15063_v49  ;;  %v9756_v29 = vpop.f32.mrb[254].mxu0  ;;  %v15067_v2 = vrot.slane %v12656_v50, 7 }
 0x454   :  { %v10145_v40 = vadd.f32 %v9756_v29, %v15064_v59  ;;  %v4605_v62 = vpop.f32.mrb[255].mxu0  ;;  %v6227_v60 = vrot.slane %v10143_v18, 7 }
 0x455   :  { %v6225_v51 = vrot.slane %v10144_v58, 7  ;;  %v10146_v8 = vadd.f32 %v4605_v62, %v15065_v53 }
 0x456   :  { %9864 = vmatmul.mubr.msk.bf16.gmra.mrb[232].mxu1 %vm517_vm1, %v10933_v38  ;;  %v6228_v39 = vrot.slane %v10145_v40, 7  ;;  %9994 = vmatmul.mubr.msk.bf16.gmra.mrb[168].mxu0 %vm517_vm1, %v10933_v38 }
 0x457   :  { %9867 = vmatprep.mubr.msk.bf16.mxu1 %vm517_vm1, %v10934_v47  ;;  %v6226_v32 = vrot.slane %v10146_v8, 7  ;;  %9997 = vmatprep.mubr.msk.bf16.mxu0 %vm517_vm1, %v10934_v47  ;;  %v13579_v62 = vsel %vm6231_vm2, %v6224_v24, %v6225_v51 }
 0x458   :  { %15066 = vst [vmem:[#allocation86_spill] sm:$0xff] %v13579_v62  ;;  %v6359_v18 = vsel %vm6231_vm2, %v6228_v39, %v15067_v2  ;;  %v13587_v49 = vsel %vm6231_vm2, %v6227_v60, %v6228_v39  ;;  %v13638_v62 = vld [vmem:[%s14656_s2 + $0x18] sm:$0xff]  }
 0x459   :  { %v9761_v53 = vpop.f32.mrb[128].mxu1  ;;  %15068 = vst [vmem:[#allocation12_spill] sm:$0xff] %v13587_v49  ;;  %v9891_v29 = vpop.f32.mrb[64].mxu0  ;;  %v13592_v59 = vsel %vm6231_vm2, %v6226_v32, %v6227_v60  ;;  %v13596_v24 = vsel %vm6231_vm2, %v6225_v51, %v6226_v32  ;;  %v13610_v51 = vld [vmem:[%s14656_s2] sm:$0xff]  }
 0x45a   :  { %v6362_v58 = vadd.f32 %v9761_v53, %v12676_v63  ;;  %v4784_v8 = vpop.f32.mrb[129].mxu1  ;;  %15069 = vst [vmem:[#allocation87_spill] sm:$0xff] %v13592_v59  ;;  %15070 = vst [vmem:[#allocation88_spill] sm:$0xff] %v13596_v24  ;;  %v13598_v40 = vpop.f32.mrb[65].mxu0  ;;  %v13605_v63 = vld [vmem:[%s14656_s2 + $0x8] sm:$0xff]   ;;  %v6490_v32 = vrot.slane %v9891_v29, 1 }
 0x45b   :  { %v6360_v50 = vadd.f32 %v6359_v18, %v4784_v8  ;;  %15071 = vst [vmem:[#allocation89_spill] sm:$0xff] %v13598_v40  ;;  %v9762_v38 = vpop.f32.mrb[130].mxu1  ;;  %v9892_v39 = vpop.f32.mrb[66].mxu0  ;;  %15072 = vst [vmem:[#allocation35_spill] sm:$0xff] %v13605_v63 }
 0x45c   :  { %v6363_v47 = vadd.f32 %v9762_v38, %v12672_v61  ;;  %v4787_v60 = vpop.f32.mrb[131].mxu1  ;;  %15073 = vst [vmem:[#allocation90_spill] sm:$0xff] %v13610_v51  ;;  %v6491_v53 = vrot.slane %v9892_v39, 1  ;;  %v5465_v18 = vpop.f32.mrb[67].mxu0  ;;  %v14684_v61 = vrot.slane %v13598_v40, 1  ;;  %v10935_v38 = vld [vmem:[%s14655_s0 + $0x1f8] sm:$0xff]   ;;  %v15074_v40 = vunpack.c.l.bf16 %v13605_v63 }
 0x45d   :  { %v6361_v2 = vadd.f32 %v12682_v0, %v4787_v60  ;;  %v6489_v8 = vrot.slane %v5465_v18, 1  ;;  %v10936_v0 = vld [vmem:[%s14655_s0 + $0x200] sm:$0xff]  }
 0x45e   :  { %9868 = vmatmul.mubr.msk.bf16.gmra.mrb[236].mxu1 %vm517_vm1, %v10935_v38  ;;  %v6741_v24 = vsel %vm6616_vm3, %v6490_v32, %v6491_v53  ;;  %9998 = vmatmul.mubr.msk.bf16.gmra.mrb[172].mxu0 %vm517_vm1, %v10935_v38 }
 0x45f   :  { %9871 = vmatprep.mubr.msk.bf16.mxu1 %vm517_vm1, %v10936_v0  ;;  %v6747_v60 = vadd.f32 %v6741_v24, %v6362_v58  ;;  %v6742_v18 = vsel %vm6616_vm3, %v6489_v8, %v6490_v32  ;;  %v6743_v49 = vsel %vm6616_vm3, %v14684_v61, %v6489_v8  ;;  %10001 = vmatprep.mubr.msk.bf16.mxu0 %vm517_vm1, %v10936_v0  ;;  %v15075_v8 = vunpack.c.l.bf16 %v13610_v51 }
 0x460   :  { %v6745_v39 = vadd.f32 %v6743_v49, %v6360_v50  ;;  %v6746_v29 = vadd.f32 %v6742_v18, %v6361_v2  ;;  %v15076_v49 = vunpack.c.h.bf16 %v13610_v51 }
 0x461   :  { %v9765_v38 = vpop.f32.mrb[132].mxu1  ;;  %v9895_v24 = vpop.f32.mrb[68].mxu0  ;;  %v7003_v30 = vmul.f32 %v15074_v40, %v6747_v60 }
 0x462   :  { %v6366_v58 = vadd.f32 %v9765_v38, %v12706_v57  ;;  %v4800_v59 = vpop.f32.mrb[133].mxu1  ;;  %v7001_v0 = vmul.f32 %v15075_v8, %v6745_v39  ;;  %v7002_v50 = vmul.f32 %v15076_v49, %v6746_v29  ;;  %v5478_v18 = vpop.f32.mrb[69].mxu0  ;;  %v13652_v57 = vld [vmem:[%s14656_s2 + $0x10] sm:$0xff]   ;;  %v6494_v38 = vrot.slane %v9895_v24, 1 }
 0x463   :  { %v6364_v2 = vadd.f32 %v12698_v55, %v4800_v59  ;;  %v9766_v61 = vpop.f32.mrb[134].mxu1  ;;  %v6492_v32 = vrot.slane %v5478_v18, 1  ;;  %v9896_v40 = vpop.f32.mrb[70].mxu0  ;;  %v14689_v18 = vunpack.c.l.bf16 %v13652_v57 }
 0x464   :  { %v6367_v26 = vadd.f32 %v9766_v61, %v12702_v56  ;;  %v4803_v39 = vpop.f32.mrb[135].mxu1  ;;  %v7130_v8 = vsel %vm517_vm1, %v7001_v0, 0.0  ;;  %v7131_v29 = vsel %vm517_vm1, %v7002_v50, 0.0  ;;  %v6495_v55 = vrot.slane %v9896_v40, 1  ;;  %v5481_v49 = vpop.f32.mrb[71].mxu0  ;;  %v10937_v56 = vld [vmem:[%s14655_s0 + $0x208] sm:$0xff]  }
 0x465   :  { %v6365_v59 = vadd.f32 %v12710_v31, %v4803_v39  ;;  %v7132_v37 = vadd.f32 %v7131_v29, %v7130_v8  ;;  %v6740_v25 = vsel %vm6616_vm3, %v6491_v53, %v6492_v32  ;;  %v6493_v24 = vrot.slane %v5481_v49, 1  ;;  %v13674_v53 = vld [vmem:[%s14656_s2 + $0x28] sm:$0xff]   ;;  %v10938_v40 = vld [vmem:[%s14655_s0 + $0x210] sm:$0xff]   ;;  %v13687_v8 = vld [vmem:[%s14656_s2 + $0x20] sm:$0xff]  }
 0x466   :  { %9872 = vmatmul.mubr.msk.bf16.gmra.mrb[240].mxu1 %vm517_vm1, %v10937_v56  ;;  %v7133_v61 = vsel %vm517_vm1, %v7003_v30, 0.0  ;;  %v6748_v0 = vadd.f32 %v6740_v25, %v6363_v47  ;;  %v6737_v31 = vsel %vm6616_vm3, %v6494_v38, %v6495_v55  ;;  %10002 = vmatmul.mubr.msk.bf16.gmra.mrb[176].mxu0 %vm517_vm1, %v10937_v56  ;;  %v15077_v29 = vunpack.c.h.bf16 %v13605_v63 }
 0x467   :  { %9875 = vmatprep.mubr.msk.bf16.mxu1 %vm517_vm1, %v10938_v40  ;;  %v7134_v30 = vadd.f32 %v7133_v61, %v7132_v37  ;;  %v6751_v25 = vadd.f32 %v6737_v31, %v6366_v58  ;;  %v6738_v47 = vsel %vm6616_vm3, %v6493_v24, %v6494_v38  ;;  %v6739_v39 = vsel %vm6616_vm3, %v6492_v32, %v6493_v24 }
 0x468   :  { %10005 = vmatprep.mubr.msk.bf16.mxu0 %vm517_vm1, %v10938_v40  ;;  %v7004_v49 = vmul.f32 %v15077_v29, %v6748_v0  ;;  %v6749_v56 = vadd.f32 %v6739_v39, %v6364_v2  ;;  %v6750_v60 = vadd.f32 %v6738_v47, %v6365_v59  ;;  %v15078_v40 = vunpack.c.h.bf16 %v13652_v57 }
 0x469   :  { %v9769_v37 = vpop.f32.mrb[136].mxu1  ;;  %v9899_v61 = vpop.f32.mrb[72].mxu0 }
 0x46a   :  { %v6370_v58 = vadd.f32 %v9769_v37, %v12738_v33  ;;  %v4816_v38 = vpop.f32.mrb[137].mxu1  ;;  %v7135_v24 = vsel %vm517_vm1, %v7004_v49, 0.0  ;;  %v7005_v50 = vmul.f32 %v14689_v18, %v6749_v56  ;;  %v7006_v51 = vmul.f32 %v15078_v40, %v6750_v60  ;;  %v5494_v0 = vpop.f32.mrb[73].mxu0 }
 0x46b   :  { %v9770_v2 = vpop.f32.mrb[138].mxu1  ;;  %v7136_v47 = vadd.f32 %v7135_v24, %v7134_v30  ;;  %v15079_v33 = vunpack.c.l.bf16 %v13638_v62  ;;  %v6368_v29 = vadd.f32 %v12730_v52, %v4816_v38  ;;  %v6496_v37 = vrot.slane %v5494_v0, 1  ;;  %v9900_v32 = vpop.f32.mrb[74].mxu0  ;;  %v10939_v52 = vld [vmem:[%s14655_s0 + $0x218] sm:$0xff]  }
 0x46c   :  { %v4819_v31 = vpop.f32.mrb[139].mxu1  ;;  %v7137_v49 = vsel %vm517_vm1, %v7005_v50, 0.0  ;;  %v6498_v63 = vrot.slane %v9899_v61, 1  ;;  %v6371_v56 = vadd.f32 %v9770_v2, %v12734_v54  ;;  %v6499_v18 = vrot.slane %v9900_v32, 1  ;;  %v5497_v60 = vpop.f32.mrb[75].mxu0  ;;  %v13734_v32 = vld [vmem:[%s14656_s2 + $0x30] sm:$0xff]  }
 0x46d   :  { %v7007_v39 = vmul.f32 %v15079_v33, %v6751_v25  ;;  %v7138_v40 = vadd.f32 %v7137_v49, %v7136_v47  ;;  %v6736_v59 = vsel %vm6616_vm3, %v6495_v55, %v6496_v37  ;;  %v6369_v30 = vadd.f32 %v12742_v19, %v4819_v31  ;;  %v13721_v19 = vld [vmem:[%s14656_s2 + $0x38] sm:$0xff]   ;;  %v10940_v55 = vld [vmem:[%s14655_s0 + $0x220] sm:$0xff]   ;;  %15080 = vst [vmem:[#allocation91_spill] sm:$0xff] %v13734_v32 }
 0x46e   :  { %v6497_v24 = vrot.slane %v5497_v60, 1  ;;  %9876 = vmatmul.mubr.msk.bf16.gmra.mrb[244].mxu1 %vm517_vm1, %v10939_v52  ;;  %v7139_v50 = vsel %vm517_vm1, %v7006_v51, 0.0  ;;  %v6752_v25 = vadd.f32 %v6736_v59, %v6367_v26  ;;  %v6733_v54 = vsel %vm6616_vm3, %v6498_v63, %v6499_v18  ;;  %10006 = vmatmul.mubr.msk.bf16.gmra.mrb[180].mxu0 %vm517_vm1, %v10939_v52 }
 0x46f   :  { %v14690_v61 = vunpack.c.h.bf16 %v13687_v8  ;;  %9879 = vmatprep.mubr.msk.bf16.mxu1 %vm517_vm1, %v10940_v55  ;;  %v7140_v51 = vadd.f32 %v7139_v50, %v7138_v40  ;;  %v6755_v26 = vadd.f32 %v6733_v54, %v6370_v58  ;;  %10009 = vmatprep.mubr.msk.bf16.mxu0 %vm517_vm1, %v10940_v55  ;;  %v7141_v0 = vsel %vm517_vm1, %v7007_v39, 0.0 }
 0x470   :  { %v6734_v38 = vsel %vm6616_vm3, %v6497_v24, %v6498_v63  ;;  %v6735_v31 = vsel %vm6616_vm3, %v6496_v37, %v6497_v24  ;;  %v15081_v2 = vunpack.c.h.bf16 %v13638_v62  ;;  %v15082_v50 = vunpack.c.l.bf16 %v13687_v8 }
 0x471   :  { %v6753_v47 = vadd.f32 %v6735_v31, %v6368_v29  ;;  %v6754_v58 = vadd.f32 %v6734_v38, %v6369_v30  ;;  %v9773_v33 = vpop.f32.mrb[140].mxu1  ;;  %v7142_v49 = vadd.f32 %v7141_v0, %v7140_v51  ;;  %v9903_v60 = vpop.f32.mrb[76].mxu0 }
 0x472   :  { %v7008_v59 = vmul.f32 %v15081_v2, %v6752_v25  ;;  %v6374_v63 = vadd.f32 %v9773_v33, %v12774_v1  ;;  %v4832_v37 = vpop.f32.mrb[141].mxu1  ;;  %v5510_v29 = vpop.f32.mrb[77].mxu0  ;;  %v15083_v1 = vunpack.c.l.bf16 %v13674_v53  ;;  %v6502_v33 = vrot.slane %v9903_v60, 1 }
 0x473   :  { %v7009_v39 = vmul.f32 %v15082_v50, %v6753_v47  ;;  %v7010_v25 = vmul.f32 %v14690_v61, %v6754_v58  ;;  %v9774_v30 = vpop.f32.mrb[142].mxu1  ;;  %v6372_v38 = vadd.f32 %v12766_v36, %v4832_v37  ;;  %v6500_v31 = vrot.slane %v5510_v29, 1  ;;  %v9904_v0 = vpop.f32.mrb[78].mxu0  ;;  %v15084_v47 = vld [vmem:[#allocation13_spill] sm:$0xff]  ;;  %v10941_v36 = vld [vmem:[%s14655_s0 + $0x228] sm:$0xff]  }
 0x474   :  { %v7143_v52 = vsel %vm517_vm1, %v7008_v59, 0.0  ;;  %v7011_v51 = vmul.f32 %v15083_v1, %v6755_v26  ;;  %v4835_v2 = vpop.f32.mrb[143].mxu1  ;;  %v6375_v50 = vadd.f32 %v9774_v30, %v15084_v47  ;;  %v6503_v24 = vrot.slane %v9904_v0, 1  ;;  %v5513_v58 = vpop.f32.mrb[79].mxu0  ;;  %v10942_v29 = vld [vmem:[%s14655_s0 + $0x230] sm:$0xff]  }
 0x475   :  { %v7144_v55 = vadd.f32 %v7143_v52, %v7142_v49  ;;  %v7145_v59 = vsel %vm517_vm1, %v7009_v39, 0.0  ;;  %v6732_v54 = vsel %vm6616_vm3, %v6499_v18, %v6500_v31  ;;  %v15085_v49 = vld [vmem:[#allocation14_spill] sm:$0xff]  ;;  %v6501_v40 = vrot.slane %v5513_v58, 1  ;;  %v13769_v18 = vld [vmem:[%s14656_s2 + $0x48] sm:$0xff]  }
 0x476   :  { %v6373_v52 = vadd.f32 %v15085_v49, %v4835_v2  ;;  %9880 = vmatmul.mubr.msk.bf16.gmra.mrb[248].mxu1 %vm517_vm1, %v10941_v36  ;;  %v7147_v26 = vsel %vm517_vm1, %v7010_v25, 0.0  ;;  %v6756_v60 = vadd.f32 %v6732_v54, %v6371_v56  ;;  %v6729_v37 = vsel %vm6616_vm3, %v6502_v33, %v6503_v24  ;;  %10010 = vmatmul.mubr.msk.bf16.gmra.mrb[184].mxu0 %vm517_vm1, %v10941_v36 }
 0x477   :  { %v7146_v61 = vadd.f32 %v7145_v59, %v7144_v55  ;;  %v14693_v39 = vunpack.c.h.bf16 %v13734_v32  ;;  %9883 = vmatprep.mubr.msk.bf16.mxu1 %vm517_vm1, %v10942_v29  ;;  %v6759_v56 = vadd.f32 %v6729_v37, %v6374_v63  ;;  %v6730_v30 = vsel %vm6616_vm3, %v6501_v40, %v6502_v33  ;;  %v13782_v55 = vld [vmem:[%s14656_s2 + $0x40] sm:$0xff]   ;;  %10013 = vmatprep.mubr.msk.bf16.mxu0 %vm517_vm1, %v10942_v29  ;;  %v15087_v33 = vld [vmem:[#allocation17_spill] sm:$0xff] }
 0x478   :  { %v6731_v54 = vsel %vm6616_vm3, %v6500_v31, %v6501_v40  ;;  %v7149_v1 = vsel %vm517_vm1, %v7011_v51, 0.0  ;;  %v15086_v0 = vunpack.c.h.bf16 %v13674_v53  ;;  %v6758_v63 = vadd.f32 %v6730_v30, %v6373_v52 }
 0x479   :  { %v7148_v25 = vadd.f32 %v7147_v26, %v7146_v61  ;;  %v6757_v61 = vadd.f32 %v6731_v54, %v6372_v38  ;;  %v9777_v59 = vpop.f32.mrb[144].mxu1  ;;  %v9907_v49 = vpop.f32.mrb[80].mxu0  ;;  %v15088_v37 = vunpack.c.l.bf16 %v13734_v32  ;;  %v15089_v30 = vunpack.c.l.bf16 %v13721_v19 }
 0x47a   :  { %v7012_v2 = vmul.f32 %v15086_v0, %v6756_v60  ;;  %v6378_v58 = vadd.f32 %v9777_v59, %v15087_v33  ;;  %v4848_v40 = vpop.f32.mrb[145].mxu1  ;;  %v7014_v60 = vmul.f32 %v14693_v39, %v6758_v63  ;;  %v5526_v38 = vpop.f32.mrb[81].mxu0  ;;  %v6506_v31 = vrot.slane %v9907_v49, 1 }
 0x47b   :  { %v7150_v47 = vadd.f32 %v7149_v1, %v7148_v25  ;;  %v7013_v51 = vmul.f32 %v15088_v37, %v6757_v61  ;;  %v9778_v52 = vpop.f32.mrb[146].mxu1  ;;  %v7015_v54 = vmul.f32 %v15089_v30, %v6759_v56  ;;  %v15090_v1 = vld [vmem:[#allocation15_spill] sm:$0xff]  ;;  %v6504_v59 = vrot.slane %v5526_v38, 1  ;;  %v9908_v33 = vpop.f32.mrb[82].mxu0  ;;  %v15091_v61 = vld [vmem:[#allocation16_spill] sm:$0xff]  ;;  %v10943_v56 = vld [vmem:[%s14655_s0 + $0x238] sm:$0xff]  }
 0x47c   :  { %v7151_v26 = vsel %vm517_vm1, %v7012_v2, 0.0  ;;  %v6376_v0 = vadd.f32 %v15090_v1, %v4848_v40  ;;  %v4851_v36 = vpop.f32.mrb[147].mxu1  ;;  %v6379_v37 = vadd.f32 %v9778_v52, %v15091_v61  ;;  %v6507_v32 = vrot.slane %v9908_v33, 1  ;;  %v5529_v63 = vpop.f32.mrb[83].mxu0 }
 0x47d   :  { %v7152_v25 = vadd.f32 %v7151_v26, %v7150_v47  ;;  %v7153_v2 = vsel %vm517_vm1, %v7013_v51, 0.0  ;;  %v6728_v29 = vsel %vm6616_vm3, %v6503_v24, %v6504_v59  ;;  %v6377_v47 = vadd.f32 %v12810_v48, %v4851_v36  ;;  %v13817_v48 = vld [vmem:[%s14656_s2 + $0x58] sm:$0xff]  }
 0x47e   :  { %v6505_v26 = vrot.slane %v5529_v63, 1  ;;  %9884 = vmatmul.mubr.msk.bf16.gmra.mrb[252].mxu1 %vm517_vm1, %v10943_v56  ;;  %v7155_v40 = vsel %vm517_vm1, %v7014_v60, 0.0  ;;  %v6760_v49 = vadd.f32 %v6728_v29, %v6375_v50  ;;  %v6725_v51 = vsel %vm6616_vm3, %v6506_v31, %v6507_v32  ;;  %10014 = vmatmul.mubr.msk.bf16.gmra.mrb[188].mxu0 %vm517_vm1, %v10943_v56  ;;  %v13826_v60 = vld [vmem:[%s14656_s2 + $0x50] sm:$0xff]  }
 0x47f   :  { %v7154_v39 = vadd.f32 %v7153_v2, %v7152_v25  ;;  %v14694_v38 = vunpack.c.h.bf16 %v13782_v55  ;;  %v6763_v36 = vadd.f32 %v6725_v51, %v6378_v58  ;;  %v7157_v29 = vsel %vm517_vm1, %v7015_v54, 0.0 }
 0x480   :  { %v6726_v52 = vsel %vm6616_vm3, %v6505_v26, %v6506_v31  ;;  %v6727_v50 = vsel %vm6616_vm3, %v6504_v59, %v6505_v26  ;;  %v15092_v25 = vunpack.c.h.bf16 %v13721_v19  ;;  %v15093_v56 = vunpack.c.l.bf16 %v13782_v55 }
 0x481   :  { %v7156_v24 = vadd.f32 %v7155_v40, %v7154_v39  ;;  %v6761_v1 = vadd.f32 %v6727_v50, %v6376_v0  ;;  %v6762_v33 = vadd.f32 %v6726_v52, %v6377_v47  ;;  %v9781_v39 = vpop.f32.mrb[148].mxu1  ;;  %v9911_v31 = vpop.f32.mrb[84].mxu0  ;;  %v15095_v52 = vld [vmem:[#allocation18_spill] sm:$0xff] }
 0x482   :  { %v7016_v30 = vmul.f32 %v15092_v25, %v6760_v49  ;;  %v6382_v2 = vadd.f32 %v9781_v39, %v12834_v34  ;;  %v4864_v61 = vpop.f32.mrb[149].mxu1  ;;  %v5542_v0 = vpop.f32.mrb[85].mxu0  ;;  %v15094_v34 = vunpack.c.l.bf16 %v13769_v18  ;;  %v6510_v63 = vrot.slane %v9911_v31, 1  ;;  %v13855_v31 = vld [vmem:[%s14656_s2 + $0x68] sm:$0xff]  }
 0x483   :  { %v7158_v58 = vadd.f32 %v7157_v29, %v7156_v24  ;;  %v7017_v54 = vmul.f32 %v15093_v56, %v6761_v1  ;;  %v7018_v40 = vmul.f32 %v14694_v38, %v6762_v33  ;;  %v9782_v47 = vpop.f32.mrb[150].mxu1  ;;  %v6380_v50 = vadd.f32 %v15095_v52, %v4864_v61  ;;  %v9912_v25 = vpop.f32.mrb[86].mxu0  ;;  %v15096_v1 = vld [vmem:[#allocation19_spill] sm:$0xff] }
 0x484   :  { %v7159_v26 = vsel %vm517_vm1, %v7016_v30, 0.0  ;;  %v7019_v24 = vmul.f32 %v15094_v34, %v6763_v36  ;;  %v6508_v29 = vrot.slane %v5542_v0, 1  ;;  %v4867_v39 = vpop.f32.mrb[151].mxu1  ;;  %v6383_v56 = vadd.f32 %v9782_v47, %v15096_v1  ;;  %v5545_v33 = vpop.f32.mrb[87].mxu0 }
 0x485   :  { %v7160_v51 = vadd.f32 %v7159_v26, %v7158_v58  ;;  %v7161_v30 = vsel %vm517_vm1, %v7017_v54, 0.0  ;;  %v6511_v59 = vrot.slane %v9912_v25, 1  ;;  %v6381_v58 = vadd.f32 %v12838_v41, %v4867_v39 }
 0x486   :  { %v6724_v49 = vsel %vm6616_vm3, %v6507_v32, %v6508_v29  ;;  %v6509_v26 = vrot.slane %v5545_v33, 1  ;;  %v7163_v36 = vsel %vm517_vm1, %v7018_v40, 0.0  ;;  %v14695_v54 = vunpack.c.h.bf16 %v13826_v60 }
 0x487   :  { %v7162_v38 = vadd.f32 %v7161_v30, %v7160_v51  ;;  %v6764_v61 = vadd.f32 %v6724_v49, %v6379_v37  ;;  %v6721_v0 = vsel %vm6616_vm3, %v6510_v63, %v6511_v59  ;;  %v13864_v37 = vld [vmem:[%s14656_s2 + $0x60] sm:$0xff]   ;;  %v7165_v40 = vsel %vm517_vm1, %v7019_v24, 0.0 }
 0x488   :  { %v6767_v51 = vadd.f32 %v6721_v0, %v6382_v2  ;;  %v6722_v32 = vsel %vm6616_vm3, %v6509_v26, %v6510_v63  ;;  %v6723_v41 = vsel %vm6616_vm3, %v6508_v29, %v6509_v26  ;;  %v15097_v49 = vunpack.c.h.bf16 %v13769_v18 }
 0x489   :  { %v7164_v47 = vadd.f32 %v7163_v36, %v7162_v38  ;;  %v6765_v52 = vadd.f32 %v6723_v41, %v6380_v50  ;;  %v6766_v25 = vadd.f32 %v6722_v32, %v6381_v58  ;;  %v9785_v38 = vpop.f32.mrb[152].mxu1  ;;  %v9915_v63 = vpop.f32.mrb[88].mxu0  ;;  %v15098_v26 = vunpack.c.l.bf16 %v13826_v60  ;;  %v15100_v32 = vld [vmem:[#allocation20_spill] sm:$0xff] }
 0x48a   :  { %v7020_v34 = vmul.f32 %v15097_v49, %v6764_v61  ;;  %v6386_v39 = vadd.f32 %v9785_v38, %v12862_v46  ;;  %v4880_v30 = vpop.f32.mrb[153].mxu1  ;;  %v5558_v50 = vpop.f32.mrb[89].mxu0  ;;  %v15099_v46 = vunpack.c.l.bf16 %v13817_v48  ;;  %v6514_v1 = vrot.slane %v9915_v63, 1  ;;  %v13893_v63 = vld [vmem:[%s14656_s2 + $0x78] sm:$0xff]  }
 0x48b   :  { %v7166_v2 = vadd.f32 %v7165_v40, %v7164_v47  ;;  %v7021_v24 = vmul.f32 %v15098_v26, %v6765_v52  ;;  %v7022_v36 = vmul.f32 %v14695_v54, %v6766_v25  ;;  %v9786_v58 = vpop.f32.mrb[154].mxu1  ;;  %v6384_v41 = vadd.f32 %v15100_v32, %v4880_v30  ;;  %v9916_v49 = vpop.f32.mrb[90].mxu0  ;;  %v15101_v52 = vld [vmem:[#allocation21_spill] sm:$0xff] }
 0x48c   :  { %v7167_v33 = vsel %vm517_vm1, %v7020_v34, 0.0  ;;  %v7023_v47 = vmul.f32 %v15099_v46, %v6767_v51  ;;  %v6512_v40 = vrot.slane %v5558_v50, 1  ;;  %v4883_v38 = vpop.f32.mrb[155].mxu1  ;;  %v6387_v26 = vadd.f32 %v9786_v58, %v15101_v52  ;;  %v5561_v25 = vpop.f32.mrb[91].mxu0 }
 0x48d   :  { %v7168_v0 = vadd.f32 %v7167_v33, %v7166_v2  ;;  %v7169_v34 = vsel %vm517_vm1, %v7021_v24, 0.0  ;;  %v6515_v29 = vrot.slane %v9916_v49, 1  ;;  %v6385_v2 = vadd.f32 %v12866_v28, %v4883_v38 }
 0x48e   :  { %v6720_v61 = vsel %vm6616_vm3, %v6511_v59, %v6512_v40  ;;  %v6513_v33 = vrot.slane %v5561_v25, 1  ;;  %v7171_v51 = vsel %vm517_vm1, %v7022_v36, 0.0  ;;  %v14696_v24 = vunpack.c.h.bf16 %v13864_v37 }
 0x48f   :  { %v7170_v54 = vadd.f32 %v7169_v34, %v7168_v0  ;;  %v6768_v30 = vadd.f32 %v6720_v61, %v6383_v56  ;;  %v6717_v50 = vsel %vm6616_vm3, %v6514_v1, %v6515_v29  ;;  %v13902_v56 = vld [vmem:[%s14656_s2 + $0x70] sm:$0xff]   ;;  %v7173_v36 = vsel %vm517_vm1, %v7023_v47, 0.0 }
 0x490   :  { %v6771_v0 = vadd.f32 %v6717_v50, %v6386_v39  ;;  %v6718_v59 = vsel %vm6616_vm3, %v6513_v33, %v6514_v1  ;;  %v6719_v28 = vsel %vm6616_vm3, %v6512_v40, %v6513_v33  ;;  %v15102_v61 = vunpack.c.h.bf16 %v13817_v48 }
 0x491   :  { %v7172_v58 = vadd.f32 %v7171_v51, %v7170_v54  ;;  %v6769_v32 = vadd.f32 %v6719_v28, %v6384_v41  ;;  %v6770_v49 = vadd.f32 %v6718_v59, %v6385_v2  ;;  %v9789_v54 = vpop.f32.mrb[156].mxu1  ;;  %v9919_v1 = vpop.f32.mrb[92].mxu0  ;;  %v15103_v33 = vunpack.c.l.bf16 %v13864_v37  ;;  %v15105_v59 = vld [vmem:[#allocation22_spill] sm:$0xff] }
 0x492   :  { %v7024_v46 = vmul.f32 %v15102_v61, %v6768_v30  ;;  %v6390_v38 = vadd.f32 %v9789_v54, %v12890_v3  ;;  %v4896_v34 = vpop.f32.mrb[157].mxu1  ;;  %v5574_v41 = vpop.f32.mrb[93].mxu0  ;;  %v15104_v3 = vunpack.c.l.bf16 %v13855_v31  ;;  %v6518_v52 = vrot.slane %v9919_v1, 1  ;;  %v13931_v1 = vld [vmem:[%s14656_s2 + $0x88] sm:$0xff]  }
 0x493   :  { %v7174_v39 = vadd.f32 %v7173_v36, %v7172_v58  ;;  %v7025_v47 = vmul.f32 %v15103_v33, %v6769_v32  ;;  %v7026_v51 = vmul.f32 %v14696_v24, %v6770_v49  ;;  %v9790_v2 = vpop.f32.mrb[158].mxu1  ;;  %v6388_v28 = vadd.f32 %v15105_v59, %v4896_v34  ;;  %v9920_v61 = vpop.f32.mrb[94].mxu0  ;;  %v15106_v32 = vld [vmem:[#allocation23_spill] sm:$0xff] }
 0x494   :  { %v7175_v25 = vsel %vm517_vm1, %v7024_v46, 0.0  ;;  %v7027_v58 = vmul.f32 %v15104_v3, %v6771_v0  ;;  %v6516_v36 = vrot.slane %v5574_v41, 1  ;;  %v4899_v54 = vpop.f32.mrb[159].mxu1  ;;  %v6391_v33 = vadd.f32 %v9790_v2, %v15106_v32  ;;  %v5577_v49 = vpop.f32.mrb[95].mxu0 }
 0x495   :  { %v7176_v50 = vadd.f32 %v7175_v25, %v7174_v39  ;;  %v7177_v46 = vsel %vm517_vm1, %v7025_v47, 0.0  ;;  %v6519_v40 = vrot.slane %v9920_v61, 1  ;;  %v6389_v39 = vadd.f32 %v12894_v27, %v4899_v54 }
 0x496   :  { %v6716_v30 = vsel %vm6616_vm3, %v6515_v29, %v6516_v36  ;;  %v6517_v25 = vrot.slane %v5577_v49, 1  ;;  %v7179_v0 = vsel %vm517_vm1, %v7026_v51, 0.0  ;;  %v14697_v47 = vunpack.c.h.bf16 %v13902_v56 }
 0x497   :  { %v7178_v24 = vadd.f32 %v7177_v46, %v7176_v50  ;;  %v6772_v34 = vadd.f32 %v6716_v30, %v6387_v26  ;;  %v6713_v41 = vsel %vm6616_vm3, %v6518_v52, %v6519_v40  ;;  %v13940_v26 = vld [vmem:[%s14656_s2 + $0x80] sm:$0xff]   ;;  %v7181_v51 = vsel %vm517_vm1, %v7027_v58, 0.0 }
 0x498   :  { %v6775_v50 = vadd.f32 %v6713_v41, %v6390_v38  ;;  %v6714_v29 = vsel %vm6616_vm3, %v6517_v25, %v6518_v52  ;;  %v6715_v27 = vsel %vm6616_vm3, %v6516_v36, %v6517_v25  ;;  %v15107_v30 = vunpack.c.h.bf16 %v13855_v31 }
 0x499   :  { %v7180_v2 = vadd.f32 %v7179_v0, %v7178_v24  ;;  %v6773_v59 = vadd.f32 %v6715_v27, %v6388_v28  ;;  %v6774_v61 = vadd.f32 %v6714_v29, %v6389_v39  ;;  %v9793_v24 = vpop.f32.mrb[160].mxu1  ;;  %v9923_v52 = vpop.f32.mrb[96].mxu0  ;;  %v15108_v25 = vunpack.c.l.bf16 %v13902_v56  ;;  %v15110_v29 = vld [vmem:[#allocation24_spill] sm:$0xff] }
 0x49a   :  { %v7028_v3 = vmul.f32 %v15107_v30, %v6772_v34  ;;  %v6394_v54 = vadd.f32 %v9793_v24, %v12918_v35  ;;  %v4912_v46 = vpop.f32.mrb[161].mxu1  ;;  %v5590_v28 = vpop.f32.mrb[97].mxu0  ;;  %v15109_v35 = vunpack.c.l.bf16 %v13893_v63  ;;  %v6522_v32 = vrot.slane %v9923_v52, 1  ;;  %v13969_v52 = vld [vmem:[%s14656_s2 + $0x98] sm:$0xff]  }
 0x49b   :  { %v7182_v38 = vadd.f32 %v7181_v51, %v7180_v2  ;;  %v7029_v58 = vmul.f32 %v15108_v25, %v6773_v59  ;;  %v7030_v0 = vmul.f32 %v14697_v47, %v6774_v61  ;;  %v9794_v39 = vpop.f32.mrb[162].mxu1  ;;  %v6392_v27 = vadd.f32 %v15110_v29, %v4912_v46  ;;  %v9924_v30 = vpop.f32.mrb[98].mxu0  ;;  %v15111_v59 = vld [vmem:[#allocation25_spill] sm:$0xff] }
 0x49c   :  { %v7183_v49 = vsel %vm517_vm1, %v7028_v3, 0.0  ;;  %v7031_v2 = vmul.f32 %v15109_v35, %v6775_v50  ;;  %v6520_v51 = vrot.slane %v5590_v28, 1  ;;  %v4915_v24 = vpop.f32.mrb[163].mxu1  ;;  %v6395_v25 = vadd.f32 %v9794_v39, %v15111_v59  ;;  %v5593_v61 = vpop.f32.mrb[99].mxu0 }
 0x49d   :  { %v7184_v41 = vadd.f32 %v7183_v49, %v7182_v38  ;;  %v7185_v3 = vsel %vm517_vm1, %v7029_v58, 0.0  ;;  %v6523_v36 = vrot.slane %v9924_v30, 1  ;;  %v6393_v38 = vadd.f32 %v12922_v9, %v4915_v24 }
 0x49e   :  { %v6712_v34 = vsel %vm6616_vm3, %v6519_v40, %v6520_v51  ;;  %v6521_v49 = vrot.slane %v5593_v61, 1  ;;  %v7187_v50 = vsel %vm517_vm1, %v7030_v0, 0.0  ;;  %v14698_v58 = vunpack.c.h.bf16 %v13940_v26 }
 0x49f   :  { %v7186_v47 = vadd.f32 %v7185_v3, %v7184_v41  ;;  %v6776_v46 = vadd.f32 %v6712_v34, %v6391_v33  ;;  %v6709_v28 = vsel %vm6616_vm3, %v6522_v32, %v6523_v36  ;;  %v13978_v33 = vld [vmem:[%s14656_s2 + $0x90] sm:$0xff]   ;;  %v7189_v0 = vsel %vm517_vm1, %v7031_v2, 0.0 }
 0x4a0   :  { %v6779_v41 = vadd.f32 %v6709_v28, %v6394_v54  ;;  %v6710_v40 = vsel %vm6616_vm3, %v6521_v49, %v6522_v32  ;;  %v6711_v9 = vsel %vm6616_vm3, %v6520_v51, %v6521_v49  ;;  %v15112_v34 = vunpack.c.h.bf16 %v13893_v63 }
 0x4a1   :  { %v7188_v39 = vadd.f32 %v7187_v50, %v7186_v47  ;;  %v6777_v29 = vadd.f32 %v6711_v9, %v6392_v27  ;;  %v6778_v30 = vadd.f32 %v6710_v40, %v6393_v38  ;;  %v9797_v47 = vpop.f32.mrb[164].mxu1  ;;  %v9927_v32 = vpop.f32.mrb[100].mxu0  ;;  %v15113_v49 = vunpack.c.l.bf16 %v13940_v26  ;;  %v15115_v40 = vld [vmem:[#allocation26_spill] sm:$0xff] }
 0x4a2   :  { %v7032_v35 = vmul.f32 %v15112_v34, %v6776_v46  ;;  %v6398_v24 = vadd.f32 %v9797_v47, %v12946_v45  ;;  %v4928_v3 = vpop.f32.mrb[165].mxu1  ;;  %v5606_v27 = vpop.f32.mrb[101].mxu0  ;;  %v15114_v45 = vunpack.c.l.bf16 %v13931_v1  ;;  %v6526_v59 = vrot.slane %v9927_v32, 1  ;;  %v14007_v32 = vld [vmem:[%s14656_s2 + $0xa8] sm:$0xff]  }
 0x4a3   :  { %v7190_v54 = vadd.f32 %v7189_v0, %v7188_v39  ;;  %v7033_v2 = vmul.f32 %v15113_v49, %v6777_v29  ;;  %v7034_v50 = vmul.f32 %v14698_v58, %v6778_v30  ;;  %v9798_v38 = vpop.f32.mrb[166].mxu1  ;;  %v6396_v9 = vadd.f32 %v15115_v40, %v4928_v3  ;;  %v9928_v34 = vpop.f32.mrb[102].mxu0  ;;  %v15116_v29 = vld [vmem:[#allocation27_spill] sm:$0xff] }
 0x4a4   :  { %v7191_v61 = vsel %vm517_vm1, %v7032_v35, 0.0  ;;  %v7035_v39 = vmul.f32 %v15114_v45, %v6779_v41  ;;  %v6524_v0 = vrot.slane %v5606_v27, 1  ;;  %v4931_v47 = vpop.f32.mrb[167].mxu1  ;;  %v6399_v49 = vadd.f32 %v9798_v38, %v15116_v29  ;;  %v5609_v30 = vpop.f32.mrb[103].mxu0 }
 0x4a5   :  { %v7192_v28 = vadd.f32 %v7191_v61, %v7190_v54  ;;  %v7193_v35 = vsel %vm517_vm1, %v7033_v2, 0.0  ;;  %v6527_v51 = vrot.slane %v9928_v34, 1  ;;  %v6397_v54 = vadd.f32 %v12950_v22, %v4931_v47 }
 0x4a6   :  { %v6708_v46 = vsel %vm6616_vm3, %v6523_v36, %v6524_v0  ;;  %v6525_v61 = vrot.slane %v5609_v30, 1  ;;  %v7195_v41 = vsel %vm517_vm1, %v7034_v50, 0.0  ;;  %v14699_v2 = vunpack.c.h.bf16 %v13978_v33 }
 0x4a7   :  { %v7194_v58 = vadd.f32 %v7193_v35, %v7192_v28  ;;  %v6780_v3 = vadd.f32 %v6708_v46, %v6395_v25  ;;  %v6705_v27 = vsel %vm6616_vm3, %v6526_v59, %v6527_v51  ;;  %v14016_v25 = vld [vmem:[%s14656_s2 + $0xa0] sm:$0xff]   ;;  %v7197_v50 = vsel %vm517_vm1, %v7035_v39, 0.0 }
 0x4a8   :  { %v6783_v28 = vadd.f32 %v6705_v27, %v6398_v24  ;;  %v6706_v36 = vsel %vm6616_vm3, %v6525_v61, %v6526_v59  ;;  %v6707_v22 = vsel %vm6616_vm3, %v6524_v0, %v6525_v61  ;;  %v15117_v46 = vunpack.c.h.bf16 %v13931_v1 }
 0x4a9   :  { %v7196_v38 = vadd.f32 %v7195_v41, %v7194_v58  ;;  %v6781_v40 = vadd.f32 %v6707_v22, %v6396_v9  ;;  %v6782_v34 = vadd.f32 %v6706_v36, %v6397_v54  ;;  %v9801_v58 = vpop.f32.mrb[168].mxu1  ;;  %v9931_v59 = vpop.f32.mrb[104].mxu0  ;;  %v15118_v61 = vunpack.c.l.bf16 %v13978_v33  ;;  %v15120_v36 = vld [vmem:[#allocation28_spill] sm:$0xff] }
 0x4aa   :  { %v7036_v45 = vmul.f32 %v15117_v46, %v6780_v3  ;;  %v6402_v47 = vadd.f32 %v9801_v58, %v12974_v23  ;;  %v4944_v35 = vpop.f32.mrb[169].mxu1  ;;  %v5622_v9 = vpop.f32.mrb[105].mxu0  ;;  %v15119_v23 = vunpack.c.l.bf16 %v13969_v52  ;;  %v6530_v29 = vrot.slane %v9931_v59, 1  ;;  %v14045_v59 = vld [vmem:[%s14656_s2 + $0xb8] sm:$0xff]  }
 0x4ab   :  { %v7198_v24 = vadd.f32 %v7197_v50, %v7196_v38  ;;  %v7037_v39 = vmul.f32 %v15118_v61, %v6781_v40  ;;  %v7038_v41 = vmul.f32 %v14699_v2, %v6782_v34  ;;  %v9802_v54 = vpop.f32.mrb[170].mxu1  ;;  %v6400_v22 = vadd.f32 %v15120_v36, %v4944_v35  ;;  %v9932_v46 = vpop.f32.mrb[106].mxu0  ;;  %v15121_v40 = vld [vmem:[#allocation29_spill] sm:$0xff] }
 0x4ac   :  { %v7199_v30 = vsel %vm517_vm1, %v7036_v45, 0.0  ;;  %v7039_v38 = vmul.f32 %v15119_v23, %v6783_v28  ;;  %v6528_v50 = vrot.slane %v5622_v9, 1  ;;  %v4947_v58 = vpop.f32.mrb[171].mxu1  ;;  %v6403_v61 = vadd.f32 %v9802_v54, %v15121_v40  ;;  %v5625_v34 = vpop.f32.mrb[107].mxu0 }
 0x4ad   :  { %v7200_v27 = vadd.f32 %v7199_v30, %v7198_v24  ;;  %v7201_v45 = vsel %vm517_vm1, %v7037_v39, 0.0  ;;  %v6531_v0 = vrot.slane %v9932_v46, 1  ;;  %v6401_v24 = vadd.f32 %v12978_v20, %v4947_v58 }
 0x4ae   :  { %v6704_v3 = vsel %vm6616_vm3, %v6527_v51, %v6528_v50  ;;  %v6529_v30 = vrot.slane %v5625_v34, 1  ;;  %v7203_v28 = vsel %vm517_vm1, %v7038_v41, 0.0  ;;  %v14700_v39 = vunpack.c.h.bf16 %v14016_v25 }
 0x4af   :  { %v7202_v2 = vadd.f32 %v7201_v45, %v7200_v27  ;;  %v6784_v35 = vadd.f32 %v6704_v3, %v6399_v49  ;;  %v6701_v9 = vsel %vm6616_vm3, %v6530_v29, %v6531_v0  ;;  %v14054_v49 = vld [vmem:[%s14656_s2 + $0xb0] sm:$0xff]   ;;  %v7205_v41 = vsel %vm517_vm1, %v7039_v38, 0.0 }
 0x4b0   :  { %v6787_v27 = vadd.f32 %v6701_v9, %v6402_v47  ;;  %v6702_v51 = vsel %vm6616_vm3, %v6529_v30, %v6530_v29  ;;  %v6703_v20 = vsel %vm6616_vm3, %v6528_v50, %v6529_v30  ;;  %v15122_v3 = vunpack.c.h.bf16 %v13969_v52 }
 0x4b1   :  { %v7204_v54 = vadd.f32 %v7203_v28, %v7202_v2  ;;  %v6785_v36 = vadd.f32 %v6703_v20, %v6400_v22  ;;  %v6786_v46 = vadd.f32 %v6702_v51, %v6401_v24  ;;  %v9805_v2 = vpop.f32.mrb[172].mxu1  ;;  %v9935_v29 = vpop.f32.mrb[108].mxu0  ;;  %v15123_v30 = vunpack.c.l.bf16 %v14016_v25  ;;  %v15125_v51 = vld [vmem:[#allocation30_spill] sm:$0xff] }
 0x4b2   :  { %v7040_v23 = vmul.f32 %v15122_v3, %v6784_v35  ;;  %v6406_v58 = vadd.f32 %v9805_v2, %v13002_v21  ;;  %v4960_v45 = vpop.f32.mrb[173].mxu1  ;;  %v5638_v22 = vpop.f32.mrb[109].mxu0  ;;  %v15124_v21 = vunpack.c.l.bf16 %v14007_v32  ;;  %v6534_v40 = vrot.slane %v9935_v29, 1  ;;  %v14083_v29 = vld [vmem:[%s14656_s2 + $0xc8] sm:$0xff]  }
 0x4b3   :  { %v7206_v47 = vadd.f32 %v7205_v41, %v7204_v54  ;;  %v7041_v38 = vmul.f32 %v15123_v30, %v6785_v36  ;;  %v7042_v28 = vmul.f32 %v14700_v39, %v6786_v46  ;;  %v9806_v24 = vpop.f32.mrb[174].mxu1  ;;  %v6404_v20 = vadd.f32 %v15125_v51, %v4960_v45  ;;  %v9936_v3 = vpop.f32.mrb[110].mxu0  ;;  %v15126_v36 = vld [vmem:[#allocation31_spill] sm:$0xff] }
 0x4b4   :  { %v7207_v34 = vsel %vm517_vm1, %v7040_v23, 0.0  ;;  %v7043_v54 = vmul.f32 %v15124_v21, %v6787_v27  ;;  %v6532_v41 = vrot.slane %v5638_v22, 1  ;;  %v4963_v2 = vpop.f32.mrb[175].mxu1  ;;  %v6407_v30 = vadd.f32 %v9806_v24, %v15126_v36  ;;  %v5641_v46 = vpop.f32.mrb[111].mxu0 }
 0x4b5   :  { %v7208_v9 = vadd.f32 %v7207_v34, %v7206_v47  ;;  %v7209_v23 = vsel %vm517_vm1, %v7041_v38, 0.0  ;;  %v6535_v50 = vrot.slane %v9936_v3, 1  ;;  %v6405_v47 = vadd.f32 %v13006_v15, %v4963_v2 }
 0x4b6   :  { %v6700_v35 = vsel %vm6616_vm3, %v6531_v0, %v6532_v41  ;;  %v6533_v34 = vrot.slane %v5641_v46, 1  ;;  %v7211_v27 = vsel %vm517_vm1, %v7042_v28, 0.0  ;;  %v14701_v38 = vunpack.c.h.bf16 %v14054_v49 }
 0x4b7   :  { %v7210_v39 = vadd.f32 %v7209_v23, %v7208_v9  ;;  %v6788_v45 = vadd.f32 %v6700_v35, %v6403_v61  ;;  %v6697_v22 = vsel %vm6616_vm3, %v6534_v40, %v6535_v50  ;;  %v14092_v61 = vld [vmem:[%s14656_s2 + $0xc0] sm:$0xff]   ;;  %v7213_v28 = vsel %vm517_vm1, %v7043_v54, 0.0 }
 0x4b8   :  { %v6791_v9 = vadd.f32 %v6697_v22, %v6406_v58  ;;  %v6698_v0 = vsel %vm6616_vm3, %v6533_v34, %v6534_v40  ;;  %v6699_v15 = vsel %vm6616_vm3, %v6532_v41, %v6533_v34  ;;  %v15127_v35 = vunpack.c.h.bf16 %v14007_v32 }
 0x4b9   :  { %v7212_v24 = vadd.f32 %v7211_v27, %v7210_v39  ;;  %v6789_v51 = vadd.f32 %v6699_v15, %v6404_v20  ;;  %v6790_v3 = vadd.f32 %v6698_v0, %v6405_v47  ;;  %v9809_v39 = vpop.f32.mrb[176].mxu1  ;;  %v9939_v40 = vpop.f32.mrb[112].mxu0  ;;  %v15128_v34 = vunpack.c.l.bf16 %v14054_v49  ;;  %v15130_v0 = vld [vmem:[#allocation32_spill] sm:$0xff] }
 0x4ba   :  { %v7044_v21 = vmul.f32 %v15127_v35, %v6788_v45  ;;  %v6410_v2 = vadd.f32 %v9809_v39, %v13030_v16  ;;  %v4976_v23 = vpop.f32.mrb[177].mxu1  ;;  %v5654_v20 = vpop.f32.mrb[113].mxu0  ;;  %v15129_v16 = vunpack.c.l.bf16 %v14045_v59  ;;  %v6538_v36 = vrot.slane %v9939_v40, 1  ;;  %v14121_v40 = vld [vmem:[%s14656_s2 + $0xd8] sm:$0xff]  }
 0x4bb   :  { %v7214_v58 = vadd.f32 %v7213_v28, %v7212_v24  ;;  %v7045_v54 = vmul.f32 %v15128_v34, %v6789_v51  ;;  %v7046_v27 = vmul.f32 %v14701_v38, %v6790_v3  ;;  %v9810_v47 = vpop.f32.mrb[178].mxu1  ;;  %v6408_v15 = vadd.f32 %v15130_v0, %v4976_v23  ;;  %v9940_v35 = vpop.f32.mrb[114].mxu0  ;;  %v15131_v51 = vld [vmem:[#allocation33_spill] sm:$0xff] }
 0x4bc   :  { %v7215_v46 = vsel %vm517_vm1, %v7044_v21, 0.0  ;;  %v7047_v24 = vmul.f32 %v15129_v16, %v6791_v9  ;;  %v6536_v28 = vrot.slane %v5654_v20, 1  ;;  %v4979_v39 = vpop.f32.mrb[179].mxu1  ;;  %v6411_v34 = vadd.f32 %v9810_v47, %v15131_v51  ;;  %v5657_v3 = vpop.f32.mrb[115].mxu0 }
 0x4bd   :  { %v7216_v22 = vadd.f32 %v7215_v46, %v7214_v58  ;;  %v7217_v21 = vsel %vm517_vm1, %v7045_v54, 0.0  ;;  %v6539_v41 = vrot.slane %v9940_v35, 1  ;;  %v6409_v58 = vadd.f32 %v13034_v13, %v4979_v39 }
 0x4be   :  { %v6696_v45 = vsel %vm6616_vm3, %v6535_v50, %v6536_v28  ;;  %v6537_v46 = vrot.slane %v5657_v3, 1  ;;  %v7219_v9 = vsel %vm517_vm1, %v7046_v27, 0.0  ;;  %v14702_v54 = vunpack.c.h.bf16 %v14092_v61 }
 0x4bf   :  { %v7218_v38 = vadd.f32 %v7217_v21, %v7216_v22  ;;  %v6792_v23 = vadd.f32 %v6696_v45, %v6407_v30  ;;  %v6693_v20 = vsel %vm6616_vm3, %v6538_v36, %v6539_v41  ;;  %v14130_v30 = vld [vmem:[%s14656_s2 + $0xd0] sm:$0xff]   ;;  %v7221_v27 = vsel %vm517_vm1, %v7047_v24, 0.0 }
 0x4c0   :  { %v6795_v22 = vadd.f32 %v6693_v20, %v6410_v2  ;;  %v6694_v50 = vsel %vm6616_vm3, %v6537_v46, %v6538_v36  ;;  %v6695_v13 = vsel %vm6616_vm3, %v6536_v28, %v6537_v46  ;;  %v15132_v45 = vunpack.c.h.bf16 %v14045_v59 }
 0x4c1   :  { %v7220_v47 = vadd.f32 %v7219_v9, %v7218_v38  ;;  %v6793_v0 = vadd.f32 %v6695_v13, %v6408_v15  ;;  %v6794_v35 = vadd.f32 %v6694_v50, %v6409_v58  ;;  %v9813_v38 = vpop.f32.mrb[180].mxu1  ;;  %v9943_v36 = vpop.f32.mrb[116].mxu0  ;;  %v14703_v28 = vunpack.c.h.bf16 %v14083_v29 }
 0x4c2   :  { %v7048_v16 = vmul.f32 %v15132_v45, %v6792_v23  ;;  %v6414_v39 = vadd.f32 %v9813_v38, %v13058_v14  ;;  %v4992_v21 = vpop.f32.mrb[181].mxu1  ;;  %v15133_v46 = vunpack.c.l.bf16 %v14092_v61  ;;  %v5670_v15 = vpop.f32.mrb[117].mxu0  ;;  %v15134_v14 = vunpack.c.l.bf16 %v14083_v29 }
 0x4c3   :  { %v7222_v2 = vadd.f32 %v7221_v27, %v7220_v47  ;;  %v7050_v9 = vmul.f32 %v14702_v54, %v6794_v35  ;;  %v9814_v58 = vpop.f32.mrb[182].mxu1  ;;  %v6412_v50 = vadd.f32 %v13050_v4, %v4992_v21  ;;  %v6540_v13 = vrot.slane %v5670_v15, 1  ;;  %v9944_v27 = vpop.f32.mrb[118].mxu0 }
 0x4c4   :  { %v7223_v3 = vsel %vm517_vm1, %v7048_v16, 0.0  ;;  %v7049_v24 = vmul.f32 %v15133_v46, %v6793_v0  ;;  %v7051_v47 = vmul.f32 %v15134_v14, %v6795_v22  ;;  %v4995_v45 = vpop.f32.mrb[183].mxu1  ;;  %v6542_v38 = vrot.slane %v9943_v36, 1  ;;  %v15135_v0 = vld [vmem:[#allocation34_spill] sm:$0xff]  ;;  %v5673_v35 = vpop.f32.mrb[119].mxu0  ;;  %v14159_v36 = vld [vmem:[%s14656_s2 + $0xe8] sm:$0xff]  }
 0x4c5   :  { %v7224_v20 = vadd.f32 %v7223_v3, %v7222_v2  ;;  %v6415_v46 = vadd.f32 %v9814_v58, %v15135_v0  ;;  %v6543_v51 = vrot.slane %v9944_v27, 1  ;;  %v6692_v23 = vsel %vm6616_vm3, %v6539_v41, %v6540_v13 }
 0x4c6   :  { %v7225_v16 = vsel %vm517_vm1, %v7049_v24, 0.0  ;;  %v6413_v2 = vadd.f32 %v13062_v7, %v4995_v45  ;;  %v6541_v3 = vrot.slane %v5673_v35, 1  ;;  %v7227_v22 = vsel %vm517_vm1, %v7050_v9, 0.0 }
 0x4c7   :  { %v7226_v54 = vadd.f32 %v7225_v16, %v7224_v20  ;;  %v6796_v4 = vadd.f32 %v6692_v23, %v6411_v34  ;;  %v6689_v21 = vsel %vm6616_vm3, %v6542_v38, %v6543_v51  ;;  %v14704_v24 = vunpack.c.h.bf16 %v14130_v30  ;;  %v14168_v34 = vld [vmem:[%s14656_s2 + $0xe0] sm:$0xff]  }
 0x4c8   :  { %v6799_v58 = vadd.f32 %v6689_v21, %v6414_v39  ;;  %v6690_v41 = vsel %vm6616_vm3, %v6541_v3, %v6542_v38  ;;  %v6691_v7 = vsel %vm6616_vm3, %v6540_v13, %v6541_v3  ;;  %v7229_v9 = vsel %vm517_vm1, %v7051_v47, 0.0 }
 0x4c9   :  { %v7228_v15 = vadd.f32 %v7227_v22, %v7226_v54  ;;  %v7052_v23 = vmul.f32 %v14703_v28, %v6796_v4  ;;  %v6797_v20 = vadd.f32 %v6691_v7, %v6412_v50  ;;  %v6798_v14 = vadd.f32 %v6690_v41, %v6413_v2  ;;  %v9817_v54 = vpop.f32.mrb[184].mxu1  ;;  %v9947_v45 = vpop.f32.mrb[120].mxu0 }
 0x4ca   :  { %v6418_v27 = vadd.f32 %v9817_v54, %v13086_v42  ;;  %v5008_v16 = vpop.f32.mrb[185].mxu1  ;;  %v14706_v13 = vunpack.c.h.bf16 %v14121_v40  ;;  %v15136_v35 = vunpack.c.l.bf16 %v14130_v30  ;;  %v5686_v50 = vpop.f32.mrb[121].mxu0  ;;  %v14705_v22 = vunpack.c.l.bf16 %v14168_v34 }
 0x4cb   :  { %v7230_v39 = vadd.f32 %v7229_v9, %v7228_v15  ;;  %v7231_v0 = vsel %vm517_vm1, %v7052_v23, 0.0  ;;  %v7054_v3 = vmul.f32 %v14704_v24, %v6798_v14  ;;  %v9818_v2 = vpop.f32.mrb[186].mxu1  ;;  %v15137_v42 = vunpack.c.l.bf16 %v14121_v40  ;;  %v9948_v7 = vpop.f32.mrb[122].mxu0 }
 0x4cc   :  { %v7053_v47 = vmul.f32 %v15136_v35, %v6797_v20  ;;  %v6416_v15 = vadd.f32 %v13078_v44, %v5008_v16  ;;  %v6544_v41 = vrot.slane %v5686_v50, 1  ;;  %v5011_v9 = vpop.f32.mrb[187].mxu1  ;;  %v6546_v54 = vrot.slane %v9947_v45, 1  ;;  %v15138_v20 = vld [vmem:[#allocation36_spill] sm:$0xff]  ;;  %v5689_v14 = vpop.f32.mrb[123].mxu0  ;;  %v14197_v45 = vld [vmem:[%s14656_s2 + $0xf8] sm:$0xff]  }
 0x4cd   :  { %v7232_v4 = vadd.f32 %v7231_v0, %v7230_v39  ;;  %v7055_v21 = vmul.f32 %v15137_v42, %v6799_v58  ;;  %v6419_v35 = vadd.f32 %v9818_v2, %v15138_v20  ;;  %v6547_v28 = vrot.slane %v9948_v7, 1 }
 0x4ce   :  { %v7233_v23 = vsel %vm517_vm1, %v7053_v47, 0.0  ;;  %v6688_v38 = vsel %vm6616_vm3, %v6543_v51, %v6544_v41  ;;  %v6417_v39 = vadd.f32 %v13090_v5, %v5011_v9  ;;  %v6545_v0 = vrot.slane %v5689_v14, 1 }
 0x4cf   :  { %v7234_v24 = vadd.f32 %v7233_v23, %v7232_v4  ;;  %v7235_v58 = vsel %vm517_vm1, %v7054_v3, 0.0  ;;  %v6800_v44 = vadd.f32 %v6688_v38, %v6415_v46  ;;  %v6685_v16 = vsel %vm6616_vm3, %v6546_v54, %v6547_v28  ;;  %v14206_v46 = vld [vmem:[%s14656_s2 + $0xf0] sm:$0xff]  }
 0x4d0   :  { %v14707_v47 = vunpack.c.h.bf16 %v14168_v34  ;;  %v6803_v2 = vadd.f32 %v6685_v16, %v6418_v27  ;;  %v6686_v51 = vsel %vm6616_vm3, %v6545_v0, %v6546_v54  ;;  %v6687_v5 = vsel %vm6616_vm3, %v6544_v41, %v6545_v0  ;;  %v15140_v16 = vld [vmem:[#allocation37_spill] sm:$0xff] }
 0x4d1   :  { %v7236_v50 = vadd.f32 %v7235_v58, %v7234_v24  ;;  %v7237_v38 = vsel %vm517_vm1, %v7055_v21, 0.0  ;;  %v7056_v3 = vmul.f32 %v14706_v13, %v6800_v44  ;;  %v6801_v4 = vadd.f32 %v6687_v5, %v6416_v15  ;;  %v9821_v24 = vpop.f32.mrb[188].mxu1  ;;  %v9951_v9 = vpop.f32.mrb[124].mxu0 }
 0x4d2   :  { %v6802_v42 = vadd.f32 %v6686_v51, %v6417_v39  ;;  %v6422_v7 = vadd.f32 %v9821_v24, %v13114_v10  ;;  %v5024_v23 = vpop.f32.mrb[189].mxu1  ;;  %v8222_v41 = vunpack.c.h.bf16 %v14159_v36  ;;  %v8229_v54 = vunpack.c.l.bf16 %v14197_v45  ;;  %v5702_v15 = vpop.f32.mrb[125].mxu0 }
 0x4d3   :  { %v7238_v27 = vadd.f32 %v7237_v38, %v7236_v50  ;;  %v7239_v20 = vsel %vm517_vm1, %v7056_v3, 0.0  ;;  %v7057_v21 = vmul.f32 %v14705_v22, %v6801_v4  ;;  %v9822_v39 = vpop.f32.mrb[190].mxu1  ;;  %v15139_v10 = vunpack.c.l.bf16 %v14159_v36  ;;  %v9952_v5 = vpop.f32.mrb[126].mxu0  ;;  %v15141_v4 = vld [vmem:[#allocation38_spill] sm:$0xff] }
 0x4d4   :  { %v7058_v14 = vmul.f32 %v14707_v47, %v6802_v42  ;;  %v6420_v50 = vadd.f32 %v15140_v16, %v5024_v23  ;;  %v6548_v51 = vrot.slane %v5702_v15, 1  ;;  %v5027_v38 = vpop.f32.mrb[191].mxu1  ;;  %v6550_v24 = vrot.slane %v9951_v9, 1  ;;  %v5705_v42 = vpop.f32.mrb[127].mxu0 }
 0x4d5   :  { %v7240_v58 = vadd.f32 %v7239_v20, %v7238_v27  ;;  %v7059_v44 = vmul.f32 %v15139_v10, %v6803_v2  ;;  %v7241_v3 = vsel %vm517_vm1, %v7057_v21, 0.0  ;;  %v6423_v22 = vadd.f32 %v9822_v39, %v15141_v4 }
 0x4d6   :  { %v6551_v13 = vrot.slane %v9952_v5, 1  ;;  %v6684_v0 = vsel %vm6616_vm3, %v6547_v28, %v6548_v51  ;;  %v6421_v27 = vadd.f32 %v13118_v11, %v5027_v38  ;;  %v6549_v20 = vrot.slane %v5705_v42, 1 }
 0x4d7   :  { %v7242_v47 = vadd.f32 %v7241_v3, %v7240_v58  ;;  %v7243_v2 = vsel %vm517_vm1, %v7058_v14, 0.0  ;;  %v6804_v23 = vadd.f32 %v6684_v0, %v6419_v35  ;;  %v8226_v21 = vunpack.c.h.bf16 %v14206_v46 }
 0x4d8   :  { %v6681_v15 = vsel %vm6616_vm3, %v6550_v24, %v6551_v13  ;;  %v6682_v39 = vsel %vm6616_vm3, %v6549_v20, %v6550_v24  ;;  %v6683_v58 = vsel %vm6616_vm3, %v6548_v51, %v6549_v20  ;;  %v7245_v28 = vsel %vm517_vm1, %v7059_v44, 0.0 }
 0x4d9   :  { %v7244_v9 = vadd.f32 %v7243_v2, %v7242_v47  ;;  %v6807_v10 = vadd.f32 %v6681_v15, %v6422_v7  ;;  %v7060_v11 = vmul.f32 %v8222_v41, %v6804_v23  ;;  %v6805_v14 = vadd.f32 %v6683_v58, %v6420_v50  ;;  %v9825_v0 = vpop.f32.mrb[192].mxu1  ;;  %v9955_v38 = vpop.f32.mrb[128].mxu0 }
 0x4da   :  { %v6806_v35 = vadd.f32 %v6682_v39, %v6421_v27  ;;  %v6426_v5 = vadd.f32 %v9825_v0, %v13142_v6  ;;  %v5040_v47 = vpop.f32.mrb[193].mxu1  ;;  %v8230_v7 = vunpack.c.h.bf16 %v14197_v45  ;;  %v15142_v44 = vunpack.c.l.bf16 %v14206_v46  ;;  %v5718_v4 = vpop.f32.mrb[129].mxu0  ;;  %v15143_v6 = vld [vmem:[#allocation39_spill] sm:$0xff] }
 0x4db   :  { %v7246_v16 = vadd.f32 %v7245_v28, %v7244_v9  ;;  %v7247_v3 = vsel %vm517_vm1, %v7060_v11, 0.0  ;;  %v7063_v51 = vmul.f32 %v8229_v54, %v6807_v10  ;;  %v9826_v42 = vpop.f32.mrb[194].mxu1  ;;  %v6554_v20 = vrot.slane %v9955_v38, 1  ;;  %v9956_v15 = vpop.f32.mrb[130].mxu0  ;;  %v15144_v10 = vld [vmem:[#allocation40_spill] sm:$0xff] }
 0x4dc   :  { %v7061_v24 = vmul.f32 %v15142_v44, %v6805_v14  ;;  %v7062_v50 = vmul.f32 %v8226_v21, %v6806_v35  ;;  %v6424_v2 = vadd.f32 %v15143_v6, %v5040_v47  ;;  %v6552_v23 = vrot.slane %v5718_v4, 1  ;;  %v5043_v9 = vpop.f32.mrb[195].mxu1  ;;  %v5721_v14 = vpop.f32.mrb[131].mxu0 }
 0x4dd   :  { %v7248_v27 = vadd.f32 %v7247_v3, %v7246_v16  ;;  %v6427_v28 = vadd.f32 %v9826_v42, %v15144_v10  ;;  %v6555_v11 = vrot.slane %v9956_v15, 1  ;;  %v6425_v16 = vadd.f32 %v13146_v17, %v5043_v9 }
 0x4de   :  { %v7249_v39 = vsel %vm517_vm1, %v7061_v24, 0.0  ;;  %v7251_v58 = vsel %vm517_vm1, %v7062_v50, 0.0  ;;  %v6680_v35 = vsel %vm6616_vm3, %v6551_v13, %v6552_v23  ;;  %v6553_v38 = vrot.slane %v5721_v14, 1  ;;  %v15147_v14 = vld [vmem:[#allocation90_spill] sm:$0xff] }
 0x4df   :  { %v7250_v0 = vadd.f32 %v7249_v39, %v7248_v27  ;;  %v6808_v3 = vadd.f32 %v6680_v35, %v6423_v22  ;;  %v6677_v47 = vsel %vm6616_vm3, %v6554_v20, %v6555_v11  ;;  %v10944_v42 = vmov 0.0  }
 0x4e0   :  { %v6811_v24 = vadd.f32 %v6677_v47, %v6426_v5  ;;  %v6678_v50 = vsel %vm6616_vm3, %v6553_v38, %v6554_v20  ;;  %v6679_v4 = vsel %vm6616_vm3, %v6552_v23, %v6553_v38  ;;  %45 = vst.msk [vmem:[#allocation2] sm:$0x3] %vm44_vm4, %v10944_v42  ;;  %v7253_v13 = vsel %vm517_vm1, %v7063_v51, 0.0 }
 0x4e1   :  { %v7252_v44 = vadd.f32 %v7251_v58, %v7250_v0  ;;  %v7064_v17 = vmul.f32 %v8230_v7, %v6808_v3  ;;  %v6809_v22 = vadd.f32 %v6679_v4, %v6424_v2  ;;  %v6810_v27 = vadd.f32 %v6678_v50, %v6425_v16  ;;  %v9829_v6 = vpop.f32.mrb[196].mxu1  ;;  %v9959_v9 = vpop.f32.mrb[132].mxu0  ;;  %v15145_v58 = vld [vmem:[#allocation35_spill] sm:$0xff] }
 0x4e2   :  { %v6430_v5 = vadd.f32 %v9829_v6, %v13170_v12  ;;  %v5056_v39 = vpop.f32.mrb[197].mxu1  ;;  %v15146_v23 = vunpack.c.l.bf16 %v15145_v58  ;;  %v15148_v0 = vunpack.c.l.bf16 %v15147_v14  ;;  %v15149_v51 = vunpack.c.h.bf16 %v15147_v14  ;;  %v5734_v3 = vpop.f32.mrb[133].mxu0 }
 0x4e3   :  { %v7254_v15 = vadd.f32 %v7253_v13, %v7252_v44  ;;  %v7255_v20 = vsel %vm517_vm1, %v7064_v17, 0.0  ;;  %v9830_v2 = vpop.f32.mrb[198].mxu1  ;;  %v6558_v47 = vrot.slane %v9959_v9, 1  ;;  %v15150_v44 = vld [vmem:[#allocation41_spill] sm:$0xff]  ;;  %v6556_v50 = vrot.slane %v5734_v3, 1  ;;  %v9960_v4 = vpop.f32.mrb[134].mxu0 }
 0x4e4   :  { %v7067_v10 = vmul.f32 %v15146_v23, %v6811_v24  ;;  %v7065_v35 = vmul.f32 %v15148_v0, %v6809_v22  ;;  %v7066_v38 = vmul.f32 %v15149_v51, %v6810_v27  ;;  %v6428_v12 = vadd.f32 %v15150_v44, %v5056_v39  ;;  %v5059_v42 = vpop.f32.mrb[199].mxu1  ;;  %v15151_v17 = vld [vmem:[#allocation42_spill] sm:$0xff]  ;;  %v5737_v23 = vpop.f32.mrb[135].mxu0 }
 0x4e5   :  { %v14273_v16 = vadd.f32 %v7255_v20, %v7254_v15  ;;  %v6431_v6 = vadd.f32 %v9830_v2, %v15151_v17  ;;  %v6559_v22 = vrot.slane %v9960_v4, 1  ;;  %v6676_v27 = vsel %vm6616_vm3, %v6555_v11, %v6556_v50  ;;  %v15152_v15 = vld [vmem:[#allocation43_spill] sm:$0xff]  ;;  %v15154_v17 = vld [vmem:[#allocation46_spill] sm:$0xff] }
 0x4e6   :  { %v7263_v13 = vsel %vm517_vm1, %v7065_v35, 0.0  ;;  %v7264_v24 = vsel %vm517_vm1, %v7066_v38, 0.0  ;;  %v6429_v20 = vadd.f32 %v15152_v15, %v5059_v42  ;;  %v7266_v9 = vsel %vm517_vm1, %v7067_v10, 0.0 }
 0x4e7   :  { %v7265_v14 = vadd.f32 %v7264_v24, %v7263_v13  ;;  %v6812_v39 = vadd.f32 %v6676_v27, %v6427_v28  ;;  %v6673_v0 = vsel %vm6616_vm3, %v6558_v47, %v6559_v22  ;;  %v6557_v51 = vrot.slane %v5737_v23, 1 }
 0x4e8   :  { %v6815_v3 = vadd.f32 %v6673_v0, %v6430_v5  ;;  %v15153_v38 = vunpack.c.h.bf16 %v15145_v58 }
 0x4e9   :  { %v7267_v35 = vadd.f32 %v7266_v9, %v7265_v14  ;;  %v6674_v44 = vsel %vm6616_vm3, %v6557_v51, %v6558_v47  ;;  %v6675_v11 = vsel %vm6616_vm3, %v6556_v50, %v6557_v51  ;;  %v9833_v4 = vpop.f32.mrb[200].mxu1  ;;  %v9963_v10 = vpop.f32.mrb[136].mxu0  ;;  %v15155_v14 = vld [vmem:[#allocation44_spill] sm:$0xff]  ;;  %v15156_v9 = vunpack.c.l.bf16 %v13652_v57 }
 0x4ea   :  { %v7068_v2 = vmul.f32 %v15153_v38, %v6812_v39  ;;  %v6813_v42 = vadd.f32 %v6675_v11, %v6428_v12  ;;  %v6814_v13 = vadd.f32 %v6674_v44, %v6429_v20  ;;  %v5072_v28 = vpop.f32.mrb[201].mxu1  ;;  %v6434_v23 = vadd.f32 %v9833_v4, %v15154_v17  ;;  %v5750_v27 = vpop.f32.mrb[137].mxu0  ;;  %v15158_v38 = vld [vmem:[#allocation45_spill] sm:$0xff] }
 0x4eb   :  { %v6432_v5 = vadd.f32 %v15155_v14, %v5072_v28  ;;  %v9834_v58 = vpop.f32.mrb[202].mxu1  ;;  %v6562_v39 = vrot.slane %v9963_v10, 1  ;;  %v9964_v0 = vpop.f32.mrb[138].mxu0  ;;  %v15157_v12 = vunpack.c.h.bf16 %v13652_v57  ;;  %v6560_v51 = vrot.slane %v5750_v27, 1 }
 0x4ec   :  { %v7268_v24 = vsel %vm517_vm1, %v7068_v2, 0.0  ;;  %v7069_v47 = vmul.f32 %v15156_v9, %v6813_v42  ;;  %v5075_v50 = vpop.f32.mrb[203].mxu1  ;;  %v6435_v44 = vadd.f32 %v9834_v58, %v15158_v38  ;;  %v6563_v2 = vrot.slane %v9964_v0, 1  ;;  %v5753_v11 = vpop.f32.mrb[139].mxu0 }
 0x4ed   :  { %v7269_v15 = vadd.f32 %v7268_v24, %v7267_v35  ;;  %v7070_v20 = vmul.f32 %v15157_v12, %v6814_v13  ;;  %v15159_v4 = vunpack.c.l.bf16 %v13638_v62  ;;  %v15160_v35 = vld [vmem:[#allocation47_spill] sm:$0xff]  ;;  %v6561_v14 = vrot.slane %v5753_v11, 1  ;;  %v15162_v11 = vld [vmem:[#allocation50_spill] sm:$0xff] }
 0x4ee   :  { %v7270_v17 = vsel %vm517_vm1, %v7069_v47, 0.0  ;;  %v6433_v24 = vadd.f32 %v15160_v35, %v5075_v50  ;;  %v6672_v10 = vsel %vm6616_vm3, %v6559_v22, %v6560_v51  ;;  %v6669_v57 = vsel %vm6616_vm3, %v6562_v39, %v6563_v2  ;;  %v15164_v35 = vld [vmem:[#allocation48_spill] sm:$0xff] }
 0x4ef   :  { %v7071_v28 = vmul.f32 %v15159_v4, %v6815_v3  ;;  %v7271_v42 = vadd.f32 %v7270_v17, %v7269_v15  ;;  %v7272_v13 = vsel %vm517_vm1, %v7070_v20, 0.0  ;;  %v6816_v27 = vadd.f32 %v6672_v10, %v6431_v6 }
 0x4f0   :  { %v6819_v58 = vadd.f32 %v6669_v57, %v6434_v23  ;;  %v6670_v9 = vsel %vm6616_vm3, %v6561_v14, %v6562_v39  ;;  %v6671_v47 = vsel %vm6616_vm3, %v6560_v51, %v6561_v14  ;;  %v15161_v22 = vunpack.c.h.bf16 %v13638_v62 }
 0x4f1   :  { %v7273_v3 = vadd.f32 %v7272_v13, %v7271_v42  ;;  %v6818_v0 = vadd.f32 %v6670_v9, %v6433_v24  ;;  %v9837_v50 = vpop.f32.mrb[204].mxu1  ;;  %v7274_v15 = vsel %vm517_vm1, %v7071_v28, 0.0  ;;  %v6817_v38 = vadd.f32 %v6671_v47, %v6432_v5  ;;  %v9967_v20 = vpop.f32.mrb[140].mxu0  ;;  %v15167_v47 = vld [vmem:[#allocation49_spill] sm:$0xff] }
 0x4f2   :  { %v7072_v12 = vmul.f32 %v15161_v22, %v6816_v27  ;;  %v6438_v4 = vadd.f32 %v9837_v50, %v15162_v11  ;;  %v5088_v6 = vpop.f32.mrb[205].mxu1  ;;  %v15163_v17 = vunpack.c.l.bf16 %v13674_v53  ;;  %v5766_v10 = vpop.f32.mrb[141].mxu0  ;;  %v15165_v28 = vunpack.c.l.bf16 %v13687_v8  ;;  %v15168_v11 = vld [vmem:[#allocation51_spill] sm:$0xff] }
 0x4f3   :  { %v7275_v23 = vadd.f32 %v7274_v15, %v7273_v3  ;;  %v6436_v42 = vadd.f32 %v15164_v35, %v5088_v6  ;;  %v9838_v51 = vpop.f32.mrb[206].mxu1  ;;  %v15166_v62 = vunpack.c.h.bf16 %v13687_v8  ;;  %v6564_v57 = vrot.slane %v5766_v10, 1  ;;  %v9968_v13 = vpop.f32.mrb[142].mxu0 }
 0x4f4   :  { %v7075_v39 = vmul.f32 %v15163_v17, %v6819_v58  ;;  %v7276_v24 = vsel %vm517_vm1, %v7072_v12, 0.0  ;;  %v7073_v14 = vmul.f32 %v15165_v28, %v6817_v38  ;;  %v5091_v27 = vpop.f32.mrb[207].mxu1  ;;  %v6566_v3 = vrot.slane %v9967_v20, 1  ;;  %v5769_v15 = vpop.f32.mrb[143].mxu0 }
 0x4f5   :  { %v7074_v5 = vmul.f32 %v15166_v62, %v6818_v0  ;;  %v7277_v9 = vadd.f32 %v7276_v24, %v7275_v23  ;;  %v6439_v50 = vadd.f32 %v9838_v51, %v15167_v47  ;;  %v6567_v58 = vrot.slane %v9968_v13, 1  ;;  %v15170_v13 = vld [vmem:[#allocation54_spill] sm:$0xff] }
 0x4f6   :  { %v7278_v22 = vsel %vm517_vm1, %v7073_v14, 0.0  ;;  %v6668_v12 = vsel %vm6616_vm3, %v6563_v2, %v6564_v57  ;;  %v6437_v6 = vadd.f32 %v15168_v11, %v5091_v27  ;;  %v6565_v38 = vrot.slane %v5769_v15, 1 }
 0x4f7   :  { %v7279_v17 = vadd.f32 %v7278_v22, %v7277_v9  ;;  %v6820_v8 = vadd.f32 %v6668_v12, %v6435_v44  ;;  %v6665_v0 = vsel %vm6616_vm3, %v6566_v3, %v6567_v58  ;;  %v7280_v23 = vsel %vm517_vm1, %v7074_v5, 0.0 }
 0x4f8   :  { %v6823_v20 = vadd.f32 %v6665_v0, %v6438_v4  ;;  %v6666_v35 = vsel %vm6616_vm3, %v6565_v38, %v6566_v3  ;;  %v6667_v10 = vsel %vm6616_vm3, %v6564_v57, %v6565_v38  ;;  %v15169_v2 = vunpack.c.h.bf16 %v13674_v53  ;;  %v15171_v3 = vld [vmem:[#allocation91_spill] sm:$0xff]  ;;  %v15175_v38 = vld [vmem:[#allocation52_spill] sm:$0xff] }
 0x4f9   :  { %v7281_v51 = vadd.f32 %v7280_v23, %v7279_v17  ;;  %v6821_v28 = vadd.f32 %v6667_v10, %v6436_v42  ;;  %v6822_v14 = vadd.f32 %v6666_v35, %v6437_v6  ;;  %v9841_v62 = vpop.f32.mrb[208].mxu1  ;;  %v7282_v44 = vsel %vm517_vm1, %v7075_v39, 0.0  ;;  %v9971_v9 = vpop.f32.mrb[144].mxu0 }
 0x4fa   :  { %v7076_v24 = vmul.f32 %v15169_v2, %v6820_v8  ;;  %v6442_v27 = vadd.f32 %v9841_v62, %v15170_v13  ;;  %v5104_v5 = vpop.f32.mrb[209].mxu1  ;;  %v15172_v15 = vunpack.c.l.bf16 %v15171_v3  ;;  %v5782_v57 = vpop.f32.mrb[145].mxu0  ;;  %v15173_v53 = vunpack.c.l.bf16 %v13721_v19 }
 0x4fb   :  { %v7283_v4 = vadd.f32 %v7282_v44, %v7281_v51  ;;  %v9842_v12 = vpop.f32.mrb[210].mxu1  ;;  %v15174_v42 = vunpack.c.h.bf16 %v15171_v3  ;;  %v6440_v39 = vadd.f32 %v15175_v38, %v5104_v5  ;;  %v6568_v17 = vrot.slane %v5782_v57, 1  ;;  %v9972_v8 = vpop.f32.mrb[146].mxu0  ;;  %v15176_v51 = vld [vmem:[#allocation53_spill] sm:$0xff] }
 0x4fc   :  { %v7284_v47 = vsel %vm517_vm1, %v7076_v24, 0.0  ;;  %v7077_v22 = vmul.f32 %v15172_v15, %v6821_v28  ;;  %v7079_v11 = vmul.f32 %v15173_v53, %v6823_v20  ;;  %v5107_v0 = vpop.f32.mrb[211].mxu1  ;;  %v6570_v10 = vrot.slane %v9971_v9, 1  ;;  %v5785_v24 = vpop.f32.mrb[147].mxu0  ;;  %v15177_v20 = vld [vmem:[#allocation55_spill] sm:$0xff] }
 0x4fd   :  { %v7078_v6 = vmul.f32 %v15174_v42, %v6822_v14  ;;  %v7285_v23 = vadd.f32 %v7284_v47, %v7283_v4  ;;  %v6443_v2 = vadd.f32 %v9842_v12, %v15176_v51  ;;  %v6664_v28 = vsel %vm6616_vm3, %v6567_v58, %v6568_v17 }
 0x4fe   :  { %v7286_v35 = vsel %vm517_vm1, %v7077_v22, 0.0  ;;  %v6571_v62 = vrot.slane %v9972_v8, 1  ;;  %v6441_v44 = vadd.f32 %v15177_v20, %v5107_v0  ;;  %v6569_v13 = vrot.slane %v5785_v24, 1 }
 0x4ff   :  { %v7287_v14 = vadd.f32 %v7286_v35, %v7285_v23  ;;  %v6824_v3 = vadd.f32 %v6664_v28, %v6439_v50  ;;  %v7288_v5 = vsel %vm517_vm1, %v7078_v6, 0.0  ;;  %v15178_v58 = vunpack.c.h.bf16 %v13721_v19  ;;  %v15179_v6 = vld [vmem:[#allocation58_spill] sm:$0xff] }
 0x500   :  { %v6661_v4 = vsel %vm6616_vm3, %v6570_v10, %v6571_v62  ;;  %v6662_v9 = vsel %vm6616_vm3, %v6569_v13, %v6570_v10  ;;  %v6663_v47 = vsel %vm6616_vm3, %v6568_v17, %v6569_v13  ;;  %v7290_v50 = vsel %vm517_vm1, %v7079_v11, 0.0 }
 0x501   :  { %v7289_v15 = vadd.f32 %v7288_v5, %v7287_v14  ;;  %v7080_v22 = vmul.f32 %v15178_v58, %v6824_v3  ;;  %v6827_v57 = vadd.f32 %v6661_v4, %v6442_v27  ;;  %v6825_v12 = vadd.f32 %v6663_v47, %v6440_v39  ;;  %v9845_v53 = vpop.f32.mrb[212].mxu1  ;;  %v9975_v8 = vpop.f32.mrb[148].mxu0  ;;  %v15182_v39 = vld [vmem:[#allocation56_spill] sm:$0xff]  ;;  %v15184_v4 = vld [vmem:[#allocation57_spill] sm:$0xff] }
 0x502   :  { %v6826_v42 = vadd.f32 %v6662_v9, %v6441_v44  ;;  %v6446_v38 = vadd.f32 %v9845_v53, %v15179_v6  ;;  %v5120_v0 = vpop.f32.mrb[213].mxu1  ;;  %v15180_v10 = vunpack.c.l.bf16 %v13782_v55  ;;  %v5798_v51 = vpop.f32.mrb[149].mxu0  ;;  %v15181_v19 = vunpack.c.h.bf16 %v13782_v55 }
 0x503   :  { %v7291_v23 = vadd.f32 %v7290_v50, %v7289_v15  ;;  %v7292_v35 = vsel %vm517_vm1, %v7080_v22, 0.0  ;;  %v9846_v24 = vpop.f32.mrb[214].mxu1  ;;  %v6444_v28 = vadd.f32 %v15182_v39, %v5120_v0  ;;  %v6572_v20 = vrot.slane %v5798_v51, 1  ;;  %v9976_v11 = vpop.f32.mrb[150].mxu0  ;;  %v15185_v22 = vld [vmem:[#allocation59_spill] sm:$0xff] }
 0x504   :  { %v7081_v17 = vmul.f32 %v15180_v10, %v6825_v12  ;;  %v7082_v27 = vmul.f32 %v15181_v19, %v6826_v42  ;;  %v5123_v44 = vpop.f32.mrb[215].mxu1  ;;  %v15183_v14 = vunpack.c.l.bf16 %v13769_v18  ;;  %v6447_v9 = vadd.f32 %v9846_v24, %v15184_v4  ;;  %v5801_v47 = vpop.f32.mrb[151].mxu0  ;;  %v15187_v24 = vld [vmem:[#allocation62_spill] sm:$0xff]  ;;  %v15189_v4 = vld [vmem:[#allocation60_spill] sm:$0xff] }
 0x505   :  { %v7293_v13 = vadd.f32 %v7292_v35, %v7291_v23  ;;  %v6574_v15 = vrot.slane %v9975_v8, 1  ;;  %v6660_v58 = vsel %vm6616_vm3, %v6571_v62, %v6572_v20  ;;  %v6575_v55 = vrot.slane %v9976_v11, 1 }
 0x506   :  { %v7083_v3 = vmul.f32 %v15183_v14, %v6827_v57  ;;  %v7294_v5 = vsel %vm517_vm1, %v7081_v17, 0.0  ;;  %v6445_v12 = vadd.f32 %v15185_v22, %v5123_v44  ;;  %v6828_v50 = vadd.f32 %v6660_v58, %v6443_v2 }
 0x507   :  { %v7295_v53 = vadd.f32 %v7294_v5, %v7293_v13  ;;  %v6573_v42 = vrot.slane %v5801_v47, 1  ;;  %v7296_v6 = vsel %vm517_vm1, %v7082_v27, 0.0  ;;  %v6657_v57 = vsel %vm6616_vm3, %v6574_v15, %v6575_v55 }
 0x508   :  { %v15186_v23 = vunpack.c.h.bf16 %v13769_v18  ;;  %v6831_v10 = vadd.f32 %v6657_v57, %v6446_v38  ;;  %v7298_v17 = vsel %vm517_vm1, %v7083_v3, 0.0  ;;  %v15188_v14 = vunpack.c.h.bf16 %v13826_v60 }
 0x509   :  { %v7297_v0 = vadd.f32 %v7296_v6, %v7295_v53  ;;  %v6658_v8 = vsel %vm6616_vm3, %v6573_v42, %v6574_v15  ;;  %v9849_v62 = vpop.f32.mrb[216].mxu1  ;;  %v6659_v2 = vsel %vm6616_vm3, %v6572_v20, %v6573_v42  ;;  %v9979_v27 = vpop.f32.mrb[152].mxu0  ;;  %v15190_v22 = vunpack.c.l.bf16 %v13826_v60  ;;  %v15191_v53 = vld [vmem:[#allocation61_spill] sm:$0xff] }
 0x50a   :  { %v7084_v35 = vmul.f32 %v15186_v23, %v6828_v50  ;;  %v6830_v51 = vadd.f32 %v6658_v8, %v6445_v12  ;;  %v6450_v19 = vadd.f32 %v9849_v62, %v15187_v24  ;;  %v5136_v39 = vpop.f32.mrb[217].mxu1  ;;  %v6829_v18 = vadd.f32 %v6659_v2, %v6444_v28  ;;  %v5814_v13 = vpop.f32.mrb[153].mxu0 }
 0x50b   :  { %v7299_v11 = vadd.f32 %v7298_v17, %v7297_v0  ;;  %v9850_v38 = vpop.f32.mrb[218].mxu1  ;;  %v6448_v47 = vadd.f32 %v15189_v4, %v5136_v39  ;;  %v6576_v3 = vrot.slane %v5814_v13, 1  ;;  %v9980_v15 = vpop.f32.mrb[154].mxu0  ;;  %v6578_v6 = vrot.slane %v9979_v27, 1  ;;  %v15192_v0 = vld [vmem:[#allocation63_spill] sm:$0xff] }
 0x50c   :  { %v7300_v44 = vsel %vm517_vm1, %v7084_v35, 0.0  ;;  %v7086_v5 = vmul.f32 %v15188_v14, %v6830_v51  ;;  %v5139_v58 = vpop.f32.mrb[219].mxu1  ;;  %v7085_v12 = vmul.f32 %v15190_v22, %v6829_v18  ;;  %v6451_v50 = vadd.f32 %v9850_v38, %v15191_v53  ;;  %v5817_v42 = vpop.f32.mrb[155].mxu0  ;;  %v15195_v38 = vld [vmem:[#allocation66_spill] sm:$0xff] }
 0x50d   :  { %v7301_v20 = vadd.f32 %v7300_v44, %v7299_v11  ;;  %v6656_v28 = vsel %vm6616_vm3, %v6575_v55, %v6576_v3  ;;  %v6579_v57 = vrot.slane %v9980_v15, 1  ;;  %v6449_v23 = vadd.f32 %v15192_v0, %v5139_v58  ;;  %v15196_v58 = vld [vmem:[#allocation64_spill] sm:$0xff] }
 0x50e   :  { %v15193_v35 = vunpack.c.l.bf16 %v13817_v48  ;;  %v7302_v62 = vsel %vm517_vm1, %v7085_v12, 0.0  ;;  %v6832_v17 = vadd.f32 %v6656_v28, %v6447_v9  ;;  %v6577_v2 = vrot.slane %v5817_v42, 1 }
 0x50f   :  { %v7303_v51 = vadd.f32 %v7302_v62, %v7301_v20  ;;  %v7304_v60 = vsel %vm517_vm1, %v7086_v5, 0.0  ;;  %v6653_v24 = vsel %vm6616_vm3, %v6578_v6, %v6579_v57  ;;  %v15194_v27 = vunpack.c.h.bf16 %v13817_v48 }
 0x510   :  { %v7087_v8 = vmul.f32 %v15193_v35, %v6831_v10  ;;  %v6835_v55 = vadd.f32 %v6653_v24, %v6450_v19  ;;  %v6654_v11 = vsel %vm6616_vm3, %v6577_v2, %v6578_v6  ;;  %v6655_v10 = vsel %vm6616_vm3, %v6576_v3, %v6577_v2  ;;  %v15199_v35 = vld [vmem:[#allocation65_spill] sm:$0xff] }
 0x511   :  { %v7088_v39 = vmul.f32 %v15194_v27, %v6832_v17  ;;  %v9853_v44 = vpop.f32.mrb[220].mxu1  ;;  %v7305_v18 = vadd.f32 %v7304_v60, %v7303_v51  ;;  %v6833_v9 = vadd.f32 %v6655_v10, %v6448_v47  ;;  %v6834_v13 = vadd.f32 %v6654_v11, %v6449_v23  ;;  %v9983_v5 = vpop.f32.mrb[156].mxu0  ;;  %v15200_v17 = vld [vmem:[#allocation67_spill] sm:$0xff] }
 0x512   :  { %v6454_v14 = vadd.f32 %v9853_v44, %v15195_v38  ;;  %v5152_v4 = vpop.f32.mrb[221].mxu1  ;;  %v7306_v15 = vsel %vm517_vm1, %v7087_v8, 0.0  ;;  %v5830_v20 = vpop.f32.mrb[157].mxu0  ;;  %v15197_v53 = vunpack.c.l.bf16 %v13864_v37  ;;  %v6582_v42 = vrot.slane %v9983_v5, 1 }
 0x513   :  { %v7308_v48 = vsel %vm517_vm1, %v7088_v39, 0.0  ;;  %v6452_v19 = vadd.f32 %v15196_v58, %v5152_v4  ;;  %v9854_v22 = vpop.f32.mrb[222].mxu1  ;;  %v7307_v12 = vadd.f32 %v7306_v15, %v7305_v18  ;;  %v6580_v6 = vrot.slane %v5830_v20, 1  ;;  %v9984_v47 = vpop.f32.mrb[158].mxu0 }
 0x514   :  { %v7089_v3 = vmul.f32 %v15197_v53, %v6833_v9  ;;  %v5155_v28 = vpop.f32.mrb[223].mxu1  ;;  %v15198_v0 = vunpack.c.h.bf16 %v13864_v37  ;;  %v6455_v62 = vadd.f32 %v9854_v22, %v15199_v35  ;;  %v6583_v8 = vrot.slane %v9984_v47, 1  ;;  %v5833_v51 = vpop.f32.mrb[159].mxu0 }
 0x515   :  { %v6453_v2 = vadd.f32 %v15200_v17, %v5155_v28  ;;  %v7309_v60 = vadd.f32 %v7308_v48, %v7307_v12  ;;  %v6652_v27 = vsel %vm6616_vm3, %v6579_v57, %v6580_v6  ;;  %v15201_v39 = vunpack.c.l.bf16 %v13855_v31  ;;  %v15203_v12 = vld [vmem:[#allocation70_spill] sm:$0xff] }
 0x516   :  { %v7090_v23 = vmul.f32 %v15198_v0, %v6834_v13  ;;  %v7310_v24 = vsel %vm517_vm1, %v7089_v3, 0.0  ;;  %v6836_v10 = vadd.f32 %v6652_v27, %v6451_v50  ;;  %v6649_v37 = vsel %vm6616_vm3, %v6582_v42, %v6583_v8 }
 0x517   :  { %v7091_v11 = vmul.f32 %v15201_v39, %v6835_v55  ;;  %v6581_v44 = vrot.slane %v5833_v51, 1  ;;  %v7311_v18 = vadd.f32 %v7310_v24, %v7309_v60  ;;  %v6839_v9 = vadd.f32 %v6649_v37, %v6454_v14  ;;  %v15207_v60 = vld [vmem:[#allocation69_spill] sm:$0xff]  ;;  %v15208_v39 = vld [vmem:[#allocation71_spill] sm:$0xff] }
 0x518   :  { %v7312_v13 = vsel %vm517_vm1, %v7090_v23, 0.0  ;;  %v15202_v38 = vunpack.c.h.bf16 %v13855_v31  ;;  %v15204_v31 = vld [vmem:[#allocation68_spill] sm:$0xff]  ;;  %v15205_v0 = vunpack.c.l.bf16 %v13902_v56  ;;  %v15206_v23 = vunpack.c.h.bf16 %v13902_v56 }
 0x519   :  { %v6650_v4 = vsel %vm6616_vm3, %v6581_v44, %v6582_v42  ;;  %v6651_v57 = vsel %vm6616_vm3, %v6580_v6, %v6581_v44  ;;  %v9857_v15 = vpop.f32.mrb[224].mxu1  ;;  %v7313_v55 = vadd.f32 %v7312_v13, %v7311_v18  ;;  %v9987_v58 = vpop.f32.mrb[160].mxu0  ;;  %v7314_v22 = vsel %vm517_vm1, %v7091_v11, 0.0 }
 0x51a   :  { %v7092_v5 = vmul.f32 %v15202_v38, %v6836_v10  ;;  %v6837_v50 = vadd.f32 %v6651_v57, %v6452_v19  ;;  %v6838_v48 = vadd.f32 %v6650_v4, %v6453_v2  ;;  %v5168_v20 = vpop.f32.mrb[225].mxu1  ;;  %v6458_v53 = vadd.f32 %v9857_v15, %v15203_v12  ;;  %v5846_v47 = vpop.f32.mrb[161].mxu0 }
 0x51b   :  { %v6456_v3 = vadd.f32 %v15204_v31, %v5168_v20  ;;  %v9858_v28 = vpop.f32.mrb[226].mxu1  ;;  %v7315_v42 = vadd.f32 %v7314_v22, %v7313_v55  ;;  %v6586_v35 = vrot.slane %v9987_v58, 1  ;;  %v9988_v17 = vpop.f32.mrb[162].mxu0  ;;  %v6584_v51 = vrot.slane %v5846_v47, 1 }
 0x51c   :  { %v7316_v14 = vsel %vm517_vm1, %v7092_v5, 0.0  ;;  %v7093_v6 = vmul.f32 %v15205_v0, %v6837_v50  ;;  %v7094_v19 = vmul.f32 %v15206_v23, %v6838_v48  ;;  %v5171_v2 = vpop.f32.mrb[227].mxu1  ;;  %v6459_v24 = vadd.f32 %v9858_v28, %v15207_v60  ;;  %v5849_v10 = vpop.f32.mrb[163].mxu0  ;;  %v15212_v28 = vld [vmem:[#allocation72_spill] sm:$0xff] }
 0x51d   :  { %v6587_v27 = vrot.slane %v9988_v17, 1  ;;  %v6457_v11 = vadd.f32 %v15208_v39, %v5171_v2  ;;  %v7317_v37 = vadd.f32 %v7316_v14, %v7315_v42  ;;  %v6585_v18 = vrot.slane %v5849_v10, 1 }
 0x51e   :  { %v7318_v44 = vsel %vm517_vm1, %v7093_v6, 0.0  ;;  %v15209_v13 = vunpack.c.l.bf16 %v13893_v63  ;;  %v6648_v56 = vsel %vm6616_vm3, %v6583_v8, %v6584_v51  ;;  %v7320_v50 = vsel %vm517_vm1, %v7094_v19, 0.0 }
 0x51f   :  { %v6645_v5 = vsel %vm6616_vm3, %v6586_v35, %v6587_v27  ;;  %v7319_v4 = vadd.f32 %v7318_v44, %v7317_v37  ;;  %v6840_v57 = vadd.f32 %v6648_v56, %v6455_v62  ;;  %v6646_v55 = vsel %vm6616_vm3, %v6585_v18, %v6586_v35 }
 0x520   :  { %v7095_v38 = vmul.f32 %v15209_v13, %v6839_v9  ;;  %v6843_v15 = vadd.f32 %v6645_v5, %v6458_v53  ;;  %v6647_v48 = vsel %vm6616_vm3, %v6584_v51, %v6585_v18  ;;  %v6842_v58 = vadd.f32 %v6646_v55, %v6457_v11  ;;  %v15211_v53 = vld [vmem:[#allocation74_spill] sm:$0xff]  ;;  %v15215_v11 = vld [vmem:[#allocation73_spill] sm:$0xff] }
 0x521   :  { %v9861_v20 = vpop.f32.mrb[228].mxu1  ;;  %v7321_v9 = vadd.f32 %v7320_v50, %v7319_v4  ;;  %v15210_v22 = vunpack.c.h.bf16 %v13893_v63  ;;  %v6841_v14 = vadd.f32 %v6647_v48, %v6456_v3  ;;  %v9991_v12 = vpop.f32.mrb[164].mxu0  ;;  %v15213_v35 = vunpack.c.l.bf16 %v13940_v26 }
 0x522   :  { %v5184_v31 = vpop.f32.mrb[229].mxu1  ;;  %v7322_v62 = vsel %vm517_vm1, %v7095_v38, 0.0  ;;  %v6462_v47 = vadd.f32 %v9861_v20, %v15211_v53  ;;  %v5862_v0 = vpop.f32.mrb[165].mxu0  ;;  %v15214_v63 = vunpack.c.h.bf16 %v13940_v26  ;;  %v6590_v60 = vrot.slane %v9991_v12, 1  ;;  %v15216_v38 = vld [vmem:[#allocation75_spill] sm:$0xff] }
 0x523   :  { %v7096_v8 = vmul.f32 %v15210_v22, %v6840_v57  ;;  %v6460_v42 = vadd.f32 %v15212_v28, %v5184_v31  ;;  %v9862_v6 = vpop.f32.mrb[230].mxu1  ;;  %v7323_v23 = vadd.f32 %v7322_v62, %v7321_v9  ;;  %v7097_v17 = vmul.f32 %v15213_v35, %v6841_v14  ;;  %v9992_v3 = vpop.f32.mrb[166].mxu0 }
 0x524   :  { %v7098_v2 = vmul.f32 %v15214_v63, %v6842_v58  ;;  %v5187_v51 = vpop.f32.mrb[231].mxu1  ;;  %v6588_v39 = vrot.slane %v5862_v0, 1  ;;  %v6463_v10 = vadd.f32 %v9862_v6, %v15215_v11  ;;  %v6591_v37 = vrot.slane %v9992_v3, 1  ;;  %v5865_v44 = vpop.f32.mrb[167].mxu0  ;;  %v15220_v0 = vld [vmem:[#allocation3_spill] sm:$0xff]  ;;  %v15223_v11 = vld [vmem:[#allocation76_spill] sm:$0xff] }
 0x525   :  { %v7324_v19 = vsel %vm517_vm1, %v7096_v8, 0.0  ;;  %v7326_v13 = vsel %vm517_vm1, %v7097_v17, 0.0  ;;  %v6461_v56 = vadd.f32 %v15216_v38, %v5187_v51  ;;  %v6589_v5 = vrot.slane %v5865_v44, 1 }
 0x526   :  { %v7325_v18 = vadd.f32 %v7324_v19, %v7323_v23  ;;  %v15217_v4 = vunpack.c.l.bf16 %v13931_v1  ;;  %v6644_v26 = vsel %vm6616_vm3, %v6587_v27, %v6588_v39  ;;  %v6641_v55 = vsel %vm6616_vm3, %v6590_v60, %v6591_v37 }
 0x527   :  { %v6844_v48 = vadd.f32 %v6644_v26, %v6459_v24  ;;  %v6847_v58 = vadd.f32 %v6641_v55, %v6462_v47  ;;  %v6642_v20 = vsel %vm6616_vm3, %v6589_v5, %v6590_v60  ;;  %v7328_v9 = vsel %vm517_vm1, %v7098_v2, 0.0  ;;  %v15219_v47 = vld [vmem:[#allocation77_spill] sm:$0xff] }
 0x528   :  { %v7099_v57 = vmul.f32 %v15217_v4, %v6843_v15  ;;  %v7327_v50 = vadd.f32 %v7326_v13, %v7325_v18  ;;  %v6643_v22 = vsel %vm6616_vm3, %v6588_v39, %v6589_v5  ;;  %v6846_v8 = vadd.f32 %v6642_v20, %v6461_v56  ;;  %v15224_v5 = vld [vmem:[#allocation78_spill] sm:$0xff] }
 0x529   :  { %v9865_v14 = vpop.f32.mrb[232].mxu1  ;;  %v15218_v12 = vunpack.c.h.bf16 %v13931_v1  ;;  %v6845_v31 = vadd.f32 %v6643_v22, %v6460_v42  ;;  %v9995_v62 = vpop.f32.mrb[168].mxu0  ;;  %v15221_v63 = vunpack.c.l.bf16 %v13978_v33  ;;  %v15222_v1 = vunpack.c.h.bf16 %v13978_v33 }
 0x52a   :  { %v7329_v15 = vadd.f32 %v7328_v9, %v7327_v50  ;;  %v5200_v53 = vpop.f32.mrb[233].mxu1  ;;  %v7330_v24 = vsel %vm517_vm1, %v7099_v57, 0.0  ;;  %v6466_v28 = vadd.f32 %v9865_v14, %v15219_v47  ;;  %v5878_v23 = vpop.f32.mrb[169].mxu0  ;;  %v6594_v60 = vrot.slane %v9995_v62, 1 }
 0x52b   :  { %v7100_v27 = vmul.f32 %v15218_v12, %v6844_v48  ;;  %v6464_v6 = vadd.f32 %v15220_v0, %v5200_v53  ;;  %v9866_v19 = vpop.f32.mrb[234].mxu1  ;;  %v7101_v2 = vmul.f32 %v15221_v63, %v6845_v31  ;;  %v7102_v3 = vmul.f32 %v15222_v1, %v6846_v8  ;;  %v9996_v42 = vpop.f32.mrb[170].mxu0 }
 0x52c   :  { %v7331_v35 = vadd.f32 %v7330_v24, %v7329_v15  ;;  %v5203_v51 = vpop.f32.mrb[235].mxu1  ;;  %v6592_v39 = vrot.slane %v5878_v23, 1  ;;  %v6467_v44 = vadd.f32 %v9866_v19, %v15223_v11  ;;  %v6595_v18 = vrot.slane %v9996_v42, 1  ;;  %v5881_v13 = vpop.f32.mrb[171].mxu0  ;;  %v15227_v24 = vld [vmem:[#allocation79_spill] sm:$0xff] }
 0x52d   :  { %v7332_v17 = vsel %vm517_vm1, %v7100_v27, 0.0  ;;  %v7334_v56 = vsel %vm517_vm1, %v7101_v2, 0.0  ;;  %v6465_v4 = vadd.f32 %v15224_v5, %v5203_v51  ;;  %v6593_v57 = vrot.slane %v5881_v13, 1  ;;  %v15232_v5 = vld [vmem:[#allocation80_spill] sm:$0xff] }
 0x52e   :  { %v7333_v38 = vadd.f32 %v7332_v17, %v7331_v35  ;;  %v15225_v26 = vunpack.c.l.bf16 %v13969_v52  ;;  %v6640_v33 = vsel %vm6616_vm3, %v6591_v37, %v6592_v39  ;;  %v6637_v50 = vsel %vm6616_vm3, %v6594_v60, %v6595_v18 }
 0x52f   :  { %v6848_v20 = vadd.f32 %v6640_v33, %v6463_v10  ;;  %v6851_v9 = vadd.f32 %v6637_v50, %v6466_v28  ;;  %v6638_v22 = vsel %vm6616_vm3, %v6593_v57, %v6594_v60  ;;  %v7336_v8 = vsel %vm517_vm1, %v7102_v3, 0.0  ;;  %v15228_v28 = vld [vmem:[#allocation4_spill] sm:$0xff]  ;;  %v15231_v60 = vld [vmem:[#allocation5_spill] sm:$0xff] }
 0x530   :  { %v7103_v55 = vmul.f32 %v15225_v26, %v6847_v58  ;;  %v7335_v48 = vadd.f32 %v7334_v56, %v7333_v38  ;;  %v6639_v14 = vsel %vm6616_vm3, %v6592_v39, %v6593_v57  ;;  %v6850_v15 = vadd.f32 %v6638_v22, %v6465_v4 }
 0x531   :  { %v9869_v12 = vpop.f32.mrb[236].mxu1  ;;  %v15226_v27 = vunpack.c.h.bf16 %v13969_v52  ;;  %v6849_v31 = vadd.f32 %v6639_v14, %v6464_v6  ;;  %v9999_v62 = vpop.f32.mrb[172].mxu0  ;;  %v15229_v63 = vunpack.c.l.bf16 %v14016_v25  ;;  %v15230_v52 = vunpack.c.h.bf16 %v14016_v25 }
 0x532   :  { %v7337_v58 = vadd.f32 %v7336_v8, %v7335_v48  ;;  %v5216_v53 = vpop.f32.mrb[237].mxu1  ;;  %v7338_v10 = vsel %vm517_vm1, %v7103_v55, 0.0  ;;  %v6470_v47 = vadd.f32 %v9869_v12, %v15227_v24  ;;  %v5894_v23 = vpop.f32.mrb[173].mxu0  ;;  %v6598_v42 = vrot.slane %v9999_v62, 1  ;;  %v15235_v62 = vld [vmem:[#allocation81_spill] sm:$0xff] }
 0x533   :  { %v7104_v37 = vmul.f32 %v15226_v27, %v6848_v20  ;;  %v6468_v0 = vadd.f32 %v15228_v28, %v5216_v53  ;;  %v9870_v19 = vpop.f32.mrb[238].mxu1  ;;  %v7105_v2 = vmul.f32 %v15229_v63, %v6849_v31  ;;  %v7106_v1 = vmul.f32 %v15230_v52, %v6850_v15  ;;  %v10000_v6 = vpop.f32.mrb[174].mxu0 }
 0x534   :  { %v7339_v35 = vadd.f32 %v7338_v10, %v7337_v58  ;;  %v5219_v3 = vpop.f32.mrb[239].mxu1  ;;  %v6596_v51 = vrot.slane %v5894_v23, 1  ;;  %v6471_v39 = vadd.f32 %v9870_v19, %v15231_v60  ;;  %v6599_v11 = vrot.slane %v10000_v6, 1  ;;  %v5897_v13 = vpop.f32.mrb[175].mxu0  ;;  %v15236_v10 = vld [vmem:[#allocation6_spill] sm:$0xff]  ;;  %v15239_v6 = vld [vmem:[#allocation7_spill] sm:$0xff] }
 0x535   :  { %v7340_v17 = vsel %vm517_vm1, %v7104_v37, 0.0  ;;  %v7342_v56 = vsel %vm517_vm1, %v7105_v2, 0.0  ;;  %v6469_v4 = vadd.f32 %v15232_v5, %v5219_v3  ;;  %v6597_v57 = vrot.slane %v5897_v13, 1 }
 0x536   :  { %v7341_v38 = vadd.f32 %v7340_v17, %v7339_v35  ;;  %v15233_v26 = vunpack.c.l.bf16 %v14007_v32  ;;  %v6636_v25 = vsel %vm6616_vm3, %v6595_v18, %v6596_v51  ;;  %v6633_v33 = vsel %vm6616_vm3, %v6598_v42, %v6599_v11 }
 0x537   :  { %v6852_v48 = vadd.f32 %v6636_v25, %v6467_v44  ;;  %v6855_v20 = vadd.f32 %v6633_v33, %v6470_v47  ;;  %v6634_v22 = vsel %vm6616_vm3, %v6597_v57, %v6598_v42  ;;  %v7344_v8 = vsel %vm517_vm1, %v7106_v1, 0.0 }
 0x538   :  { %v7107_v55 = vmul.f32 %v15233_v26, %v6851_v9  ;;  %v7343_v50 = vadd.f32 %v7342_v56, %v7341_v38  ;;  %v6635_v14 = vsel %vm6616_vm3, %v6596_v51, %v6597_v57  ;;  %v6854_v15 = vadd.f32 %v6634_v22, %v6469_v4  ;;  %v15240_v38 = vld [vmem:[#allocation82_spill] sm:$0xff] }
 0x539   :  { %v9873_v12 = vpop.f32.mrb[240].mxu1  ;;  %v15234_v58 = vunpack.c.h.bf16 %v14007_v32  ;;  %v6853_v27 = vadd.f32 %v6635_v14, %v6468_v0  ;;  %v10003_v37 = vpop.f32.mrb[176].mxu0  ;;  %v15237_v35 = vunpack.c.l.bf16 %v14054_v49  ;;  %v15238_v32 = vunpack.c.h.bf16 %v14054_v49 }
 0x53a   :  { %v7345_v9 = vadd.f32 %v7344_v8, %v7343_v50  ;;  %v5232_v31 = vpop.f32.mrb[241].mxu1  ;;  %v7346_v44 = vsel %vm517_vm1, %v7107_v55, 0.0  ;;  %v6474_v53 = vadd.f32 %v9873_v12, %v15235_v62  ;;  %v5910_v47 = vpop.f32.mrb[177].mxu0  ;;  %v6602_v52 = vrot.slane %v10003_v37, 1  ;;  %v15244_v37 = vld [vmem:[#allocation8_spill] sm:$0xff] }
 0x53b   :  { %v7108_v18 = vmul.f32 %v15234_v58, %v6852_v48  ;;  %v6472_v24 = vadd.f32 %v15236_v10, %v5232_v31  ;;  %v9874_v28 = vpop.f32.mrb[242].mxu1  ;;  %v7109_v17 = vmul.f32 %v15237_v35, %v6853_v27  ;;  %v7110_v63 = vmul.f32 %v15238_v32, %v6854_v15  ;;  %v10004_v0 = vpop.f32.mrb[178].mxu0  ;;  %v15247_v32 = vld [vmem:[#allocation9_spill] sm:$0xff] }
 0x53c   :  { %v7347_v23 = vadd.f32 %v7346_v44, %v7345_v9  ;;  %v5235_v2 = vpop.f32.mrb[243].mxu1  ;;  %v6600_v1 = vrot.slane %v5910_v47, 1  ;;  %v6475_v3 = vadd.f32 %v9874_v28, %v15239_v6  ;;  %v6603_v42 = vrot.slane %v10004_v0, 1  ;;  %v5913_v51 = vpop.f32.mrb[179].mxu0  ;;  %v15248_v6 = vld [vmem:[#allocation84_spill] sm:$0xff] }
 0x53d   :  { %v7348_v19 = vsel %vm517_vm1, %v7108_v18, 0.0  ;;  %v7350_v13 = vsel %vm517_vm1, %v7109_v17, 0.0  ;;  %v6473_v56 = vadd.f32 %v15240_v38, %v5235_v2  ;;  %v6601_v5 = vrot.slane %v5913_v51, 1  ;;  %v15243_v18 = vld [vmem:[#allocation83_spill] sm:$0xff] }
 0x53e   :  { %v7349_v60 = vadd.f32 %v7348_v19, %v7347_v23  ;;  %v15241_v4 = vunpack.c.l.bf16 %v14045_v59  ;;  %v6632_v49 = vsel %vm6616_vm3, %v6599_v11, %v6600_v1  ;;  %v6629_v26 = vsel %vm6616_vm3, %v6602_v52, %v6603_v42 }
 0x53f   :  { %v6856_v25 = vadd.f32 %v6632_v49, %v6471_v39  ;;  %v6859_v33 = vadd.f32 %v6629_v26, %v6474_v53  ;;  %v6630_v50 = vsel %vm6616_vm3, %v6601_v5, %v6602_v52  ;;  %v7352_v48 = vsel %vm517_vm1, %v7110_v63, 0.0 }
 0x540   :  { %v7111_v57 = vmul.f32 %v15241_v4, %v6855_v20  ;;  %v7351_v55 = vadd.f32 %v7350_v13, %v7349_v60  ;;  %v6631_v22 = vsel %vm6616_vm3, %v6600_v1, %v6601_v5  ;;  %v6858_v8 = vadd.f32 %v6630_v50, %v6473_v56 }
 0x541   :  { %v9877_v14 = vpop.f32.mrb[244].mxu1  ;;  %v15242_v15 = vunpack.c.h.bf16 %v14045_v59  ;;  %v6857_v12 = vadd.f32 %v6631_v22, %v6472_v24  ;;  %v10007_v9 = vpop.f32.mrb[180].mxu0  ;;  %v15245_v47 = vunpack.c.l.bf16 %v14092_v61  ;;  %v15246_v59 = vunpack.c.h.bf16 %v14092_v61 }
 0x542   :  { %v7353_v20 = vadd.f32 %v7352_v48, %v7351_v55  ;;  %v5248_v58 = vpop.f32.mrb[245].mxu1  ;;  %v7354_v39 = vsel %vm517_vm1, %v7111_v57, 0.0  ;;  %v6478_v27 = vadd.f32 %v9877_v14, %v15243_v18  ;;  %v5926_v44 = vpop.f32.mrb[181].mxu0  ;;  %v6606_v35 = vrot.slane %v10007_v9, 1 }
 0x543   :  { %v7112_v11 = vmul.f32 %v15242_v15, %v6856_v25  ;;  %v6476_v31 = vadd.f32 %v15244_v37, %v5248_v58  ;;  %v9878_v62 = vpop.f32.mrb[246].mxu1  ;;  %v7113_v28 = vmul.f32 %v15245_v47, %v6857_v12  ;;  %v7114_v23 = vmul.f32 %v15246_v59, %v6858_v8  ;;  %v10008_v24 = vpop.f32.mrb[182].mxu0  ;;  %v15255_v47 = vld [vmem:[#allocation10_spill] sm:$0xff] }
 0x544   :  { %v7355_v53 = vadd.f32 %v7354_v39, %v7353_v20  ;;  %v5251_v19 = vpop.f32.mrb[247].mxu1  ;;  %v6604_v17 = vrot.slane %v5926_v44, 1  ;;  %v6479_v63 = vadd.f32 %v9878_v62, %v15247_v32  ;;  %v6607_v0 = vrot.slane %v10008_v24, 1  ;;  %v5929_v2 = vpop.f32.mrb[183].mxu0  ;;  %v15251_v20 = vld [vmem:[#allocation11_spill] sm:$0xff] }
 0x545   :  { %v7356_v10 = vsel %vm517_vm1, %v7112_v11, 0.0  ;;  %v7358_v1 = vsel %vm517_vm1, %v7113_v28, 0.0  ;;  %v6477_v51 = vadd.f32 %v15248_v6, %v5251_v19  ;;  %v6605_v60 = vrot.slane %v5929_v2, 1  ;;  %v15252_v11 = vld [vmem:[#allocation129_spill] sm:$0xff] }
 0x546   :  { %v7357_v52 = vadd.f32 %v7356_v10, %v7355_v53  ;;  %v15249_v13 = vunpack.c.l.bf16 %v14083_v29  ;;  %v6628_v61 = vsel %vm6616_vm3, %v6603_v42, %v6604_v17  ;;  %v6625_v56 = vsel %vm6616_vm3, %v6606_v35, %v6607_v0 }
 0x547   :  { %v6860_v4 = vadd.f32 %v6628_v61, %v6475_v3  ;;  %v6863_v57 = vadd.f32 %v6625_v56, %v6478_v27  ;;  %v6626_v49 = vsel %vm6616_vm3, %v6605_v60, %v6606_v35  ;;  %v7360_v26 = vsel %vm517_vm1, %v7114_v23, 0.0  ;;  %v15256_v35 = vld [vmem:[#allocation85_spill] sm:$0xff] }
 0x548   :  { %v7115_v38 = vmul.f32 %v15249_v13, %v6859_v33  ;;  %v7359_v5 = vadd.f32 %v7358_v1, %v7357_v52  ;;  %v6627_v55 = vsel %vm6616_vm3, %v6604_v17, %v6605_v60  ;;  %v6862_v25 = vadd.f32 %v6626_v49, %v6477_v51 }
 0x549   :  { %v9881_v50 = vpop.f32.mrb[248].mxu1  ;;  %v15250_v48 = vunpack.c.h.bf16 %v14083_v29  ;;  %v6861_v22 = vadd.f32 %v6627_v55, %v6476_v31  ;;  %v10011_v8 = vpop.f32.mrb[184].mxu0  ;;  %v15253_v27 = vunpack.c.l.bf16 %v14130_v30  ;;  %v15254_v29 = vunpack.c.h.bf16 %v14130_v30 }
 0x54a   :  { %v7361_v33 = vadd.f32 %v7360_v26, %v7359_v5  ;;  %v5264_v14 = vpop.f32.mrb[249].mxu1  ;;  %v7362_v3 = vsel %vm517_vm1, %v7115_v38, 0.0  ;;  %v6482_v15 = vadd.f32 %v9881_v50, %v15251_v20  ;;  %v5942_v9 = vpop.f32.mrb[185].mxu0  ;;  %v6610_v53 = vrot.slane %v10011_v8, 1 }
 0x54b   :  { %v7116_v42 = vmul.f32 %v15250_v48, %v6860_v4  ;;  %v6480_v12 = vadd.f32 %v15252_v11, %v5264_v14  ;;  %v9882_v58 = vpop.f32.mrb[250].mxu1  ;;  %v7117_v37 = vmul.f32 %v15253_v27, %v6861_v22  ;;  %v7118_v44 = vmul.f32 %v15254_v29, %v6862_v25  ;;  %v10012_v31 = vpop.f32.mrb[186].mxu0  ;;  %v15259_v25 = vld [vmem:[#allocation87_spill] sm:$0xff] }
 0x54c   :  { %v7363_v39 = vadd.f32 %v7362_v3, %v7361_v33  ;;  %v5267_v62 = vpop.f32.mrb[251].mxu1  ;;  %v6608_v10 = vrot.slane %v5942_v9, 1  ;;  %v6483_v28 = vadd.f32 %v9882_v58, %v15255_v47  ;;  %v6611_v59 = vrot.slane %v10012_v31, 1  ;;  %v5945_v23 = vpop.f32.mrb[187].mxu0  ;;  %v15260_v33 = vld [vmem:[#allocation86_spill] sm:$0xff]  ;;  %v15264_v31 = vld [vmem:[#allocation88_spill] sm:$0xff] }
 0x54d   :  { %v7364_v18 = vsel %vm517_vm1, %v7116_v42, 0.0  ;;  %v7366_v19 = vsel %vm517_vm1, %v7117_v37, 0.0  ;;  %v6481_v17 = vadd.f32 %v15256_v35, %v5267_v62  ;;  %v6609_v32 = vrot.slane %v5945_v23, 1 }
 0x54e   :  { %v7365_v24 = vadd.f32 %v7364_v18, %v7363_v39  ;;  %v15257_v2 = vunpack.c.l.bf16 %v14121_v40  ;;  %v6624_v30 = vsel %vm6616_vm3, %v6607_v0, %v6608_v10  ;;  %v6621_v1 = vsel %vm6616_vm3, %v6610_v53, %v6611_v59  ;;  %v15263_v39 = vld [vmem:[#allocation12_spill] sm:$0xff] }
 0x54f   :  { %v6864_v51 = vadd.f32 %v6624_v30, %v6479_v63  ;;  %v6867_v60 = vadd.f32 %v6621_v1, %v6482_v15  ;;  %v6622_v13 = vsel %vm6616_vm3, %v6609_v32, %v6610_v53  ;;  %v7368_v38 = vsel %vm517_vm1, %v7118_v44, 0.0 }
 0x550   :  { %v7119_v52 = vmul.f32 %v15257_v2, %v6863_v57  ;;  %v7367_v6 = vadd.f32 %v7366_v19, %v7365_v24  ;;  %v6623_v61 = vsel %vm6616_vm3, %v6608_v10, %v6609_v32  ;;  %v6866_v56 = vadd.f32 %v6622_v13, %v6481_v17  ;;  %v15266_v24 = vld [vmem:[#allocation89_spill] sm:$0xff] }
 0x551   :  { %v9885_v5 = vpop.f32.mrb[252].mxu1  ;;  %v15258_v57 = vunpack.c.h.bf16 %v14121_v40  ;;  %v6865_v49 = vadd.f32 %v6623_v61, %v6480_v12  ;;  %v10015_v26 = vpop.f32.mrb[188].mxu0  ;;  %v15261_v3 = vunpack.c.l.bf16 %v14168_v34  ;;  %v15262_v40 = vunpack.c.h.bf16 %v14168_v34 }
 0x552   :  { %v7369_v4 = vadd.f32 %v7368_v38, %v7367_v6  ;;  %v5280_v55 = vpop.f32.mrb[253].mxu1  ;;  %v7370_v63 = vsel %vm517_vm1, %v7119_v52, 0.0  ;;  %v6486_v50 = vadd.f32 %v9885_v5, %v15259_v25  ;;  %v5958_v42 = vpop.f32.mrb[189].mxu0  ;;  %v6614_v9 = vrot.slane %v10015_v26, 1 }
 0x553   :  { %v7120_v0 = vmul.f32 %v15258_v57, %v6864_v51  ;;  %v6484_v48 = vadd.f32 %v15260_v33, %v5280_v55  ;;  %v9886_v22 = vpop.f32.mrb[254].mxu1  ;;  %v7121_v20 = vmul.f32 %v15261_v3, %v6865_v49  ;;  %v7122_v15 = vmul.f32 %v15262_v40, %v6866_v56  ;;  %v10016_v11 = vpop.f32.mrb[190].mxu0 }
 0x554   :  { %v7371_v8 = vadd.f32 %v7370_v63, %v7369_v4  ;;  %v5283_v12 = vpop.f32.mrb[255].mxu1  ;;  %v6612_v58 = vrot.slane %v5958_v42, 1  ;;  %v6487_v18 = vadd.f32 %v9886_v22, %v15263_v39  ;;  %v6615_v27 = vrot.slane %v10016_v11, 1  ;;  %v5961_v37 = vpop.f32.mrb[191].mxu0 }
 0x555   :  { %v7372_v14 = vsel %vm517_vm1, %v7120_v0, 0.0  ;;  %v7374_v44 = vsel %vm517_vm1, %v7121_v20, 0.0  ;;  %v6485_v62 = vadd.f32 %v15264_v31, %v5283_v12  ;;  %v6613_v53 = vrot.slane %v5961_v37, 1  ;;  %v7129_v20 = vld [vmem:[#allocation2] sm:$0x3] }
 0x556   :  { %v7373_v29 = vadd.f32 %v7372_v14, %v7371_v8  ;;  %v15265_v10 = vunpack.c.l.bf16 %v14159_v36  ;;  %v6620_v34 = vsel %vm6616_vm3, %v6611_v59, %v6612_v58  ;;  %v6617_v23 = vsel %vm6616_vm3, %v6614_v9, %v6615_v27 }
 0x557   :  { %v15267_v19 = vrot.slane %v15266_v24, 1  ;;  %v6868_v32 = vadd.f32 %v6620_v34, %v6483_v28  ;;  %v6871_v2 = vadd.f32 %v6617_v23, %v6486_v50  ;;  %v7376_v30 = vsel %vm517_vm1, %v7122_v15, 0.0 }
 0x558   :  { %v7123_v47 = vmul.f32 %v15265_v10, %v6867_v60  ;;  %v7375_v17 = vadd.f32 %v7374_v44, %v7373_v29  ;;  %v6618_v1 = vsel %vm6616_vm3, %v6613_v53, %v6614_v9  ;;  %v6619_v59 = vsel %vm6616_vm3, %v6612_v58, %v6613_v53 }
 0x559   :  { %v6744_v35 = vsel %vm6616_vm3, %v6615_v27, %v15267_v19  ;;  %v7124_v51 = vmul.f32 %v8222_v41, %v6868_v32  ;;  %v6869_v13 = vadd.f32 %v6619_v59, %v6484_v48  ;;  %v6870_v38 = vadd.f32 %v6618_v1, %v6485_v62 }
 0x55a   :  { %v6872_v52 = vadd.f32 %v6744_v35, %v6487_v18  ;;  %v7377_v6 = vadd.f32 %v7376_v30, %v7375_v17  ;;  %v7378_v60 = vsel %vm517_vm1, %v7123_v47, 0.0  ;;  %v15268_v56 = vunpack.c.l.bf16 %v14206_v46 }
 0x55b   :  { %v7380_v28 = vsel %vm517_vm1, %v7124_v51, 0.0  ;;  %v7126_v4 = vmul.f32 %v8226_v21, %v6870_v38  ;;  %v7257_v57 = vrot.slane %v14273_v16, 4  ;;  %v7127_v36 = vmul.f32 %v8229_v54, %v6871_v2 }
 0x55c   :  { %v7379_v61 = vadd.f32 %v7378_v60, %v7377_v6  ;;  %v7125_v5 = vmul.f32 %v15268_v56, %v6869_v13  ;;  %v7128_v26 = vmul.f32 %v8230_v7, %v6872_v52  ;;  %v10945_v11 = vmov 1966171168  }
 0x55d   :  { %v7384_v55 = vsel %vm517_vm1, %v7126_v4, 0.0  ;;  %v7258_v63 = vadd.f32 %v7257_v57, %v14273_v16  ;;  %v7386_v46 = vsel %vm517_vm1, %v7127_v36, 0.0  ;;  %v7411_v12 = vunpack.c.l.s4 %v10945_v11 }
 0x55e   :  { %v7381_v0 = vadd.f32 %v7380_v28, %v7379_v61  ;;  %v7382_v41 = vsel %vm517_vm1, %v7125_v5, 0.0  ;;  %v7388_v50 = vsel %vm517_vm1, %v7128_v26, 0.0 }
 0x55f   :  { %v7259_v33 = vrot.slane %v7258_v63, 2  ;;  %v7412_v9 = vunpack.c.0.s8 %v7411_v12 }
 0x560   :  { %v7383_v49 = vadd.f32 %v7382_v41, %v7381_v0 }
 0x561   :  { %v7260_v54 = vadd.f32 %v7259_v33, %v7258_v63  ;;  %v7415_v58 = vsub.s32 %v7412_v9, %v12652_v43 }
 0x562   :  { %v7385_v25 = vadd.f32 %v7384_v55, %v7383_v49 }
 0x563   :  { %v7261_v14 = vrot.slane %v7260_v54, 1 }
 0x564   :  { %v7387_v21 = vadd.f32 %v7386_v46, %v7385_v25 }
 0x565   :  { %v7262_v7 = vadd.f32 %v7261_v14, %v7260_v54 }
 0x566   :  { %v7389_v48 = vadd.f32 %v7388_v50, %v7387_v21 }
 0x568   :  { %v7390_v42 = vrot.slane %v7389_v48, 4 }
 0x56a   :  { %v7391_v22 = vadd.f32 %v7390_v42, %v7389_v48 }
 0x56c   :  { %v7392_v8 = vrot.slane %v7391_v22, 2 }
 0x56e   :  { %v7393_v3 = vadd.f32 %v7392_v8, %v7391_v22 }
 0x570   :  { %v7394_v45 = vrot.slane %v7393_v3, 1 }
 0x572   :  { %v7395_v40 = vadd.f32 %v7394_v45, %v7393_v3 }
 0x574   :  { %v7399_v16 = vsel %vm7398_vm5, %v7395_v40, %v7262_v7 }
 0x575   :  { %v7401_v15 = vadd.f32 %v7399_v16, %v7129_v20 }
 0x577   :  { %7403 = vst.msk [vmem:[#allocation2] sm:$0x3] %vm44_vm4, %v7401_v15 }
 0x57e   :  { %v7407_v39 = vld [vmem:[#allocation2] sm:$0x3] }
 0x57f   :  { %v7408_v18 = vmul.f32 0.00390625, %v7407_v39 }
 0x581   :  { %v7416_v27 = vrot.slane %v7408_v18, %v7415_v58 }
 0x583   :  { %v7417_v37 = vcombine.high %v7416_v27, %v7416_v27  ;;  %v7424_v29 = vrot.slane %v7416_v27, %v7415_v58 }
 0x585   :  { %v7431_v44 = vrot.slane %v7417_v37, %v7415_v58  ;;  %7435 = vst.msk [vmem:[%s14657_s3] sm:$0x1] %vm7434_vm6, %v7424_v29 }
 0x587   :  { %7436 = vst.msk [vmem:[%s14657_s3 + $0x1] sm:$0x1] %vm7434_vm6, %v7431_v44 }

</bundles_post_ra>
